<compile_context>
chip_gen: v7x
topology: tpu7x:2x2x1
jax: 0.10.0
libtpu: 0.0.40
codegen_flags: <defaults>
</compile_context>

<pallas_src>
import functools

import jax
import jax.numpy as jnp
from jax import lax
from jax.experimental import pallas as pl
from jax.experimental.pallas import tpu as pltpu

TEMPERATURE = 0.05
_MIB = 1024 * 1024


def _round_up(x, m):
    return (x + m - 1) // m * m


def _cdiv(a, b):
    return -(-a // b)


# ---------------------------------------------------------------------------
# Gather path: O(B*K*D) work, fully stable (running max), row-tiled grid.
# ---------------------------------------------------------------------------
def _gather_kernel(f1_ref, f2_ref, g_ref, mapped_ref, out_ref, *, temperature):
    inv_t = 1.0 / temperature
    K = g_ref.shape[0]
    f1r = f1_ref[...].astype(jnp.float32)
    f2r = f2_ref[...].astype(jnp.float32)
    spos = jnp.sum(f1r * f2r, axis=1, keepdims=True) * inv_t        # s_pos / T  [tb,1]

    m = mapped_ref[...]                                             # [tb, K] int32
    s_list, dup_list = [], []
    for k in range(K):                                              # K static & small
        gk = g_ref[k].astype(jnp.float32)                           # [tb, D]
        s_list.append(jnp.sum(gk * f2r, axis=1, keepdims=True) * inv_t)
        dup = None                                                  # dedup: count each column once
        for k2 in range(k):
            eq = m[:, k:k + 1] == m[:, k2:k2 + 1]
            dup = eq if dup is None else jnp.logical_or(dup, eq)
        dup_list.append(dup)

    # Flash-style shift by the running max -> stable for arbitrary feature scales.
    mx = spos
    for s_k in s_list:
        mx = jnp.maximum(mx, s_k)
    p = jnp.exp(spos - mx)
    ng = jnp.zeros_like(p)
    for s_k, dup in zip(s_list, dup_list):
        e = jnp.exp(s_k - mx)
        if dup is not None:
            e = jnp.where(dup, 0.0, e)
        ng = ng + e
    # -log(pos/(Ng+pos)) = log(Ng+pos) - log(pos), everything shifted by mx.
    loss = jnp.log(ng + p) - (spos - mx)                            # [tb, 1]
    out_ref[...] = jnp.broadcast_to(loss, out_ref.shape)            # lane-dense store


def _gather_vmem_bytes(tb, D, K, itemsize):
    ins = 2 * ((2 + K) * tb * D * itemsize + tb * K * 4)            # double-buffered inputs
    outs = 2 * tb * 128 * 4
    live = 4 * tb * D * 4                                           # f32 upcast temporaries
    return ins + outs + live


def _gather_loss(f1, f2, hi, temperature, block_rows):
    B, D = f1.shape
    K = hi.shape[1]
    itemsize = jnp.dtype(f1.dtype).itemsize

    rows = jnp.arange(B, dtype=jnp.int32)[:, None]
    mapped = hi + (hi >= rows).astype(jnp.int32)                    # full-matrix column ids [B,K]
    # One bulk gather of the K hard-negative feature rows per sample (O(B*K*D),
    # vs. the O(B^2*D) dense score pass).
    # TODO(synk): an in-kernel SMEM-indexed DMA gather (pl.ANY + make_async_copy)
    # could replace this wrapper-side take, but TB*K tiny row DMAs per tile are
    # slower than one bulk gather for typical K.
    g = jnp.take(f1, jnp.reshape(mapped.T, (-1,)), axis=0).reshape(K, B, D)

    if block_rows is None:
        tb = min(256, _round_up(max(_cdiv(B, 2), 8), 8))            # nr >= 2 => megacore busy
        while _gather_vmem_bytes(tb, D, K, itemsize) > 32 * _MIB and tb > 64:
            tb = max(64, _round_up(tb // 2, 8))
    else:
        tb = int(block_rows)
    assert tb % 8 == 0, "row tile must be a multiple of 8"

    br = _round_up(B, tb)
    if br != B:
        pad = br - B
        f1 = jnp.pad(f1, ((0, pad), (0, 0)))
        f2 = jnp.pad(f2, ((0, pad), (0, 0)))
        g = jnp.pad(g, ((0, 0), (0, pad), (0, 0)))
        mapped = jnp.pad(mapped, ((0, pad), (0, 0)))
    nr = br // tb

    needed = _gather_vmem_bytes(tb, D, K, itemsize)
    kernel = functools.partial(_gather_kernel, temperature=float(temperature))
    out = pl.pallas_call(
        kernel,
        out_shape=jax.ShapeDtypeStruct((br, 128), jnp.float32),
        grid_spec=pltpu.PrefetchScalarGridSpec(
            num_scalar_prefetch=0,
            grid=(nr,),
            in_specs=[
                pl.BlockSpec((tb, D), lambda i: (i, 0)),            # f1 rows (positive logit)
                pl.BlockSpec((tb, D), lambda i: (i, 0)),            # f2 rows
                pl.BlockSpec((K, tb, D), lambda i: (0, i, 0)),      # gathered hard-neg rows
                pl.BlockSpec((tb, K), lambda i: (i, 0)),            # mapped ids (dedup)
            ],
            out_specs=pl.BlockSpec((tb, 128), lambda i: (i, 0)),
        ),
        compiler_params=pltpu.CompilerParams(
            dimension_semantics=("parallel",),
            vmem_limit_bytes=int(min(48 * _MIB, max(2 * needed, 32 * _MIB))),
        ),
    )(f1, f2, g, mapped)

    # NOTE: keep this [:B] slice in sync with the (br, 128) broadcast output layout.
    return jnp.sum(out[:B, 0]) / B


# ---------------------------------------------------------------------------
# Dense path: tiled [row-tile x column-tile] score matrix (for K ~ B).
# ---------------------------------------------------------------------------
def _dense_kernel(f1_row_ref, f2_row_ref, f1_col_ref, hi_ref, out_ref,
                  f2s_ref, spos_ref, ng_ref, mapped_ref, cols_ref,
                  *, temperature, idx_dtype, pretransposed):
    i = pl.program_id(0)                   # row-tile index     ("parallel")
    j = pl.program_id(1)                   # column-tile index  (reduction, innermost)
    nj = pl.num_programs(1)
    tb = f2_row_ref.shape[0]
    tc = cols_ref.shape[1]
    inv_t = 1.0 / temperature

    # ---- per-row-tile init (once, at the first column tile) -----------------
    @pl.when(j == 0)
    def _init():
        # Fold 1/T into the f2 row tile once (hidden under the input pipeline),
        # so the per-element path below has no multiply.
        f2s_ref[...] = f2_row_ref[...] * inv_t
        # Positive logit, already scaled by 1/T (same rounding path as the
        # negatives, so the shift below cancels the common error).
        f1r = f1_row_ref[...].astype(jnp.float32)
        spos_ref[...] = jnp.sum(f2s_ref[...].astype(jnp.float32) * f1r,
                                axis=1, keepdims=True)
        ng_ref[...] = jnp.zeros_like(ng_ref)
        # Compact (diagonal-removed) [B, B-1] index -> full column index.
        hi = hi_ref[...]
        row = i * tb + lax.broadcasted_iota(jnp.int32, hi.shape, 0)
        mapped_ref[...] = hi + (hi >= row).astype(jnp.int32)
        # Column iota, materialized once and reused for every column tile (the
        # j*tc offset is applied to `mapped`, a [tb,K] op, not per element).
        cols_ref[...] = lax.broadcasted_iota(jnp.int32, (tb, tc), 1).astype(idx_dtype)

    # ---- scores for this (row, column) tile: MXU, f32 accumulation ----------
    if pretransposed:
        # f1 column tile arrives as (D, tc) (wrapper-side transpose; v5e option).
        s = jnp.dot(f2s_ref[...], f1_col_ref[...],
                    preferred_element_type=jnp.float32)
    else:
        # f1 column tile arrives untransposed as (tc, D): contract dim1 x dim1,
        # no extra XLA transpose pass over f1 in HBM.
        s = lax.dot_general(f2s_ref[...], f1_col_ref[...],
                            dimension_numbers=(((1,), (1,)), ((), ())),
                            preferred_element_type=jnp.float32)

    # ---- hard-negative mask for this column tile (narrow compares) ----------
    local = (mapped_ref[...] - j * tc).astype(idx_dtype)            # [tb, K]
    cols = cols_ref[...]                                            # [tb, tc]
    mask = local[:, 0:1] == cols
    for k in range(1, local.shape[1]):                              # K static & small
        mask = jnp.logical_or(mask, local[:, k:k + 1] == cols)

    # ---- single exp pass + on-chip accumulation ------------------------------
    # `s` and `spos` are already scaled by 1/T; the s_pos shift keeps the
    # exponent bounded for (L2-normalized) contrastive features.
    shifted = s - spos_ref[...]
    e = jnp.where(mask, jnp.exp(shifted), 0.0)
    ng_ref[...] += jnp.sum(e, axis=1, keepdims=True)

    # ---- finalize per-row losses at the last column tile ---------------------
    @pl.when(j == nj - 1)
    def _finalize():
        # -log(pos/(Ng+pos)) == log(1 + Ng/pos) == log(1 + ng)
        loss = jnp.log(1.0 + ng_ref[...])                           # [tb, 1]
        out_ref[...] = jnp.broadcast_to(loss, out_ref.shape)        # lane-dense store


def _dense_vmem_bytes(tb, tc, D, K, itemsize, idx_itemsize):
    ins = 2 * (2 * tb * D * itemsize + tc * D * itemsize + tb * K * 4)   # double-buffered
    outs = 2 * tb * 128 * 4
    scratch = tb * D * itemsize + tb * tc * idx_itemsize + tb * K * 4 + 2 * tb * 4
    live = 4 * tb * tc * 4                                               # s/mask/exp temporaries
    return ins + outs + scratch + live


def _pick_dense_tiles(B, D, K, itemsize):
    idx_itemsize = 2 if B < 2 ** 15 else 4
    # Rows: keep nr >= 2 so both TensorCores get work on v7x megacore.
    tb = min(512, _round_up(max(_cdiv(B, 2), 8), 8))
    tc = min(512, _round_up(B, 128))
    # Shrink columns first (a larger tb cuts the total f1-column re-read traffic).
    while _dense_vmem_bytes(tb, tc, D, K, itemsize, idx_itemsize) > 32 * _MIB:
        if tc > 128:
            tc //= 2
        elif tb > 64:
            tb = max(64, _round_up(tb // 2, 8))
        else:
            break
    return tb, tc


def _maybe_buffered(block_shape, index_map, buffers):
    """BlockSpec with deeper multi-buffering when supported (hides the f1-column DMA)."""
    if buffers and buffers > 2 and hasattr(pl, "Buffered"):
        try:
            return pl.BlockSpec(block_shape, index_map, pipeline_mode=pl.Buffered(buffers))
        except TypeError:                      # BlockSpec without pipeline_mode support
            pass
    return pl.BlockSpec(block_shape, index_map)


def _dense_loss(f1, f2, hi, temperature, block_rows, block_cols, pretranspose_f1):
    B, D = f1.shape
    K = hi.shape[1]
    itemsize = jnp.dtype(f1.dtype).itemsize
    if block_rows is None or block_cols is None:
        tb, tc = _pick_dense_tiles(B, D, K, itemsize)
    else:
        tb, tc = int(block_rows), int(block_cols)
    assert tb % 8 == 0 and tc % 8 == 0, "tile sizes must be multiples of 8"

    # Rows and columns are padded independently (no lcm(tb, tc) padding waste).
    br, bc = _round_up(B, tb), _round_up(B, tc)
    f1r = jnp.pad(f1, ((0, br - B), (0, 0))) if br != B else f1
    f2r = jnp.pad(f2, ((0, br - B), (0, 0))) if br != B else f2
    hir = jnp.pad(hi, ((0, br - B), (0, 0))) if br != B else hi
    f1c = jnp.pad(f1, ((0, bc - B), (0, 0))) if bc != B else f1
    if pretranspose_f1:
        f1c = f1c.T                                      # (D, bc): classic MXU feed (v5e)
    nr, nc = br // tb, bc // tc
    buffers = 3 if nc >= 3 else 0

    def run(idx_dtype):
        needed = _dense_vmem_bytes(tb, tc, D, K, itemsize, jnp.dtype(idx_dtype).itemsize)
        if pretranspose_f1:
            col_spec = _maybe_buffered((D, tc), lambda i, j: (0, j), buffers)
        else:
            col_spec = _maybe_buffered((tc, D), lambda i, j: (j, 0), buffers)
        kernel = functools.partial(_dense_kernel, temperature=float(temperature),
                                   idx_dtype=idx_dtype, pretransposed=pretranspose_f1)
        return pl.pallas_call(
            kernel,
            out_shape=jax.ShapeDtypeStruct((br, 128), jnp.float32),
            grid_spec=pltpu.PrefetchScalarGridSpec(
                num_scalar_prefetch=0,
                grid=(nr, nc),                                   # (row tiles, column tiles)
                in_specs=[
                    pl.BlockSpec((tb, D), lambda i, j: (i, 0)),  # f1 row tile (positive logit)
                    pl.BlockSpec((tb, D), lambda i, j: (i, 0)),  # f2 row tile
                    col_spec,                                    # f1 column tile
                    pl.BlockSpec((tb, K), lambda i, j: (i, 0)),  # hard indices row tile
                ],
                out_specs=pl.BlockSpec((tb, 128), lambda i, j: (i, 0)),
                scratch_shapes=[
                    pltpu.VMEM((tb, D), f2.dtype),               # f2/T row tile
                    pltpu.VMEM((tb, 1), jnp.float32),            # s_pos/T
                    pltpu.VMEM((tb, 1), jnp.float32),            # Ng accumulator
                    pltpu.VMEM((tb, K), jnp.int32),              # mapped hard columns
                    pltpu.VMEM((tb, tc), idx_dtype),             # hoisted column iota
                ],
            ),
            compiler_params=pltpu.CompilerParams(
                dimension_semantics=("parallel", "arbitrary"),
                vmem_limit_bytes=int(min(48 * _MIB, max(2 * needed, 32 * _MIB))),
            ),
        )(f1r, f2r, f1c, hir)

    # 16-bit index compares double the packed VPU compare/OR throughput on
    # v6e/v7x; fall back to int32 if the toolchain rejects the narrow lowering.
    candidates = [jnp.int16, jnp.int32] if max(br, bc) < 2 ** 15 else [jnp.int32]
    out, last_err = None, None
    for idx_dtype in candidates:
        try:
            out = jax.block_until_ready(run(idx_dtype))
            break
        except Exception as e:                 # pragma: no cover (older-toolchain fallback)
            out, last_err = None, e
    if out is None:
        raise last_err

    # NOTE: keep this [:B] slice in sync with the (br, 128) broadcast output layout.
    return jnp.sum(out[:B, 0]) / B


# ---------------------------------------------------------------------------
# Public wrapper.
# ---------------------------------------------------------------------------
def vascl_nunidir(features_1, features_2, hard_indices, temperature=TEMPERATURE,
                  method="auto", block_rows=None, block_cols=None,
                  pretranspose_f1=False):
    """Pallas implementation of VaSCL_NUniDir.forward; returns {'lds_loss': scalar}."""
    B = features_1.shape[0]
    K = hard_indices.shape[1]
    hi = hard_indices.astype(jnp.int32)
    if method == "auto":
        # The dense path touches B*B scores to keep only B*K of them; the gather
        # path wins whenever K << B (the usual few-hard-negatives regime).
        method = "gather" if K * 16 <= B else "dense"
    if method == "gather":
        loss = _gather_loss(features_1, features_2, hi, temperature, block_rows)
    elif method == "dense":
        loss = _dense_loss(features_1, features_2, hi, temperature,
                           block_rows, block_cols, pretranspose_f1)
    else:
        raise ValueError(f"unknown method: {method}")
    return {"lds_loss": loss}


def _reference(f1, f2, hi, temperature=TEMPERATURE):
    """Pure-numpy float64 reference mirroring the PyTorch code."""
    import numpy as np
    f1 = np.asarray(f1, dtype=np.float64)
    f2 = np.asarray(f2, dtype=np.float64)
    hi = np.asarray(hi)
    B = f1.shape[0]
    pos = np.exp(np.sum(f1 * f2, axis=-1) / temperature)
    neg_full = np.exp(f2 @ f1.T / temperature)
    mask = ~np.eye(B, dtype=bool)
    neg = neg_full[mask].reshape(B, B - 1)
    hard_mask = np.zeros_like(neg, dtype=bool)
    np.put_along_axis(hard_mask, hi, True, axis=1)     # == scatter_(1, idx, 1) > 0
    ng = np.where(hard_mask, neg, 0.0).sum(-1)
    return float(np.mean(-np.log(pos / (ng + pos))))


if __name__ == "__main__":
    import numpy as np

    B, D, K = 256, 32, 4
    key = jax.random.PRNGKey(0)
    k1, k2, k3 = jax.random.split(key, 3)

    f1 = jax.random.normal(k1, (B, D), dtype=jnp.float32)
    f2 = jax.random.normal(k2, (B, D), dtype=jnp.float32)
    # L2-normalize (typical for contrastive features; keeps exp(./0.05) tame).
    f1 = f1 / jnp.linalg.norm(f1, axis=-1, keepdims=True)
    f2 = f2 / jnp.linalg.norm(f2, axis=-1, keepdims=True)

    # K distinct hard-negative indices per row into the compact [B, B-1] matrix.
    u = jax.random.uniform(k3, (B, B - 1))
    hard = jnp.argsort(u, axis=1)[:, :K].astype(jnp.int32)

    ref = _reference(np.asarray(f1), np.asarray(f2), np.asarray(hard))

    # 1) gather path (auto default for K << B)
    out = vascl_nunidir(f1, f2, hard)["lds_loss"]
    np.testing.assert_allclose(float(jax.block_until_ready(out)), ref, rtol=1e-3, atol=1e-3)

    # 2) gather path with explicit small row tiles (multi-step "parallel" grid)
    out = vascl_nunidir(f1, f2, hard, method="gather", block_rows=64)["lds_loss"]
    np.testing.assert_allclose(float(jax.block_until_ready(out)), ref, rtol=1e-3, atol=1e-3)

    # 3) dense path, auto tiles (nr >= 2, int16 compares, lane-dense output)
    out = vascl_nunidir(f1, f2, hard, method="dense")["lds_loss"]
    np.testing.assert_allclose(float(jax.block_until_ready(out)), ref, rtol=1e-3, atol=1e-3)

    # 4) dense path, small explicit tiles: exercises multi-column accumulation,
    #    the pl.when init/finalize paths and the deeper f1-column buffering.
    out = vascl_nunidir(f1, f2, hard, method="dense",
                        block_rows=64, block_cols=64)["lds_loss"]
    np.testing.assert_allclose(float(jax.block_until_ready(out)), ref, rtol=1e-3, atol=1e-3)

    # 5) dense path with a wrapper-side pre-transposed f1 (v5e-friendly MXU feed)
    out = vascl_nunidir(f1, f2, hard, method="dense", pretranspose_f1=True)["lds_loss"]
    np.testing.assert_allclose(float(jax.block_until_ready(out)), ref, rtol=1e-3, atol=1e-3)

    # 6) duplicate hard indices: scatter/mask semantics count each column once
    hard_dup = hard.at[:, -1].set(hard[:, 0])
    ref_dup = _reference(np.asarray(f1), np.asarray(f2), np.asarray(hard_dup))
    out = vascl_nunidir(f1, f2, hard_dup, method="gather")["lds_loss"]
    np.testing.assert_allclose(float(jax.block_until_ready(out)), ref_dup, rtol=1e-3, atol=1e-3)
    out = vascl_nunidir(f1, f2, hard_dup, method="dense")["lds_loss"]
    np.testing.assert_allclose(float(jax.block_until_ready(out)), ref_dup, rtol=1e-3, atol=1e-3)

    # 7) bf16 feature smoke test (production dtype: half the HBM traffic, 2x MXU)
    out_bf16 = vascl_nunidir(f1.astype(jnp.bfloat16), f2.astype(jnp.bfloat16),
                             hard, method="dense")["lds_loss"]
    out_bf16 = float(jax.block_until_ready(out_bf16))
    assert np.isfinite(out_bf16) and abs(out_bf16 - ref) / max(abs(ref), 1e-6) < 0.1

    print("KERNEL_OK")
</pallas_src>

<mosaic_0001>
module attributes {stable_mosaic.version = 11 : i64} {
  func.func @_gather_kernel(%arg0: i32, %arg1: memref<128x32xf32, #tpu.memory_space<vmem>>, %arg2: memref<128x32xf32, #tpu.memory_space<vmem>>, %arg3: memref<4x128x32xf32, #tpu.memory_space<vmem>>, %arg4: memref<128x4xi32, #tpu.memory_space<vmem>>, %arg5: memref<128x128xf32, #tpu.memory_space<vmem>>) attributes {dimension_semantics = [#tpu.dimension_semantics<parallel>], iteration_bounds = array<i64: 2>, scalar_prefetch = 0 : i64, scratch_operands = 0 : i64, tpu.core_type = #tpu.core_type<tc>, window_params = [{transform_indices = @transform_0, window_bounds = array<i64: 128, 32>}, {transform_indices = @transform_1, window_bounds = array<i64: 128, 32>}, {transform_indices = @transform_2, window_bounds = array<i64: 4, 128, 32>}, {transform_indices = @transform_3, window_bounds = array<i64: 128, 4>}, {transform_indices = @transform_4, window_bounds = array<i64: 128, 128>}]} {
    %c0 = arith.constant 0 : index
    %c0_0 = arith.constant 0 : index
    %0 = vector.load %arg1[%c0, %c0_0] : memref<128x32xf32, #tpu.memory_space<vmem>>, vector<128x32xf32>
    %c0_1 = arith.constant 0 : index
    %c0_2 = arith.constant 0 : index
    %1 = vector.load %arg2[%c0_1, %c0_2] : memref<128x32xf32, #tpu.memory_space<vmem>>, vector<128x32xf32>
    %2 = arith.mulf %0, %1 : vector<128x32xf32>
    %cst = arith.constant dense<0.000000e+00> : vector<128xf32>
    %3 = vector.multi_reduction <add>, %2, %cst [1] : vector<128x32xf32> to vector<128xf32>
    %4 = vector.shape_cast %3 : vector<128xf32> to vector<128x1xf32>
    %cst_3 = arith.constant 2.000000e+01 : f32
    %5 = vector.broadcast %cst_3 : f32 to vector<128x1xf32>
    %6 = arith.mulf %4, %5 : vector<128x1xf32>
    %c0_4 = arith.constant 0 : index
    %c0_5 = arith.constant 0 : index
    %7 = vector.load %arg4[%c0_4, %c0_5] : memref<128x4xi32, #tpu.memory_space<vmem>>, vector<128x4xi32>
    %c0_6 = arith.constant 0 : index
    %c0_7 = arith.constant 0 : index
    %c0_8 = arith.constant 0 : index
    %8 = vector.load %arg3[%c0_6, %c0_7, %c0_8] : memref<4x128x32xf32, #tpu.memory_space<vmem>>, vector<1x128x32xf32>
    %9 = vector.shape_cast %8 : vector<1x128x32xf32> to vector<128x32xf32>
    %10 = arith.mulf %9, %1 : vector<128x32xf32>
    %cst_9 = arith.constant dense<0.000000e+00> : vector<128xf32>
    %11 = vector.multi_reduction <add>, %10, %cst_9 [1] : vector<128x32xf32> to vector<128xf32>
    %12 = vector.shape_cast %11 : vector<128xf32> to vector<128x1xf32>
    %cst_10 = arith.constant 2.000000e+01 : f32
    %13 = vector.broadcast %cst_10 : f32 to vector<128x1xf32>
    %14 = arith.mulf %12, %13 : vector<128x1xf32>
    %c1 = arith.constant 1 : index
    %c0_11 = arith.constant 0 : index
    %c0_12 = arith.constant 0 : index
    %15 = vector.load %arg3[%c1, %c0_11, %c0_12] : memref<4x128x32xf32, #tpu.memory_space<vmem>>, vector<1x128x32xf32>
    %16 = vector.shape_cast %15 : vector<1x128x32xf32> to vector<128x32xf32>
    %17 = arith.mulf %16, %1 : vector<128x32xf32>
    %cst_13 = arith.constant dense<0.000000e+00> : vector<128xf32>
    %18 = vector.multi_reduction <add>, %17, %cst_13 [1] : vector<128x32xf32> to vector<128xf32>
    %19 = vector.shape_cast %18 : vector<128xf32> to vector<128x1xf32>
    %cst_14 = arith.constant 2.000000e+01 : f32
    %20 = vector.broadcast %cst_14 : f32 to vector<128x1xf32>
    %21 = arith.mulf %19, %20 : vector<128x1xf32>
    %22 = vector.extract_strided_slice %7 {offsets = [0, 1], sizes = [128, 1], strides = [1, 1]} : vector<128x4xi32> to vector<128x1xi32>
    %23 = vector.extract_strided_slice %7 {offsets = [0, 0], sizes = [128, 1], strides = [1, 1]} : vector<128x4xi32> to vector<128x1xi32>
    %24 = arith.cmpi eq, %22, %23 : vector<128x1xi32>
    %c2 = arith.constant 2 : index
    %c0_15 = arith.constant 0 : index
    %c0_16 = arith.constant 0 : index
    %25 = vector.load %arg3[%c2, %c0_15, %c0_16] : memref<4x128x32xf32, #tpu.memory_space<vmem>>, vector<1x128x32xf32>
    %26 = vector.shape_cast %25 : vector<1x128x32xf32> to vector<128x32xf32>
    %27 = arith.mulf %26, %1 : vector<128x32xf32>
    %cst_17 = arith.constant dense<0.000000e+00> : vector<128xf32>
    %28 = vector.multi_reduction <add>, %27, %cst_17 [1] : vector<128x32xf32> to vector<128xf32>
    %29 = vector.shape_cast %28 : vector<128xf32> to vector<128x1xf32>
    %cst_18 = arith.constant 2.000000e+01 : f32
    %30 = vector.broadcast %cst_18 : f32 to vector<128x1xf32>
    %31 = arith.mulf %29, %30 : vector<128x1xf32>
    %32 = vector.extract_strided_slice %7 {offsets = [0, 2], sizes = [128, 1], strides = [1, 1]} : vector<128x4xi32> to vector<128x1xi32>
    %33 = vector.extract_strided_slice %7 {offsets = [0, 0], sizes = [128, 1], strides = [1, 1]} : vector<128x4xi32> to vector<128x1xi32>
    %34 = arith.cmpi eq, %32, %33 : vector<128x1xi32>
    %35 = vector.extract_strided_slice %7 {offsets = [0, 2], sizes = [128, 1], strides = [1, 1]} : vector<128x4xi32> to vector<128x1xi32>
    %36 = vector.extract_strided_slice %7 {offsets = [0, 1], sizes = [128, 1], strides = [1, 1]} : vector<128x4xi32> to vector<128x1xi32>
    %37 = arith.cmpi eq, %35, %36 : vector<128x1xi32>
    %38 = arith.ori %34, %37 : vector<128x1xi1>
    %c3 = arith.constant 3 : index
    %c0_19 = arith.constant 0 : index
    %c0_20 = arith.constant 0 : index
    %39 = vector.load %arg3[%c3, %c0_19, %c0_20] : memref<4x128x32xf32, #tpu.memory_space<vmem>>, vector<1x128x32xf32>
    %40 = vector.shape_cast %39 : vector<1x128x32xf32> to vector<128x32xf32>
    %41 = arith.mulf %40, %1 : vector<128x32xf32>
    %cst_21 = arith.constant dense<0.000000e+00> : vector<128xf32>
    %42 = vector.multi_reduction <add>, %41, %cst_21 [1] : vector<128x32xf32> to vector<128xf32>
    %43 = vector.shape_cast %42 : vector<128xf32> to vector<128x1xf32>
    %cst_22 = arith.constant 2.000000e+01 : f32
    %44 = vector.broadcast %cst_22 : f32 to vector<128x1xf32>
    %45 = arith.mulf %43, %44 : vector<128x1xf32>
    %46 = vector.extract_strided_slice %7 {offsets = [0, 3], sizes = [128, 1], strides = [1, 1]} : vector<128x4xi32> to vector<128x1xi32>
    %47 = vector.extract_strided_slice %7 {offsets = [0, 0], sizes = [128, 1], strides = [1, 1]} : vector<128x4xi32> to vector<128x1xi32>
    %48 = arith.cmpi eq, %46, %47 : vector<128x1xi32>
    %49 = vector.extract_strided_slice %7 {offsets = [0, 3], sizes = [128, 1], strides = [1, 1]} : vector<128x4xi32> to vector<128x1xi32>
    %50 = vector.extract_strided_slice %7 {offsets = [0, 1], sizes = [128, 1], strides = [1, 1]} : vector<128x4xi32> to vector<128x1xi32>
    %51 = arith.cmpi eq, %49, %50 : vector<128x1xi32>
    %52 = arith.ori %48, %51 : vector<128x1xi1>
    %53 = vector.extract_strided_slice %7 {offsets = [0, 3], sizes = [128, 1], strides = [1, 1]} : vector<128x4xi32> to vector<128x1xi32>
    %54 = vector.extract_strided_slice %7 {offsets = [0, 2], sizes = [128, 1], strides = [1, 1]} : vector<128x4xi32> to vector<128x1xi32>
    %55 = arith.cmpi eq, %53, %54 : vector<128x1xi32>
    %56 = arith.ori %52, %55 : vector<128x1xi1>
    %57 = arith.maximumf %6, %14 : vector<128x1xf32>
    %58 = arith.maximumf %57, %21 : vector<128x1xf32>
    %59 = arith.maximumf %58, %31 : vector<128x1xf32>
    %60 = arith.maximumf %59, %45 : vector<128x1xf32>
    %61 = arith.subf %6, %60 : vector<128x1xf32>
    %62 = math.exp %61 : vector<128x1xf32>
    %cst_23 = arith.constant 0.000000e+00 : f32
    %63 = vector.broadcast %cst_23 : f32 to vector<128x1xf32>
    %64 = arith.subf %14, %60 : vector<128x1xf32>
    %65 = math.exp %64 : vector<128x1xf32>
    %66 = arith.addf %63, %65 : vector<128x1xf32>
    %67 = arith.subf %21, %60 : vector<128x1xf32>
    %68 = math.exp %67 : vector<128x1xf32>
    %cst_24 = arith.constant 0.000000e+00 : f32
    %69 = vector.broadcast %cst_24 : f32 to vector<128x1xf32>
    %70 = arith.select %24, %69, %68 : vector<128x1xi1>, vector<128x1xf32>
    %71 = arith.addf %66, %70 : vector<128x1xf32>
    %72 = arith.subf %31, %60 : vector<128x1xf32>
    %73 = math.exp %72 : vector<128x1xf32>
    %cst_25 = arith.constant 0.000000e+00 : f32
    %74 = vector.broadcast %cst_25 : f32 to vector<128x1xf32>
    %75 = arith.select %38, %74, %73 : vector<128x1xi1>, vector<128x1xf32>
    %76 = arith.addf %71, %75 : vector<128x1xf32>
    %77 = arith.subf %45, %60 : vector<128x1xf32>
    %78 = math.exp %77 : vector<128x1xf32>
    %cst_26 = arith.constant 0.000000e+00 : f32
    %79 = vector.broadcast %cst_26 : f32 to vector<128x1xf32>
    %80 = arith.select %56, %79, %78 : vector<128x1xi1>, vector<128x1xf32>
    %81 = arith.addf %76, %80 : vector<128x1xf32>
    %82 = arith.addf %81, %62 : vector<128x1xf32>
    %83 = math.log %82 : vector<128x1xf32>
    %84 = arith.subf %6, %60 : vector<128x1xf32>
    %85 = arith.subf %83, %84 : vector<128x1xf32>
    %86 = vector.shape_cast %85 : vector<128x1xf32> to vector<128x1xf32>
    %87 = vector.broadcast %86 : vector<128x1xf32> to vector<128x128xf32>
    %c0_27 = arith.constant 0 : index
    %c0_28 = arith.constant 0 : index
    %88 = vector.load %arg5[%c0_27, %c0_28] : memref<128x128xf32, #tpu.memory_space<vmem>>, vector<128x128xf32>
    tpu.vector_store %arg5[%c0_27, %c0_28], %87 {strides = array<i32>} : memref<128x128xf32, #tpu.memory_space<vmem>>, vector<128x128xf32>,
    return
  }
  func.func @transform_0(%arg0: i32) -> (i32, i32) {
    %c0_i32 = arith.constant 0 : i32
    %c0_i32_0 = arith.constant 0 : i32
    return %arg0, %c0_i32 : i32, i32
  }
  func.func @transform_1(%arg0: i32) -> (i32, i32) {
    %c0_i32 = arith.constant 0 : i32
    %c0_i32_0 = arith.constant 0 : i32
    return %arg0, %c0_i32 : i32, i32
  }
  func.func @transform_2(%arg0: i32) -> (i32, i32, i32) {
    %c0_i32 = arith.constant 0 : i32
    %c0_i32_0 = arith.constant 0 : i32
    %c0_i32_1 = arith.constant 0 : i32
    return %c0_i32, %arg0, %c0_i32_0 : i32, i32, i32
  }
  func.func @transform_3(%arg0: i32) -> (i32, i32) {
    %c0_i32 = arith.constant 0 : i32
    %c0_i32_0 = arith.constant 0 : i32
    return %arg0, %c0_i32 : i32, i32
  }
  func.func @transform_4(%arg0: i32) -> (i32, i32) {
    %c0_i32 = arith.constant 0 : i32
    %c0_i32_0 = arith.constant 0 : i32
    return %arg0, %c0_i32 : i32, i32
  }
}

</mosaic_0001>

<bundles_post_ra>
// kernel: tpu_custom_call.1
= control target key start
LH: loop header
LB: loop body
LE: loop exit
PB: predicated region body
PF: predicated region fallthrough
CT: control target
= control target key end

     0   :  { %9 = vsyncpa [#allocation4], 0  ;;  %s4825_s0 = inlined_call_operand.vmem [shape: f32[256,32], index: 0, kind: input, shape index: {}]   ;;  %s4826_s1 = inlined_call_operand.vmem [shape: f32[256,32], index: 1, kind: input, shape index: {}]   ;;  %s4827_s2 = inlined_call_operand.vmem [shape: f32[4,256,32], index: 2, kind: input, shape index: {}]   ;;  %s4828_s3 = inlined_call_operand.vmem [shape: s32[256,4], index: 3, kind: input, shape index: {}]   ;;  %s4829_s4 = inlined_call_operand.hbm [shape: f32[256,128], index: 4, kind: output, shape index: {}]  }
   0x1   :  { %11 = vsyncpa [#allocation4 + $0x1], 0  ;;  %s2506_s15 = smov 0   ;;  %s2508_s16 = smov 0  }
   0x2   :  { %s2510_s17 = smov 0   ;;  %s2512_s18 = smov 0  }
   0x3 LB: > { %s2527_s19 = sadd.s32 4294967295, %s2470_s18   ;;  %s2081_s20 = sadd.s32 4294967294, %s2470_s18   ;;  %s2470_s18 = sphi %s2512_s18, %s5395_s18   ;;  %s2466_s17 = sphi %s2510_s17, %s5394_s17   ;;  %s2462_s16 = sphi %s2508_s16, %s5393_s16   ;;  %s2458_s15 = sphi %s2506_s15, %s5392_s15  }
   0x4   : > { %s2531_s21 = sadd.s32 1, %s2470_s18   ;;  %s76_s22 = sadd.s32 1, %s2466_s17 }
   0x5   : > { %s73_s23 = ssub.s32 %s2470_s18, %s2531_s21  ;;  %p83_p0 = scmp.ne.s32.totalorder %s2466_s17, %s2462_s16 }
   0x6   : > { %p74_p1 = scmp.eq.s32.totalorder %s73_s23, 0  ;;  %p84_p2 = scmp.eq.s32.totalorder %s2470_s18, 0 }
   0x7   : > { %p139_p3 = scmp.eq.s32.totalorder %s2527_s19, 1  ;;  %p144_p4 = scmp.ne.s32.totalorder %s2462_s16, %s2458_s15 }
   0x8   : > { %s2543_s24 = scalar_select %p74_p1, %s2466_s17, %s76_s22  }
   0x9   : > { %p85_p5 = por %p84_p2, %p83_p0  ;;  %p2545_p6 = por %p139_p3, %p83_p0 }
   0xa   : > { %p145_p7 = scmp.eq.s32.totalorder %s2081_s20, 1  ;;  %p2083_p9 = scmp.ge.s32.totalorder %s2470_s18, 2 }
   0xc   : > { %p2549_p8 = por %p145_p7, %p144_p4  ;;  %161 = sbr.rel (%p2083_p9) target bundleno = 55 (0x37), region = 16 }
  0x13   : > { %182 = sbr.rel (!%p85_p5) target bundleno = 55 (0x37), region = 28  ;;  %s184_s27 = sand.u32 (%p85_p5), 1, %s2466_s17  }
  0x14   : > { %s2149_s28 = sshll.u32 (%p85_p5), %s2470_s18, 7  ;;  %s2084_s29 = sshll.u32 (%p85_p5), %s184_s27, 9 }
  0x15   : > { %s2561_s6 = scalar_lea.vmem (%p85_p5), %s4827_s2, %s2149_s28  ;;  %s2566_s7 = scalar_lea.vmem (%p85_p5), [#allocation2], %s2084_s29 }
  0x16   : > { %v343_v0 = vld [vmem:[%s2561_s6] sm:$0xff] (%p85_p5)  ;;  %v345_v1 = vld [vmem:[%s2561_s6 + $0x8] sm:$0xff] (%p85_p5)  ;;  %v347_v2 = vld [vmem:[%s2561_s6 + $0x10] sm:$0xff] (%p85_p5) }
  0x17   : > { %344 = vst [vmem:[%s2566_s7] sm:$0xff] (%p85_p5), %v343_v0  ;;  %346 = vst [vmem:[%s2566_s7 + $0x8] sm:$0xff] (%p85_p5), %v345_v1  ;;  %v349_v3 = vld [vmem:[%s2561_s6 + $0x18] sm:$0xff] (%p85_p5)  ;;  %v351_v4 = vld [vmem:[%s2561_s6 + $0x20] sm:$0xff] (%p85_p5) }
  0x18   : > { %348 = vst [vmem:[%s2566_s7 + $0x10] sm:$0xff] (%p85_p5), %v347_v2  ;;  %v353_v5 = vld [vmem:[%s2561_s6 + $0x28] sm:$0xff] (%p85_p5)  ;;  %350 = vst [vmem:[%s2566_s7 + $0x18] sm:$0xff] (%p85_p5), %v349_v3  ;;  %v355_v6 = vld [vmem:[%s2561_s6 + $0x30] sm:$0xff] (%p85_p5) }
  0x19   : > { %352 = vst [vmem:[%s2566_s7 + $0x20] sm:$0xff] (%p85_p5), %v351_v4  ;;  %354 = vst [vmem:[%s2566_s7 + $0x28] sm:$0xff] (%p85_p5), %v353_v5  ;;  %v357_v7 = vld [vmem:[%s2561_s6 + $0x38] sm:$0xff] (%p85_p5)  ;;  %v359_v8 = vld [vmem:[%s2561_s6 + $0x40] sm:$0xff] (%p85_p5) }
  0x1a   : > { %356 = vst [vmem:[%s2566_s7 + $0x30] sm:$0xff] %v355_v6  ;;  %358 = vst [vmem:[%s2566_s7 + $0x38] sm:$0xff] %v357_v7  ;;  %v361_v9 = vld [vmem:[%s2561_s6 + $0x48] sm:$0xff]  ;;  %v363_v10 = vld [vmem:[%s2561_s6 + $0x50] sm:$0xff] }
  0x1b   : > { %360 = vst [vmem:[%s2566_s7 + $0x40] sm:$0xff] %v359_v8  ;;  %v365_v11 = vld [vmem:[%s2561_s6 + $0x58] sm:$0xff]  ;;  %362 = vst [vmem:[%s2566_s7 + $0x48] sm:$0xff] %v361_v9  ;;  %v367_v12 = vld [vmem:[%s2561_s6 + $0x60] sm:$0xff] }
  0x1c   : > { %364 = vst [vmem:[%s2566_s7 + $0x50] sm:$0xff] %v363_v10  ;;  %366 = vst [vmem:[%s2566_s7 + $0x58] sm:$0xff] %v365_v11  ;;  %v369_v13 = vld [vmem:[%s2561_s6 + $0x68] sm:$0xff]  ;;  %v371_v14 = vld [vmem:[%s2561_s6 + $0x70] sm:$0xff] }
  0x1d   : > { %368 = vst [vmem:[%s2566_s7 + $0x60] sm:$0xff] %v367_v12  ;;  %370 = vst [vmem:[%s2566_s7 + $0x68] sm:$0xff] %v369_v13  ;;  %v373_v15 = vld [vmem:[%s2561_s6 + $0x78] sm:$0xff]  ;;  %v375_v16 = vld [vmem:[%s2561_s6 + $0x100] sm:$0xff] }
  0x1e   : > { %372 = vst [vmem:[%s2566_s7 + $0x70] sm:$0xff] %v371_v14  ;;  %v377_v17 = vld [vmem:[%s2561_s6 + $0x108] sm:$0xff]  ;;  %374 = vst [vmem:[%s2566_s7 + $0x78] sm:$0xff] %v373_v15  ;;  %v379_v18 = vld [vmem:[%s2561_s6 + $0x110] sm:$0xff] }
  0x1f   : > { %376 = vst [vmem:[%s2566_s7 + $0x80] sm:$0xff] %v375_v16  ;;  %378 = vst [vmem:[%s2566_s7 + $0x88] sm:$0xff] %v377_v17  ;;  %v381_v19 = vld [vmem:[%s2561_s6 + $0x118] sm:$0xff]  ;;  %v383_v20 = vld [vmem:[%s2561_s6 + $0x120] sm:$0xff] }
  0x20   : > { %380 = vst [vmem:[%s2566_s7 + $0x90] sm:$0xff] %v379_v18  ;;  %382 = vst [vmem:[%s2566_s7 + $0x98] sm:$0xff] %v381_v19  ;;  %v385_v21 = vld [vmem:[%s2561_s6 + $0x128] sm:$0xff]  ;;  %v387_v22 = vld [vmem:[%s2561_s6 + $0x130] sm:$0xff] }
  0x21   : > { %384 = vst [vmem:[%s2566_s7 + $0xa0] sm:$0xff] %v383_v20  ;;  %v389_v23 = vld [vmem:[%s2561_s6 + $0x138] sm:$0xff]  ;;  %386 = vst [vmem:[%s2566_s7 + $0xa8] sm:$0xff] %v385_v21  ;;  %v391_v24 = vld [vmem:[%s2561_s6 + $0x140] sm:$0xff] }
  0x22   : > { %388 = vst [vmem:[%s2566_s7 + $0xb0] sm:$0xff] %v387_v22  ;;  %390 = vst [vmem:[%s2566_s7 + $0xb8] sm:$0xff] %v389_v23  ;;  %v393_v25 = vld [vmem:[%s2561_s6 + $0x148] sm:$0xff]  ;;  %v395_v26 = vld [vmem:[%s2561_s6 + $0x150] sm:$0xff] }
  0x23   : > { %392 = vst [vmem:[%s2566_s7 + $0xc0] sm:$0xff] %v391_v24  ;;  %394 = vst [vmem:[%s2566_s7 + $0xc8] sm:$0xff] %v393_v25  ;;  %v397_v27 = vld [vmem:[%s2561_s6 + $0x158] sm:$0xff]  ;;  %v399_v28 = vld [vmem:[%s2561_s6 + $0x160] sm:$0xff] }
  0x24   : > { %396 = vst [vmem:[%s2566_s7 + $0xd0] sm:$0xff] %v395_v26  ;;  %v401_v29 = vld [vmem:[%s2561_s6 + $0x168] sm:$0xff]  ;;  %398 = vst [vmem:[%s2566_s7 + $0xd8] sm:$0xff] %v397_v27  ;;  %v403_v30 = vld [vmem:[%s2561_s6 + $0x170] sm:$0xff] }
  0x25   : > { %400 = vst [vmem:[%s2566_s7 + $0xe0] sm:$0xff] %v399_v28  ;;  %402 = vst [vmem:[%s2566_s7 + $0xe8] sm:$0xff] %v401_v29  ;;  %v405_v31 = vld [vmem:[%s2561_s6 + $0x178] sm:$0xff]  ;;  %v407_v32 = vld [vmem:[%s2561_s6 + $0x200] sm:$0xff] }
  0x26   : > { %404 = vst [vmem:[%s2566_s7 + $0xf0] sm:$0xff] %v403_v30  ;;  %406 = vst [vmem:[%s2566_s7 + $0xf8] sm:$0xff] %v405_v31  ;;  %v409_v33 = vld [vmem:[%s2561_s6 + $0x208] sm:$0xff]  ;;  %v411_v34 = vld [vmem:[%s2561_s6 + $0x210] sm:$0xff] }
  0x27   : > { %408 = vst [vmem:[%s2566_s7 + $0x100] sm:$0xff] %v407_v32  ;;  %v413_v35 = vld [vmem:[%s2561_s6 + $0x218] sm:$0xff]  ;;  %410 = vst [vmem:[%s2566_s7 + $0x108] sm:$0xff] %v409_v33  ;;  %v415_v36 = vld [vmem:[%s2561_s6 + $0x220] sm:$0xff] }
  0x28   : > { %412 = vst [vmem:[%s2566_s7 + $0x110] sm:$0xff] %v411_v34  ;;  %414 = vst [vmem:[%s2566_s7 + $0x118] sm:$0xff] %v413_v35  ;;  %v417_v37 = vld [vmem:[%s2561_s6 + $0x228] sm:$0xff]  ;;  %v419_v38 = vld [vmem:[%s2561_s6 + $0x230] sm:$0xff] }
  0x29   : > { %416 = vst [vmem:[%s2566_s7 + $0x120] sm:$0xff] %v415_v36  ;;  %418 = vst [vmem:[%s2566_s7 + $0x128] sm:$0xff] %v417_v37  ;;  %v421_v39 = vld [vmem:[%s2561_s6 + $0x238] sm:$0xff]  ;;  %v423_v40 = vld [vmem:[%s2561_s6 + $0x240] sm:$0xff] }
  0x2a   : > { %420 = vst [vmem:[%s2566_s7 + $0x130] sm:$0xff] %v419_v38  ;;  %v425_v41 = vld [vmem:[%s2561_s6 + $0x248] sm:$0xff]  ;;  %422 = vst [vmem:[%s2566_s7 + $0x138] sm:$0xff] %v421_v39  ;;  %v427_v42 = vld [vmem:[%s2561_s6 + $0x250] sm:$0xff] }
  0x2b   : > { %424 = vst [vmem:[%s2566_s7 + $0x140] sm:$0xff] %v423_v40  ;;  %426 = vst [vmem:[%s2566_s7 + $0x148] sm:$0xff] %v425_v41  ;;  %v429_v43 = vld [vmem:[%s2561_s6 + $0x258] sm:$0xff]  ;;  %v431_v44 = vld [vmem:[%s2561_s6 + $0x260] sm:$0xff] }
  0x2c   : > { %428 = vst [vmem:[%s2566_s7 + $0x150] sm:$0xff] %v427_v42  ;;  %430 = vst [vmem:[%s2566_s7 + $0x158] sm:$0xff] %v429_v43  ;;  %v433_v45 = vld [vmem:[%s2561_s6 + $0x268] sm:$0xff]  ;;  %v435_v46 = vld [vmem:[%s2561_s6 + $0x270] sm:$0xff] }
  0x2d   : > { %432 = vst [vmem:[%s2566_s7 + $0x160] sm:$0xff] %v431_v44  ;;  %v437_v47 = vld [vmem:[%s2561_s6 + $0x278] sm:$0xff]  ;;  %434 = vst [vmem:[%s2566_s7 + $0x168] sm:$0xff] %v433_v45  ;;  %v439_v48 = vld [vmem:[%s2561_s6 + $0x300] sm:$0xff] }
  0x2e   : > { %436 = vst [vmem:[%s2566_s7 + $0x170] sm:$0xff] %v435_v46  ;;  %438 = vst [vmem:[%s2566_s7 + $0x178] sm:$0xff] %v437_v47  ;;  %v441_v49 = vld [vmem:[%s2561_s6 + $0x308] sm:$0xff]  ;;  %v443_v50 = vld [vmem:[%s2561_s6 + $0x310] sm:$0xff] }
  0x2f   : > { %440 = vst [vmem:[%s2566_s7 + $0x180] sm:$0xff] %v439_v48  ;;  %442 = vst [vmem:[%s2566_s7 + $0x188] sm:$0xff] %v441_v49  ;;  %v445_v51 = vld [vmem:[%s2561_s6 + $0x318] sm:$0xff]  ;;  %v447_v52 = vld [vmem:[%s2561_s6 + $0x320] sm:$0xff] }
  0x30   : > { %444 = vst [vmem:[%s2566_s7 + $0x190] sm:$0xff] %v443_v50  ;;  %v449_v53 = vld [vmem:[%s2561_s6 + $0x328] sm:$0xff]  ;;  %446 = vst [vmem:[%s2566_s7 + $0x198] sm:$0xff] %v445_v51  ;;  %v451_v54 = vld [vmem:[%s2561_s6 + $0x330] sm:$0xff] }
  0x31   : > { %448 = vst [vmem:[%s2566_s7 + $0x1a0] sm:$0xff] %v447_v52  ;;  %450 = vst [vmem:[%s2566_s7 + $0x1a8] sm:$0xff] %v449_v53  ;;  %v453_v55 = vld [vmem:[%s2561_s6 + $0x338] sm:$0xff]  ;;  %v455_v56 = vld [vmem:[%s2561_s6 + $0x340] sm:$0xff] }
  0x32   : > { %452 = vst [vmem:[%s2566_s7 + $0x1b0] sm:$0xff] %v451_v54  ;;  %454 = vst [vmem:[%s2566_s7 + $0x1b8] sm:$0xff] %v453_v55  ;;  %v457_v57 = vld [vmem:[%s2561_s6 + $0x348] sm:$0xff]  ;;  %v459_v58 = vld [vmem:[%s2561_s6 + $0x350] sm:$0xff] }
  0x33   : > { %456 = vst [vmem:[%s2566_s7 + $0x1c0] sm:$0xff] %v455_v56  ;;  %v461_v59 = vld [vmem:[%s2561_s6 + $0x358] sm:$0xff]  ;;  %458 = vst [vmem:[%s2566_s7 + $0x1c8] sm:$0xff] %v457_v57  ;;  %v463_v60 = vld [vmem:[%s2561_s6 + $0x360] sm:$0xff] }
  0x34   : > { %460 = vst [vmem:[%s2566_s7 + $0x1d0] sm:$0xff] %v459_v58  ;;  %462 = vst [vmem:[%s2566_s7 + $0x1d8] sm:$0xff] %v461_v59  ;;  %v465_v61 = vld [vmem:[%s2561_s6 + $0x368] sm:$0xff]  ;;  %v467_v62 = vld [vmem:[%s2561_s6 + $0x370] sm:$0xff] }
  0x35   : > { %464 = vst [vmem:[%s2566_s7 + $0x1e0] sm:$0xff] %v463_v60  ;;  %466 = vst [vmem:[%s2566_s7 + $0x1e8] sm:$0xff] %v465_v61  ;;  %v469_v63 = vld [vmem:[%s2561_s6 + $0x378] sm:$0xff] }
  0x36   : > { %468 = vst [vmem:[%s2566_s7 + $0x1f0] sm:$0xff] %v467_v62  ;;  %470 = vst [vmem:[%s2566_s7 + $0x1f8] sm:$0xff] %v469_v63 }
  0x37 PF: > { %p2087_p10 = scmp.ge.s32.totalorder %s2470_s18, 1  ;;  %p484_p11 = scmp.lt.s32.totalorder %s2470_s18, 3 }
  0x39   : > { %p485_p12 = pnand %p2087_p10, %p484_p11 }
  0x3b   : > { %488 = sbr.rel (%p485_p12) target bundleno = 859 (0x35b), region = 70 }
  0x42   : > { %s2090_s8 = sshll.u32 %s2527_s19, 4  ;;  %vm599_vm0 = vcmask 261120   ;;  %s2779_s22 = sand.u32 1, %s2462_s16  }
  0x43   : > { %p532_p13 = scmp.lt.s32.totalorder %s2090_s8, 31  ;;  %s2088_s23 = sshll.u32 %s2779_s22, 9 }
  0x44   : > { %s2808_s27 = scalar_lea.vmem [#allocation2], %s2088_s23  ;;  %s2472_s5 = smov 1  }
  0x45   : > { %s5397_s8 = smov (!%p532_p13, %s2090_s8), 31  ;;  %v681_v62 = vld [vmem:[%s2808_s27 + $0x8] sm:$0xff]  ;;  %v680_v63 = vld [vmem:[%s2808_s27] sm:$0xff]  ;;  %s2473_s6 = smov 2  }
  0x46   : > { %s2696_s9 = sshll.u32 %s5397_s8, 3  ;;  %s2474_s7 = smov 3  }
  0x47   : > { %s2702_s12 = scalar_lea.vmem %s4825_s0, %s2696_s9  ;;  %s2708_s20 = scalar_lea.vmem %s4826_s1, %s2696_s9 }
  0x48   : > { %v553_v0 = vld [vmem:[%s2702_s12 + $0x10] sm:$0xff]  ;;  %v551_v2 = vld [vmem:[%s2702_s12] sm:$0xff]  ;;  %v554_v5 = vld [vmem:[%s2702_s12 + $0x18] sm:$0xff]  ;;  %s2912_s30 = scalar_lea.vmem %s4828_s3, %s2696_s9  ;;  %s2475_s8 = smov 127  }
  0x49   : > { %v2712_v1 = vld [vmem:[%s2708_s20 + $0x10] sm:$0xff]  ;;  %v2717_v4 = vld [vmem:[%s2708_s20] sm:$0xff]  ;;  %v2721_v6 = vld [vmem:[%s2708_s20 + $0x18] sm:$0xff]  ;;  %s2476_s9 = smov 126   ;;  %s2089_s10 = sshll.u32 %s2779_s22, 7 }
  0x4a   : > { %v585_v3 = vmul.f32 %v2712_v1, %v553_v0  ;;  %v583_v7 = vmul.f32 %v2717_v4, %v551_v2  ;;  %v586_v8 = vmul.f32 %v2721_v6, %v554_v5  ;;  %v552_v9 = vld [vmem:[%s2702_s12 + $0x8] sm:$0xff]  ;;  %v555_v15 = vld [vmem:[%s2702_s12 + $0x20] sm:$0xff]  ;;  %v558_v22 = vld [vmem:[%s2702_s12 + $0x38] sm:$0xff]  ;;  %v696_v5 = vmul.f32 %v680_v63, %v2717_v4  ;;  %s4756_s11 = scalar_lea.vmem [#allocation3], %s2089_s10  ;;  %s2478_s28 = smov [#allocation3]  }
  0x4b   : > { %v2727_v10 = vld [vmem:[%s2708_s20 + $0x8] sm:$0xff]  ;;  %v2737_v16 = vld [vmem:[%s2708_s20 + $0x20] sm:$0xff]  ;;  %v2746_v23 = vld [vmem:[%s2708_s20 + $0x38] sm:$0xff]  ;;  %s1977_s13 = sshll.u32 %s4756_s11, 4  ;;  %s2412_s29 = sshll.u32 %s2478_s28, 4  ;;  %s4779_s13 = int_to_ptr.vmem [resolvable:$true] %s1977_s13  ;;  %s2413_s29 = int_to_ptr.vmem [resolvable:$false] %s2412_s29 }
  0x4c   : > { %v556_v11 = vld [vmem:[%s2702_s12 + $0x28] sm:$0xff]  ;;  %v606_v12 = vsel %vm599_vm0, %v585_v3, 0.0  ;;  %v584_v13 = vmul.f32 %v2727_v10, %v552_v9  ;;  %v600_v17 = vsel %vm599_vm0, %v583_v7, 0.0  ;;  %v609_v18 = vsel %vm599_vm0, %v586_v8, 0.0  ;;  %v557_v24 = vld [vmem:[%s2702_s12 + $0x30] sm:$0xff]  ;;  %v559_v32 = vld [vmem:[%s2702_s12 + $0x40] sm:$0xff]  ;;  %p2415_p3 = scmp.lt.s32.totalorder %s4779_s13, %s2413_s29 }
  0x4d   : > { %v2733_v14 = vld [vmem:[%s2708_s20 + $0x28] sm:$0xff]  ;;  %607 = vadd.xlane.f32.xlu1 %v606_v12  ;;  %601 = vadd.xlane.f32.xlu0 %v600_v17  ;;  %v587_v21 = vmul.f32 %v2737_v16, %v555_v15  ;;  %v2750_v25 = vld [vmem:[%s2708_s20 + $0x30] sm:$0xff]  ;;  %v590_v27 = vmul.f32 %v2746_v23, %v558_v22  ;;  %v2762_v33 = vld [vmem:[%s2708_s20 + $0x40] sm:$0xff]  ;;  %v697_v2 = vmul.f32 %v681_v62, %v2727_v10  ;;  %v712_v12 = vsel %vm599_vm0, %v696_v5, 0.0 }
  0x4e   : > { %v588_v19 = vmul.f32 %v2733_v14, %v556_v11  ;;  %v603_v20 = vsel %vm599_vm0, %v584_v13, 0.0  ;;  %v589_v29 = vmul.f32 %v2750_v25, %v557_v24  ;;  %v560_v30 = vld [vmem:[%s2702_s12 + $0x48] sm:$0xff]  ;;  %v591_v37 = vmul.f32 %v2762_v33, %v559_v32  ;;  %v562_v38 = vld [vmem:[%s2702_s12 + $0x58] sm:$0xff]  ;;  %v561_v40 = vld [vmem:[%s2702_s12 + $0x50] sm:$0xff] }
  0x4f   : > { %v612_v28 = vsel %vm599_vm0, %v587_v21, 0.0  ;;  %v2758_v31 = vld [vmem:[%s2708_s20 + $0x48] sm:$0xff]  ;;  %v621_v34 = vsel %vm599_vm0, %v590_v27, 0.0  ;;  %v2770_v39 = vld [vmem:[%s2708_s20 + $0x58] sm:$0xff]  ;;  %v2774_v41 = vld [vmem:[%s2708_s20 + $0x50] sm:$0xff]  ;;  %v715_v9 = vsel %vm599_vm0, %v697_v2, 0.0 }
  0x50   : > { %v615_v26 = vsel %vm599_vm0, %v588_v19, 0.0  ;;  %v592_v35 = vmul.f32 %v2758_v31, %v560_v30  ;;  %v618_v36 = vsel %vm599_vm0, %v589_v29, 0.0  ;;  %v594_v43 = vmul.f32 %v2770_v39, %v562_v38  ;;  %v564_v46 = vld [vmem:[%s2702_s12 + $0x68] sm:$0xff]  ;;  %v563_v48 = vld [vmem:[%s2702_s12 + $0x60] sm:$0xff]  ;;  %v566_v54 = vld [vmem:[%s2702_s12 + $0x78] sm:$0xff] }
  0x51   : > { %610 = vadd.xlane.f32.xlu1 %v609_v18  ;;  %604 = vadd.xlane.f32.xlu0 %v603_v20  ;;  %v624_v44 = vsel %vm599_vm0, %v591_v37, 0.0  ;;  %v593_v45 = vmul.f32 %v2774_v41, %v561_v40  ;;  %v2785_v47 = vld [vmem:[%s2708_s20 + $0x68] sm:$0xff]  ;;  %v2789_v49 = vld [vmem:[%s2708_s20 + $0x60] sm:$0xff]  ;;  %v2798_v55 = vld [vmem:[%s2708_s20 + $0x78] sm:$0xff] }
  0x52   : > { %v627_v42 = vsel %vm599_vm0, %v592_v35, 0.0  ;;  %v633_v50 = vsel %vm599_vm0, %v594_v43, 0.0  ;;  %v596_v51 = vmul.f32 %v2785_v47, %v564_v46  ;;  %v595_v53 = vmul.f32 %v2789_v49, %v563_v48  ;;  %v565_v56 = vld [vmem:[%s2702_s12 + $0x70] sm:$0xff]  ;;  %v683_v7 = vld [vmem:[%s2808_s27 + $0x18] sm:$0xff]  ;;  %v685_v15 = vld [vmem:[%s2808_s27 + $0x28] sm:$0xff]  ;;  %s2150_s12 = sshll.u32 %s2527_s19, 11 }
  0x53   : > { %v630_v52 = vsel %vm599_vm0, %v593_v45, 0.0  ;;  %v2802_v57 = vld [vmem:[%s2708_s20 + $0x70] sm:$0xff]  ;;  %v598_v59 = vmul.f32 %v2798_v55, %v566_v54  ;;  %v699_v11 = vmul.f32 %v683_v7, %v2721_v6  ;;  %v684_v17 = vld [vmem:[%s2808_s27 + $0x20] sm:$0xff]  ;;  %v701_v19 = vmul.f32 %v685_v15, %v2733_v14  ;;  %v687_v22 = vld [vmem:[%s2808_s27 + $0x38] sm:$0xff]  ;;  %s4777_s23 = scalar_lea.hbm %s4829_s4, %s2150_s12  ;;  %s1964_s19 = scalar_lea.sflag [#allocation4], %s2779_s22 }
  0x54   : > { %v639_v58 = vsel %vm599_vm0, %v596_v51, 0.0  ;;  %v636_v60 = vsel %vm599_vm0, %v595_v53, 0.0  ;;  %v597_v61 = vmul.f32 %v2802_v57, %v565_v56  ;;  %v682_v8 = vld [vmem:[%s2808_s27 + $0x10] sm:$0xff]  ;;  %v700_v21 = vmul.f32 %v684_v17, %v2737_v16  ;;  %v689_v30 = vld [vmem:[%s2808_s27 + $0x48] sm:$0xff]  ;;  %v688_v32 = vld [vmem:[%s2808_s27 + $0x40] sm:$0xff] }
  0x55   : > { %616 = vadd.xlane.f32.xlu1 %v615_v26  ;;  %613 = vadd.xlane.f32.xlu0 %v612_v28  ;;  %v645_v0 = vsel %vm599_vm0, %v598_v59, 0.0  ;;  %v698_v13 = vmul.f32 %v682_v8, %v2712_v1  ;;  %v721_v18 = vsel %vm599_vm0, %v699_v11, 0.0  ;;  %v686_v24 = vld [vmem:[%s2808_s27 + $0x30] sm:$0xff]  ;;  %v727_v26 = vsel %vm599_vm0, %v701_v19, 0.0  ;;  %v691_v38 = vld [vmem:[%s2808_s27 + $0x58] sm:$0xff]  ;;  %v693_v46 = vld [vmem:[%s2808_s27 + $0x68] sm:$0xff] }
  0x56   : > { %v642_v3 = vsel %vm599_vm0, %v597_v61, 0.0  ;;  %v703_v27 = vmul.f32 %v687_v22, %v2746_v23  ;;  %v724_v28 = vsel %vm599_vm0, %v700_v21, 0.0  ;;  %v702_v29 = vmul.f32 %v686_v24, %v2750_v25  ;;  %v690_v40 = vld [vmem:[%s2808_s27 + $0x50] sm:$0xff]  ;;  %v692_v48 = vld [vmem:[%s2808_s27 + $0x60] sm:$0xff]  ;;  %v695_v54 = vld [vmem:[%s2808_s27 + $0x78] sm:$0xff] }
  0x57   : > { %v718_v20 = vsel %vm599_vm0, %v698_v13, 0.0  ;;  %v705_v35 = vmul.f32 %v689_v30, %v2758_v31  ;;  %v704_v37 = vmul.f32 %v688_v32, %v2762_v33  ;;  %v707_v43 = vmul.f32 %v691_v38, %v2770_v39  ;;  %v694_v56 = vld [vmem:[%s2808_s27 + $0x70] sm:$0xff]  ;;  %v2097_v62 = vld [vmem:[%s2808_s27 + $0x88] sm:$0xff]  ;;  %v2096_v63 = vld [vmem:[%s2808_s27 + $0x80] sm:$0xff] }
  0x58   : > { %v706_v45 = vmul.f32 %v690_v40, %v2774_v41  ;;  %v709_v51 = vmul.f32 %v693_v46, %v2785_v47  ;;  %v708_v53 = vmul.f32 %v692_v48, %v2789_v49  ;;  %v711_v59 = vmul.f32 %v695_v54, %v2798_v55  ;;  %v2099_v7 = vld [vmem:[%s2808_s27 + $0x98] sm:$0xff]  ;;  %v2098_v8 = vld [vmem:[%s2808_s27 + $0x90] sm:$0xff]  ;;  %v2101_v15 = vld [vmem:[%s2808_s27 + $0xa8] sm:$0xff] }
  0x59   : > { %622 = vadd.xlane.f32.xlu1 %v621_v34  ;;  %619 = vadd.xlane.f32.xlu0 %v618_v36  ;;  %v733_v34 = vsel %vm599_vm0, %v703_v27, 0.0  ;;  %v730_v36 = vsel %vm599_vm0, %v702_v29, 0.0  ;;  %v710_v61 = vmul.f32 %v694_v56, %v2802_v57  ;;  %v794_v2 = vmul.f32 %v2097_v62, %v2727_v10  ;;  %v2100_v17 = vld [vmem:[%s2808_s27 + $0xa0] sm:$0xff]  ;;  %v2103_v22 = vld [vmem:[%s2808_s27 + $0xb8] sm:$0xff]  ;;  %v2102_v24 = vld [vmem:[%s2808_s27 + $0xb0] sm:$0xff] }
  0x5a   : > { %v793_v5 = vmul.f32 %v2096_v63, %v2717_v4  ;;  %v796_v11 = vmul.f32 %v2099_v7, %v2721_v6  ;;  %v795_v13 = vmul.f32 %v2098_v8, %v2712_v1  ;;  %v798_v19 = vmul.f32 %v2101_v15, %v2733_v14  ;;  %v2105_v30 = vld [vmem:[%s2808_s27 + $0xc8] sm:$0xff]  ;;  %v2104_v32 = vld [vmem:[%s2808_s27 + $0xc0] sm:$0xff]  ;;  %v2107_v38 = vld [vmem:[%s2808_s27 + $0xd8] sm:$0xff] }
  0x5b   : > { %v797_v21 = vmul.f32 %v2100_v17, %v2737_v16  ;;  %v800_v27 = vmul.f32 %v2103_v22, %v2746_v23  ;;  %v799_v29 = vmul.f32 %v2102_v24, %v2750_v25  ;;  %v2106_v40 = vld [vmem:[%s2808_s27 + $0xd0] sm:$0xff]  ;;  %v2109_v46 = vld [vmem:[%s2808_s27 + $0xe8] sm:$0xff]  ;;  %v2108_v48 = vld [vmem:[%s2808_s27 + $0xe0] sm:$0xff] }
  0x5c   : > { %v2111_v54 = vld [vmem:[%s2808_s27 + $0xf8] sm:$0xff]  ;;  %v2110_v56 = vld [vmem:[%s2808_s27 + $0xf0] sm:$0xff]  ;;  %v2933_v7 = vld [vmem:[%s2912_s30 + $0x20] sm:$0xff] }
  0x5d   : > { %628 = vadd.xlane.f32.xlu1 %v627_v42  ;;  %625 = vadd.xlane.f32.xlu0 %v624_v44  ;;  %v739_v42 = vsel %vm599_vm0, %v705_v35, 0.0  ;;  %v736_v44 = vsel %vm599_vm0, %v704_v37, 0.0  ;;  %v802_v35 = vmul.f32 %v2105_v30, %v2758_v31  ;;  %v801_v37 = vmul.f32 %v2104_v32, %v2762_v33  ;;  %4993 = vst [vmem:[#allocation10_spill] sm:$0xff] %v2933_v7  ;;  %v2938_v8 = vld [vmem:[%s2912_s30 + $0x28] sm:$0xff]  ;;  %v2963_v15 = vld [vmem:[%s2912_s30 + $0x50] sm:$0xff]  ;;  %v2968_v17 = vld [vmem:[%s2912_s30 + $0x58] sm:$0xff] }
  0x5e   : > { %4994 = vst [vmem:[#allocation11_spill] sm:$0xff] %v2938_v8 }
  0x61   : > { %634 = vadd.xlane.f32.xlu1 %v633_v50  ;;  %631 = vadd.xlane.f32.xlu0 %v630_v52  ;;  %v745_v50 = vsel %vm599_vm0, %v707_v43, 0.0  ;;  %v742_v52 = vsel %vm599_vm0, %v706_v45, 0.0  ;;  %v804_v43 = vmul.f32 %v2107_v38, %v2770_v39  ;;  %v803_v45 = vmul.f32 %v2106_v40, %v2774_v41  ;;  %v2113_v38 = vld [vmem:[%s2808_s27 + $0x108] sm:$0xff]  ;;  %v2115_v40 = vld [vmem:[%s2808_s27 + $0x118] sm:$0xff] }
  0x65   : > { %640 = vadd.xlane.f32.xlu1 %v639_v58  ;;  %637 = vadd.xlane.f32.xlu0 %v636_v60  ;;  %v751_v58 = vsel %vm599_vm0, %v709_v51, 0.0  ;;  %v748_v60 = vsel %vm599_vm0, %v708_v53, 0.0  ;;  %v806_v51 = vmul.f32 %v2109_v46, %v2785_v47  ;;  %v805_v53 = vmul.f32 %v2108_v48, %v2789_v49  ;;  %v2117_v46 = vld [vmem:[%s2808_s27 + $0x128] sm:$0xff]  ;;  %v2116_v48 = vld [vmem:[%s2808_s27 + $0x120] sm:$0xff] }
  0x69   : > { %646 = vadd.xlane.f32.xlu1 %v645_v0  ;;  %643 = vadd.xlane.f32.xlu0 %v642_v3  ;;  %v757_v0 = vsel %vm599_vm0, %v711_v59, 0.0  ;;  %v754_v3 = vsel %vm599_vm0, %v710_v61, 0.0  ;;  %v808_v59 = vmul.f32 %v2111_v54, %v2798_v55  ;;  %v807_v61 = vmul.f32 %v2110_v56, %v2802_v57  ;;  %v2119_v56 = vld [vmem:[%s2808_s27 + $0x138] sm:$0xff] }
  0x6a   : > { %v942_v54 = vmul.f32 %v2116_v48, %v2737_v16 }
  0x6b   : > { %v854_v62 = vsel %vm599_vm0, %v808_v59, 0.0  ;;  %v851_v63 = vsel %vm599_vm0, %v807_v61, 0.0  ;;  %v2118_v59 = vld [vmem:[%s2808_s27 + $0x130] sm:$0xff]  ;;  %v945_v61 = vmul.f32 %v2119_v56, %v2746_v23 }
  0x6d   : > { %716 = vadd.xlane.f32.xlu1 %v715_v9  ;;  %713 = vadd.xlane.f32.xlu0 %v712_v12  ;;  %v812_v9 = vsel %vm599_vm0, %v794_v2, 0.0  ;;  %v809_v12 = vsel %vm599_vm0, %v793_v5, 0.0  ;;  %v2920_v2 = vld [vmem:[%s2912_s30 + $0x10] sm:$0xff]  ;;  %v2928_v5 = vld [vmem:[%s2912_s30 + $0x18] sm:$0xff] }
  0x6e   : > { %4990 = vst [vmem:[#allocation7_spill] sm:$0xff] %v2920_v2  ;;  %4992 = vst [vmem:[#allocation9_spill] sm:$0xff] %v2928_v5 }
  0x71   : > { %722 = vadd.xlane.f32.xlu1 %v721_v18  ;;  %719 = vadd.xlane.f32.xlu0 %v718_v20  ;;  %v818_v18 = vsel %vm599_vm0, %v796_v11, 0.0  ;;  %v815_v20 = vsel %vm599_vm0, %v795_v13, 0.0  ;;  %v2948_v11 = vld [vmem:[%s2912_s30 + $0x38] sm:$0xff]  ;;  %v2958_v13 = vld [vmem:[%s2912_s30 + $0x48] sm:$0xff] }
  0x72   : > { %4996 = vst [vmem:[#allocation13_spill] sm:$0xff] %v2948_v11 }
  0x75   : > { %728 = vadd.xlane.f32.xlu1 %v727_v26  ;;  %725 = vadd.xlane.f32.xlu0 %v724_v28  ;;  %v824_v26 = vsel %vm599_vm0, %v798_v19, 0.0  ;;  %v821_v28 = vsel %vm599_vm0, %v797_v21, 0.0  ;;  %v2978_v19 = vld [vmem:[%s2912_s30 + $0x68] sm:$0xff]  ;;  %v2988_v21 = vld [vmem:[%s2912_s30 + $0x78] sm:$0xff] }
  0x79   : > { %734 = vadd.xlane.f32.xlu1 %v733_v34  ;;  %731 = vadd.xlane.f32.xlu0 %v730_v36  ;;  %v830_v34 = vsel %vm599_vm0, %v800_v27, 0.0  ;;  %v827_v36 = vsel %vm599_vm0, %v799_v29, 0.0 }
  0x7d   : > { %740 = vadd.xlane.f32.xlu1 %v739_v42  ;;  %737 = vadd.xlane.f32.xlu0 %v736_v44  ;;  %v836_v42 = vsel %vm599_vm0, %v802_v35, 0.0  ;;  %v833_v44 = vsel %vm599_vm0, %v801_v37, 0.0 }
  0x81   : > { %746 = vadd.xlane.f32.xlu1 %v745_v50  ;;  %743 = vadd.xlane.f32.xlu0 %v742_v52  ;;  %v842_v50 = vsel %vm599_vm0, %v804_v43, 0.0  ;;  %v839_v52 = vsel %vm599_vm0, %v803_v45, 0.0  ;;  %v939_v43 = vmul.f32 %v2113_v38, %v2727_v10  ;;  %v941_v45 = vmul.f32 %v2115_v40, %v2721_v6 }
  0x85   : > { %752 = vadd.xlane.f32.xlu1 %v751_v58  ;;  %749 = vadd.xlane.f32.xlu0 %v748_v60  ;;  %v848_v58 = vsel %vm599_vm0, %v806_v51, 0.0  ;;  %v845_v60 = vsel %vm599_vm0, %v805_v53, 0.0  ;;  %v957_v51 = vsel %vm599_vm0, %v939_v43, 0.0  ;;  %v963_v53 = vsel %vm599_vm0, %v941_v45, 0.0  ;;  %v2122_v45 = vld [vmem:[%s2808_s27 + $0x150] sm:$0xff] }
  0x89   : > { %758 = vadd.xlane.f32.xlu1 %v757_v0  ;;  %755 = vadd.xlane.f32.xlu0 %v754_v3  ;;  %v2915_v0 = vld [vmem:[%s2912_s30 + $0x8] sm:$0xff]  ;;  %v2923_v3 = vld [vmem:[%s2912_s30] sm:$0xff] }
  0x8a   : > { %4989 = vst [vmem:[#allocation6_spill] sm:$0xff] %v2915_v0  ;;  %4991 = vst [vmem:[#allocation8_spill] sm:$0xff] %v2923_v3 }
  0x8d   : > { %813 = vadd.xlane.f32.xlu1 %v812_v9  ;;  %810 = vadd.xlane.f32.xlu0 %v809_v12  ;;  %v2943_v9 = vld [vmem:[%s2912_s30 + $0x30] sm:$0xff]  ;;  %v2953_v12 = vld [vmem:[%s2912_s30 + $0x40] sm:$0xff] }
  0x8e   : > { %4995 = vst [vmem:[#allocation12_spill] sm:$0xff] %v2943_v9  ;;  %4997 = vst [vmem:[#allocation14_spill] sm:$0xff] %v2953_v12 }
  0x91   : > { %819 = vadd.xlane.f32.xlu1 %v818_v18  ;;  %816 = vadd.xlane.f32.xlu0 %v815_v20  ;;  %v2973_v18 = vld [vmem:[%s2912_s30 + $0x60] sm:$0xff]  ;;  %v2983_v20 = vld [vmem:[%s2912_s30 + $0x70] sm:$0xff] }
  0x95   : > { %825 = vadd.xlane.f32.xlu1 %v824_v26  ;;  %822 = vadd.xlane.f32.xlu0 %v821_v28  ;;  %v2112_v28 = vld [vmem:[%s2808_s27 + $0x100] sm:$0xff] }
  0x96   : > { %v938_v30 = vmul.f32 %v2112_v28, %v2717_v4  ;;  %v944_v28 = vmul.f32 %v2118_v59, %v2750_v25  ;;  %v2124_v59 = vld [vmem:[%s2808_s27 + $0x160] sm:$0xff] }
  0x98   : > { %v972_v40 = vsel %vm599_vm0, %v944_v28, 0.0 }
  0x99   : > { %831 = vadd.xlane.f32.xlu1 %v830_v34  ;;  %828 = vadd.xlane.f32.xlu0 %v827_v36  ;;  %v2114_v34 = vld [vmem:[%s2808_s27 + $0x110] sm:$0xff]  ;;  %v954_v36 = vsel %vm599_vm0, %v938_v30, 0.0  ;;  %v2121_v30 = vld [vmem:[%s2808_s27 + $0x148] sm:$0xff] }
  0x9a   : > { %v940_v37 = vmul.f32 %v2114_v34, %v2712_v1  ;;  %v2120_v34 = vld [vmem:[%s2808_s27 + $0x140] sm:$0xff]  ;;  %v947_v38 = vmul.f32 %v2121_v30, %v2758_v31  ;;  %v950_v30 = vmul.f32 %v2124_v59, %v2789_v49 }
  0x9b   : > { %v946_v43 = vmul.f32 %v2120_v34, %v2762_v33  ;;  %v2127_v34 = vld [vmem:[%s2808_s27 + $0x178] sm:$0xff] }
  0x9c   : > { %v981_v48 = vsel %vm599_vm0, %v947_v38, 0.0 }
  0x9d   : > { %837 = vadd.xlane.f32.xlu1 %v836_v42  ;;  %834 = vadd.xlane.f32.xlu0 %v833_v44  ;;  %v960_v44 = vsel %vm599_vm0, %v940_v37, 0.0  ;;  %v975_v37 = vsel %vm599_vm0, %v945_v61, 0.0 }
  0xa1   : > { %843 = vadd.xlane.f32.xlu1 %v842_v50  ;;  %840 = vadd.xlane.f32.xlu0 %v839_v52  ;;  %v943_v52 = vmul.f32 %v2117_v46, %v2733_v14 }
  0xa5   : > { %849 = vadd.xlane.f32.xlu1 %v848_v58  ;;  %846 = vadd.xlane.f32.xlu0 %v845_v60  ;;  %v969_v60 = vsel %vm599_vm0, %v943_v52, 0.0  ;;  %v978_v52 = vsel %vm599_vm0, %v946_v43, 0.0  ;;  %v953_v43 = vmul.f32 %v2127_v34, %v2798_v55 }
  0xa9   : > { %855 = vadd.xlane.f32.xlu1 %v854_v62  ;;  %852 = vadd.xlane.f32.xlu0 %v851_v63  ;;  %v966_v63 = vsel %vm599_vm0, %v942_v54, 0.0  ;;  %v2125_v54 = vld [vmem:[%s2808_s27 + $0x168] sm:$0xff] }
  0xaa   : > { %v951_v61 = vmul.f32 %v2125_v54, %v2785_v47 }
  0xba   : > { %875 = vrot.lane.b32.xlu1 %v2915_v0, %s2472_s5 }
  0xbe   : > { %877 = vrot.lane.b32.xlu1 %v2920_v2, %s2472_s5 }
  0xbf   : > { %873 = vrot.lane.b32.xlu0 %v2923_v3, %s2472_s5 }
  0xc2   : > { %879 = vrot.lane.b32.xlu1 %v2928_v5, %s2472_s5 }
  0xc3   : > { %881 = vrot.lane.b32.xlu0 %v2933_v7, %s2472_s5 }
  0xc6   : > { %883 = vrot.lane.b32.xlu1 %v2938_v8, %s2472_s5 }
  0xc7   : > { %885 = vrot.lane.b32.xlu0 %v2943_v9, %s2472_s5 }
  0xca   : > { %887 = vrot.lane.b32.xlu1 %v2948_v11, %s2472_s5 }
  0xcb   : > { %889 = vrot.lane.b32.xlu0 %v2953_v12, %s2472_s5 }
  0xce   : > { %891 = vrot.lane.b32.xlu1 %v2958_v13, %s2472_s5 }
  0xcf   : > { %893 = vrot.lane.b32.xlu0 %v2963_v15, %s2472_s5 }
  0xd2   : > { %895 = vrot.lane.b32.xlu1 %v2968_v17, %s2472_s5 }
  0xd3   : > { %897 = vrot.lane.b32.xlu0 %v2973_v18, %s2472_s5 }
  0xd6   : > { %899 = vrot.lane.b32.xlu1 %v2978_v19, %s2472_s5 }
  0xd7   : > { %901 = vrot.lane.b32.xlu0 %v2983_v20, %s2472_s5 }
  0xda   : > { %903 = vrot.lane.b32.xlu1 %v2988_v21, %s2472_s5  ;;  %v2994_v22 = vpop.xlane.xlu1 %607  ;;  %v2996_v24 = vpop.xlane.xlu0 %601 }
  0xde   : > { %v2998_v26 = vpop.xlane.xlu1 %610  ;;  %v3000_v27 = vpop.xlane.xlu0 %604 }
  0xe2   : > { %v3003_v29 = vpop.xlane.xlu1 %616  ;;  %v3006_v32 = vpop.xlane.xlu0 %613 }
  0xe6   : > { %v3009_v35 = vpop.xlane.xlu1 %622  ;;  %v3015_v42 = vpop.xlane.xlu0 %619 }
  0xea   : > { %v3022_v50 = vpop.xlane.xlu1 %628  ;;  %v3029_v58 = vpop.xlane.xlu0 %625 }
  0xee   : > { %v3034_v62 = vpop.xlane.xlu1 %634 }
  0xf2   : > { %v3048_v46 = vpop.xlane.xlu1 %640 }
  0xf6   : > { %955 = vadd.xlane.f32.xlu0 %v954_v36  ;;  %v3040_v36 = vpop.xlane.xlu0 %631 }
  0xfa   : > { %961 = vadd.xlane.f32.xlu0 %v960_v44  ;;  %v2123_v44 = vld [vmem:[%s2808_s27 + $0x158] sm:$0xff]  ;;  %v3055_v56 = vpop.xlane.xlu0 %637 }
  0xfe   : > { %958 = vadd.xlane.f32.xlu1 %v957_v51  ;;  %964 = vadd.xlane.f32.xlu0 %v963_v53  ;;  %v949_v51 = vmul.f32 %v2123_v44, %v2770_v39  ;;  %v948_v53 = vmul.f32 %v2122_v45, %v2774_v41  ;;  %v3066_v38 = vpop.xlane.xlu0 %643  ;;  %v990_v44 = vsel %vm599_vm0, %v950_v30, 0.0 }
  0xff   : > { %4999 = vst [vmem:[#allocation16_spill] sm:$0xff] %v3066_v38 }
 0x100   : > { %v984_v28 = vsel %vm599_vm0, %v948_v53, 0.0 }
 0x102   : > { %970 = vadd.xlane.f32.xlu1 %v969_v60  ;;  %967 = vadd.xlane.f32.xlu0 %v966_v63  ;;  %v987_v60 = vsel %vm599_vm0, %v949_v51, 0.0  ;;  %v3060_v63 = vpop.xlane.xlu1 %646  ;;  %v999_v51 = vsel %vm599_vm0, %v953_v43, 0.0  ;;  %v3076_v53 = vpop.xlane.xlu0 %713 }
 0x103   : > { %4998 = vst [vmem:[#allocation15_spill] sm:$0xff] %v3060_v63  ;;  %v2132_v63 = vld [vmem:[%s2808_s27 + $0x1a0] sm:$0xff] }
 0x106   : > { %976 = vadd.xlane.f32.xlu1 %v975_v37  ;;  %973 = vadd.xlane.f32.xlu0 %v972_v40  ;;  %v2126_v37 = vld [vmem:[%s2808_s27 + $0x170] sm:$0xff]  ;;  %v993_v40 = vsel %vm599_vm0, %v951_v61, 0.0  ;;  %v3080_v59 = vpop.xlane.xlu0 %719 }
 0x107   : > { %v952_v45 = vmul.f32 %v2126_v37, %v2802_v57 }
 0x10a   : > { %982 = vadd.xlane.f32.xlu1 %v981_v48  ;;  %979 = vadd.xlane.f32.xlu0 %v978_v52  ;;  %v3072_v48 = vpop.xlane.xlu1 %716  ;;  %v996_v52 = vsel %vm599_vm0, %v952_v45, 0.0  ;;  %v3084_v61 = vpop.xlane.xlu0 %725 }
 0x10b   : > { %5000 = vst [vmem:[#allocation17_spill] sm:$0xff] %v3084_v61 }
 0x10e   : > { %988 = vadd.xlane.f32.xlu1 %v987_v60  ;;  %985 = vadd.xlane.f32.xlu0 %v984_v28  ;;  %v3078_v54 = vpop.xlane.xlu1 %722  ;;  %v3088_v30 = vpop.xlane.xlu0 %731 }
 0x10f   : > { %5002 = vst [vmem:[#allocation19_spill] sm:$0xff] %v3088_v30 }
 0x112   : > { %994 = vadd.xlane.f32.xlu1 %v993_v40  ;;  %991 = vadd.xlane.f32.xlu0 %v990_v44  ;;  %v3082_v60 = vpop.xlane.xlu1 %728  ;;  %v3096_v37 = vpop.xlane.xlu0 %737 }
 0x113   : > { %5004 = vst [vmem:[#allocation21_spill] sm:$0xff] %v3096_v37 }
 0x116   : > { %1000 = vadd.xlane.f32.xlu1 %v999_v51  ;;  %997 = vadd.xlane.f32.xlu0 %v996_v52  ;;  %v3086_v28 = vpop.xlane.xlu1 %734  ;;  %v3106_v43 = vpop.xlane.xlu0 %743 }
 0x117   : > { %5001 = vst [vmem:[#allocation18_spill] sm:$0xff] %v3086_v28  ;;  %5006 = vst [vmem:[#allocation23_spill] sm:$0xff] %v3106_v43  ;;  %v2128_v43 = vld [vmem:[%s2808_s27 + $0x180] sm:$0xff] }
 0x11a   : > { %v3092_v34 = vpop.xlane.xlu1 %740  ;;  %v3110_v45 = vpop.xlane.xlu0 %749 }
 0x11b   : > { %5003 = vst [vmem:[#allocation20_spill] sm:$0xff] %v3092_v34  ;;  %5008 = vst [vmem:[#allocation25_spill] sm:$0xff] %v3110_v45  ;;  %v1099_v45 = vmul.f32 %v2128_v43, %v2717_v4  ;;  %v2133_v43 = vld [vmem:[%s2808_s27 + $0x1a8] sm:$0xff] }
 0x11e   : > { %v3102_v40 = vpop.xlane.xlu1 %746  ;;  %v3114_v52 = vpop.xlane.xlu0 %755 }
 0x11f   : > { %5005 = vst [vmem:[#allocation22_spill] sm:$0xff] %v3102_v40  ;;  %5010 = vst [vmem:[#allocation27_spill] sm:$0xff] %v3114_v52  ;;  %v2129_v40 = vld [vmem:[%s2808_s27 + $0x188] sm:$0xff] }
 0x120   : > { %v1100_v28 = vmul.f32 %v2129_v40, %v2727_v10  ;;  %v1115_v10 = vsel %vm599_vm0, %v1099_v45, 0.0  ;;  %v1103_v40 = vmul.f32 %v2132_v63, %v2737_v16  ;;  %v1104_v63 = vmul.f32 %v2133_v43, %v2733_v14  ;;  %v2137_v14 = vld [vmem:[%s2808_s27 + $0x1c8] sm:$0xff] }
 0x122   : > { %v3108_v44 = vpop.xlane.xlu1 %752  ;;  %v3118_v34 = vpop.xlane.xlu0 %810 }
 0x123   : > { %5007 = vst [vmem:[#allocation24_spill] sm:$0xff] %v3108_v44  ;;  %5011 = vst [vmem:[#allocation28_spill] sm:$0xff] %v3118_v34  ;;  %v2130_v44 = vld [vmem:[%s2808_s27 + $0x190] sm:$0xff]  ;;  %v2131_v34 = vld [vmem:[%s2808_s27 + $0x198] sm:$0xff] }
 0x124   : > { %v1101_v52 = vmul.f32 %v2130_v44, %v2712_v1  ;;  %v1102_v4 = vmul.f32 %v2131_v34, %v2721_v6  ;;  %v1127_v44 = vsel %vm599_vm0, %v1103_v40, 0.0  ;;  %v1130_v34 = vsel %vm599_vm0, %v1104_v63, 0.0 }
 0x126   : > { %v3112_v51 = vpop.xlane.xlu1 %758  ;;  %v3126_v38 = vpop.xlane.xlu0 %816  ;;  %v1124_v16 = vsel %vm599_vm0, %v1102_v4, 0.0 }
 0x127   : > { %1020 = vrot.lane.b32.xlu1 %v2915_v0, %s2473_s6  ;;  %5009 = vst [vmem:[#allocation26_spill] sm:$0xff] %v3112_v51  ;;  %5013 = vst [vmem:[#allocation30_spill] sm:$0xff] %v3126_v38  ;;  %v1118_v51 = vsel %vm599_vm0, %v1100_v28, 0.0  ;;  %v1121_v38 = vsel %vm599_vm0, %v1101_v52, 0.0  ;;  %v2134_v28 = vld [vmem:[%s2808_s27 + $0x1b0] sm:$0xff]  ;;  %v2135_v52 = vld [vmem:[%s2808_s27 + $0x1b8] sm:$0xff] }
 0x128   : > { %v1105_v45 = vmul.f32 %v2134_v28, %v2750_v25  ;;  %v1106_v25 = vmul.f32 %v2135_v52, %v2746_v23  ;;  %v2139_v23 = vld [vmem:[%s2808_s27 + $0x1d8] sm:$0xff] }
 0x12a   : > { %v3116_v37 = vpop.xlane.xlu1 %813  ;;  %v1133_v6 = vsel %vm599_vm0, %v1105_v45, 0.0  ;;  %v2140_v45 = vld [vmem:[%s2808_s27 + $0x1e0] sm:$0xff] }
 0x12b   : > { %1022 = vrot.lane.b32.xlu1 %v2920_v2, %s2473_s6 }
 0x12c   : > { %1018 = vrot.lane.b32.xlu0 %v2923_v3, %s2473_s6 }
 0x12e   : > { %v3121_v30 = vpop.xlane.xlu1 %819 }
 0x12f   : > { %1024 = vrot.lane.b32.xlu1 %v2928_v5, %s2473_s6  ;;  %5012 = vst [vmem:[#allocation29_spill] sm:$0xff] %v3121_v30  ;;  %v3137_v30 = vpop.xlane.xlu0 %822 }
 0x130   : > { %1026 = vrot.lane.b32.xlu0 %v2933_v7, %s2473_s6  ;;  %5014 = vst [vmem:[#allocation31_spill] sm:$0xff] %v3137_v30 }
 0x132   : > { %v3132_v61 = vpop.xlane.xlu1 %825 }
 0x133   : > { %v3151_v30 = vpop.xlane.xlu0 %828 }
 0x136   : > { %v3143_v1 = vpop.xlane.xlu1 %831 }
 0x137   : > { %v3163_v43 = vpop.xlane.xlu0 %834 }
 0x13a   : > { %v3158_v40 = vpop.xlane.xlu1 %837 }
 0x14f   : > { %1119 = vadd.xlane.f32.xlu0 %v1118_v51  ;;  %v2136_v51 = vld [vmem:[%s2808_s27 + $0x1c0] sm:$0xff] }
 0x153   : > { %1116 = vadd.xlane.f32.xlu1 %v1115_v10  ;;  %1122 = vadd.xlane.f32.xlu0 %v1121_v38  ;;  %v1107_v38 = vmul.f32 %v2136_v51, %v2762_v33  ;;  %v2138_v10 = vld [vmem:[%s2808_s27 + $0x1d0] sm:$0xff]  ;;  %v1136_v33 = vsel %vm599_vm0, %v1106_v25, 0.0  ;;  %v1111_v51 = vmul.f32 %v2140_v45, %v2789_v49  ;;  %v2143_v49 = vld [vmem:[%s2808_s27 + $0x1f8] sm:$0xff] }
 0x154   : > { %v1109_v28 = vmul.f32 %v2138_v10, %v2774_v41  ;;  %v1110_v41 = vmul.f32 %v2139_v23, %v2770_v39 }
 0x155   : > { %v1139_v4 = vsel %vm599_vm0, %v1107_v38, 0.0  ;;  %v2141_v38 = vld [vmem:[%s2808_s27 + $0x1e8] sm:$0xff] }
 0x156   : > { %v1145_v63 = vsel %vm599_vm0, %v1109_v28, 0.0  ;;  %v1148_v10 = vsel %vm599_vm0, %v1110_v41, 0.0 }
 0x157   : > { %1128 = vadd.xlane.f32.xlu1 %v1127_v44  ;;  %1125 = vadd.xlane.f32.xlu0 %v1124_v16  ;;  %v1108_v44 = vmul.f32 %v2137_v14, %v2758_v31  ;;  %v3169_v16 = vpop.xlane.xlu1 %843  ;;  %v1151_v31 = vsel %vm599_vm0, %v1111_v51, 0.0  ;;  %v1112_v14 = vmul.f32 %v2141_v38, %v2785_v47 }
 0x159   : > { %v1142_v52 = vsel %vm599_vm0, %v1108_v44, 0.0  ;;  %v1114_v44 = vmul.f32 %v2143_v49, %v2798_v55 }
 0x15b   : > { %1134 = vadd.xlane.f32.xlu1 %v1133_v6  ;;  %1131 = vadd.xlane.f32.xlu0 %v1130_v34  ;;  %v2142_v6 = vld [vmem:[%s2808_s27 + $0x1f0] sm:$0xff]  ;;  %v3177_v34 = vpop.xlane.xlu0 %840  ;;  %s2408_s27 = scalar_lea.vmem %s4779_s13, 2048 }
 0x15c   : > { %v1113_v25 = vmul.f32 %v2142_v6, %v2802_v57  ;;  %v1160_v57 = vsel %vm599_vm0, %v1114_v44, 0.0  ;;  %p2409_p0 = scmp.ne.s32.totalorder %s4779_s13, %s2408_s27 }
 0x15e   : > { %v1157_v39 = vsel %vm599_vm0, %v1113_v25, 0.0  ;;  %p2410_p1 = pnand %p2409_p0, %p2545_p6 }
 0x15f   : > { %1140 = vadd.xlane.f32.xlu1 %v1139_v4  ;;  %1137 = vadd.xlane.f32.xlu0 %v1136_v33  ;;  %v3183_v4 = vpop.xlane.xlu1 %849  ;;  %v3187_v28 = vpop.xlane.xlu0 %846  ;;  %v1154_v33 = vsel %vm599_vm0, %v1112_v14, 0.0 }
 0x160   : > { %p2411_p2 = pneg %p2410_p1 }
 0x163   : > { %1146 = vadd.xlane.f32.xlu1 %v1145_v63  ;;  %1143 = vadd.xlane.f32.xlu0 %v1142_v52  ;;  %v3191_v45 = vpop.xlane.xlu1 %855  ;;  %v3194_v47 = vpop.xlane.xlu0 %852 }
 0x167   : > { %1152 = vadd.xlane.f32.xlu1 %v1151_v31  ;;  %1149 = vadd.xlane.f32.xlu0 %v1148_v10  ;;  %v3196_v23 = vpop.permute.xlu1 %875  ;;  %v3198_v63 = vpop.permute.xlu0 %873 }
 0x168   : > { %5015 = vst [vmem:[#allocation32_spill] sm:$0xff] %v3196_v23  ;;  %5016 = vst [vmem:[#allocation33_spill] sm:$0xff] %v3198_v63  ;;  %vm4939_vm2 = vcmp.eq.s32.totalorder %v2915_v0, %v3196_v23  ;;  %vm905_vm4 = vcmp.eq.s32.totalorder %v2923_v3, %v3198_v63 }
 0x16b   : > { %1158 = vadd.xlane.f32.xlu1 %v1157_v39  ;;  %1155 = vadd.xlane.f32.xlu0 %v1154_v33  ;;  %v3200_v51 = vpop.permute.xlu1 %877  ;;  %v3202_v52 = vpop.permute.xlu0 %881 }
 0x16c   : > { %5017 = vst [vmem:[#allocation34_spill] sm:$0xff] %v3200_v51  ;;  %5018 = vst [vmem:[#allocation35_spill] sm:$0xff] %v3202_v52  ;;  %v3307_v52 = vmul.f32 20.0, %v2998_v26  ;;  %v3327_v26 = vmul.f32 20.0, %v3015_v42  ;;  %v3348_v42 = vmul.f32 20.0, %v3078_v54  ;;  %v5061_v54 = vld [vmem:[#allocation17_spill] sm:$0xff]  ;;  %vm4930_vm5 = vcmp.eq.s32.totalorder %v2920_v2, %v3200_v51 }
 0x16e   : > { %5041 = vst [vmem:[#allocation58_spill] sm:$0xff] %v3307_v52  ;;  %5048 = vst [vmem:[#allocation65_spill] sm:$0xff] %v3327_v26 }
 0x16f   : > { %1161 = vadd.xlane.f32.xlu0 %v1160_v57  ;;  %v3206_v55 = vpop.permute.xlu1 %879  ;;  %v3210_v41 = vpop.permute.xlu0 %885  ;;  %5055 = vst [vmem:[#allocation72_spill] sm:$0xff] %v3348_v42 }
 0x170   : > { %5019 = vst [vmem:[#allocation36_spill] sm:$0xff] %v3206_v55  ;;  %5020 = vst [vmem:[#allocation37_spill] sm:$0xff] %v3210_v41  ;;  %v3301_v41 = vmul.f32 20.0, %v2994_v22  ;;  %v3321_v22 = vmul.f32 20.0, %v3006_v32  ;;  %v3342_v32 = vmul.f32 20.0, %v3040_v36  ;;  %v3361_v36 = vmul.f32 20.0, %v3080_v59 }
 0x172   : > { %5039 = vst [vmem:[#allocation56_spill] sm:$0xff] %v3301_v41  ;;  %5046 = vst [vmem:[#allocation63_spill] sm:$0xff] %v3321_v22 }
 0x173   : > { %v3212_v6 = vpop.permute.xlu1 %883  ;;  %v3218_v38 = vpop.permute.xlu0 %889  ;;  %5053 = vst [vmem:[#allocation70_spill] sm:$0xff] %v3342_v32  ;;  %5059 = vst [vmem:[#allocation76_spill] sm:$0xff] %v3361_v36 }
 0x174   : > { %5021 = vst [vmem:[#allocation38_spill] sm:$0xff] %v3212_v6  ;;  %5022 = vst [vmem:[#allocation39_spill] sm:$0xff] %v3218_v38  ;;  %v3318_v6 = vmul.f32 20.0, %v3003_v29  ;;  %v3339_v29 = vmul.f32 20.0, %v3034_v62 }
 0x176   : > { %5045 = vst [vmem:[#allocation62_spill] sm:$0xff] %v3318_v6  ;;  %5052 = vst [vmem:[#allocation69_spill] sm:$0xff] %v3339_v29 }
 0x177   : > { %v3222_v31 = vpop.permute.xlu1 %887  ;;  %v3228_v25 = vpop.permute.xlu0 %893 }
 0x178   : > { %5023 = vst [vmem:[#allocation40_spill] sm:$0xff] %v3222_v31  ;;  %5024 = vst [vmem:[#allocation41_spill] sm:$0xff] %v3228_v25 }
 0x17b   : > { %v3232_v10 = vpop.permute.xlu1 %891  ;;  %v3238_v14 = vpop.permute.xlu0 %897 }
 0x17c   : > { %1028 = vrot.lane.b32.xlu1 %v2938_v8, %s2473_s6  ;;  %5025 = vst [vmem:[#allocation42_spill] sm:$0xff] %v3232_v10  ;;  %5026 = vst [vmem:[#allocation43_spill] sm:$0xff] %v3238_v14 }
 0x17f   : > { %v3242_v49 = vpop.permute.xlu1 %895  ;;  %v3246_v39 = vpop.permute.xlu0 %901 }
 0x180   : > { %1032 = vrot.lane.b32.xlu1 %v2948_v11, %s2473_s6  ;;  %5027 = vst [vmem:[#allocation44_spill] sm:$0xff] %v3242_v49  ;;  %5028 = vst [vmem:[#allocation45_spill] sm:$0xff] %v3246_v39 }
 0x183   : > { %v3249_v33 = vpop.permute.xlu1 %899  ;;  %v3252_v44 = vpop.xlane.xlu0 %955 }
 0x184   : > { %1034 = vrot.lane.b32.xlu1 %v2953_v12, %s2473_s6  ;;  %5029 = vst [vmem:[#allocation46_spill] sm:$0xff] %v3249_v33 }
 0x185   : > { %1030 = vrot.lane.b32.xlu0 %v2943_v9, %s2473_s6 }
 0x187   : > { %v3256_v57 = vpop.permute.xlu1 %903  ;;  %v3259_v14 = vpop.xlane.xlu0 %961 }
 0x188   : > { %1036 = vrot.lane.b32.xlu1 %v2958_v13, %s2473_s6  ;;  %5030 = vst [vmem:[#allocation47_spill] sm:$0xff] %v3256_v57 }
 0x189   : > { %1038 = vrot.lane.b32.xlu0 %v2963_v15, %s2473_s6 }
 0x18b   : > { %v959_v39 = vpop.xlane.xlu1 %958  ;;  %v3264_v33 = vpop.xlane.xlu0 %964 }
 0x18c   : > { %1040 = vrot.lane.b32.xlu1 %v2968_v17, %s2473_s6  ;;  %v1003_v55 = vmul.f32 20.0, %v959_v39 }
 0x18d   : > { %1042 = vrot.lane.b32.xlu0 %v2973_v18, %s2473_s6 }
 0x18f   : > { %v3267_v25 = vpop.xlane.xlu1 %970  ;;  %v3271_v57 = vpop.xlane.xlu0 %967 }
 0x190   : > { %1044 = vrot.lane.b32.xlu1 %v2978_v19, %s2473_s6 }
 0x191   : > { %1046 = vrot.lane.b32.xlu0 %v2983_v20, %s2473_s6 }
 0x193   : > { %v3274_v49 = vpop.xlane.xlu1 %976 }
 0x194   : > { %1048 = vrot.lane.b32.xlu1 %v2988_v21, %s2473_s6 }
 0x195   : > { %1179 = vrot.lane.b32.xlu0 %v2923_v3, %s2474_s7 }
 0x197   : > { %v3280_v10 = vpop.xlane.xlu1 %982 }
 0x198   : > { %1181 = vrot.lane.b32.xlu1 %v2915_v0, %s2474_s7 }
 0x199   : > { %1183 = vrot.lane.b32.xlu0 %v2920_v2, %s2474_s7 }
 0x19c   : > { %1185 = vrot.lane.b32.xlu1 %v2928_v5, %s2474_s7  ;;  %v3333_v5 = vmul.f32 20.0, %v3029_v58  ;;  %v3353_v58 = vmul.f32 20.0, %v3048_v46  ;;  %v5065_v46 = vld [vmem:[#allocation15_spill] sm:$0xff] }
 0x19d   : > { %1187 = vrot.lane.b32.xlu0 %v2933_v7, %s2474_s7  ;;  %v3304_v7 = vmul.f32 20.0, %v2996_v24  ;;  %v3324_v24 = vmul.f32 20.0, %v3009_v35  ;;  %v3345_v35 = vmul.f32 20.0, %v3076_v53  ;;  %v3364_v53 = vmul.f32 20.0, %v3082_v60 }
 0x19e   : > { %5050 = vst [vmem:[#allocation67_spill] sm:$0xff] %v3333_v5  ;;  %5057 = vst [vmem:[#allocation74_spill] sm:$0xff] %v3353_v58 }
 0x19f   : > { %5040 = vst [vmem:[#allocation57_spill] sm:$0xff] %v3304_v7  ;;  %5047 = vst [vmem:[#allocation64_spill] sm:$0xff] %v3324_v24  ;;  %v1259_v60 = vmax.f32 %v3304_v7, %v3345_v35  ;;  %v1261_v7 = vmax.f32 %v3301_v41, %v3361_v36  ;;  %v5080_v36 = vld [vmem:[#allocation22_spill] sm:$0xff] }
 0x1a0   : > { %1189 = vrot.lane.b32.xlu1 %v2938_v8, %s2474_s7  ;;  %v3315_v8 = vmul.f32 20.0, %v3000_v27  ;;  %v3336_v27 = vmul.f32 20.0, %v3116_v37  ;;  %5054 = vst [vmem:[#allocation71_spill] sm:$0xff] %v3345_v35  ;;  %v3356_v37 = vmul.f32 20.0, %v3055_v56  ;;  %5060 = vst [vmem:[#allocation77_spill] sm:$0xff] %v3364_v53  ;;  %v5067_v56 = vld [vmem:[#allocation16_spill] sm:$0xff] }
 0x1a1   : > { %1191 = vrot.lane.b32.xlu0 %v2943_v9, %s2474_s7  ;;  %v3419_v35 = vmul.f32 20.0, %v5080_v36 }
 0x1a2   : > { %5044 = vst [vmem:[#allocation61_spill] sm:$0xff] %v3315_v8  ;;  %5051 = vst [vmem:[#allocation68_spill] sm:$0xff] %v3336_v27 }
 0x1a3   : > { %5058 = vst [vmem:[#allocation75_spill] sm:$0xff] %v3356_v37  ;;  %5081 = vst [vmem:[#allocation22_spill] sm:$0xff] %v3419_v35 }
 0x1a4   : > { %1193 = vrot.lane.b32.xlu1 %v2948_v11, %s2474_s7  ;;  %v3310_v11 = vmul.f32 20.0, %v3072_v48  ;;  %v3330_v48 = vmul.f32 20.0, %v3022_v50 }
 0x1a5   : > { %1195 = vrot.lane.b32.xlu0 %v2953_v12, %s2474_s7  ;;  %v3284_v12 = vpop.xlane.xlu1 %988 }
 0x1a6   : > { %5031 = vst [vmem:[#allocation48_spill] sm:$0xff] %v3284_v12  ;;  %5042 = vst [vmem:[#allocation59_spill] sm:$0xff] %v3310_v11  ;;  %v1260_v62 = vmax.f32 %v3315_v8, %v3310_v11  ;;  %v5069_v8 = vld [vmem:[#allocation18_spill] sm:$0xff] }
 0x1a7   : > { %5049 = vst [vmem:[#allocation66_spill] sm:$0xff] %v3330_v48  ;;  %v3379_v39 = vmul.f32 20.0, %v5069_v8  ;;  %v5076_v8 = vld [vmem:[#allocation30_spill] sm:$0xff] }
 0x1a8   : > { %1197 = vrot.lane.b32.xlu1 %v2958_v13, %s2474_s7  ;;  %v3278_v13 = vpop.xlane.xlu0 %973  ;;  %v1276_v59 = vmax.f32 %v1260_v62, %v3336_v27  ;;  %v3396_v12 = vmul.f32 20.0, %v5076_v8 }
 0x1a9   : > { %1199 = vrot.lane.b32.xlu0 %v2963_v15, %s2474_s7  ;;  %5070 = vst [vmem:[#allocation18_spill] sm:$0xff] %v3379_v39 }
 0x1aa   : > { %5077 = vst [vmem:[#allocation30_spill] sm:$0xff] %v3396_v12  ;;  %v1292_v62 = vmax.f32 %v1276_v59, %v1003_v55  ;;  %v1004_v59 = vmul.f32 20.0, %v3259_v14  ;;  %v1277_v14 = vmax.f32 %v1261_v7, %v3396_v12 }
 0x1ac   : > { %1201 = vrot.lane.b32.xlu1 %v2968_v17, %s2474_s7  ;;  %v3282_v15 = vpop.xlane.xlu0 %979  ;;  %v1293_v7 = vmax.f32 %v1277_v14, %v1004_v59  ;;  %v5096_v14 = vld [vmem:[#allocation31_spill] sm:$0xff] }
 0x1ad   : > { %1203 = vrot.lane.b32.xlu0 %v2973_v18, %s2474_s7  ;;  %v3288_v18 = vpop.xlane.xlu1 %994 }
 0x1ae   : > { %5033 = vst [vmem:[#allocation50_spill] sm:$0xff] %v3288_v18 }
 0x1b0   : > { %1205 = vrot.lane.b32.xlu1 %v2978_v19, %s2474_s7  ;;  %v3286_v17 = vpop.xlane.xlu0 %985 }
 0x1b1   : > { %1207 = vrot.lane.b32.xlu0 %v2983_v20, %s2474_s7  ;;  %5032 = vst [vmem:[#allocation49_spill] sm:$0xff] %v3286_v17  ;;  %v3292_v19 = vpop.xlane.xlu1 %1000 }
 0x1b2   : > { %5035 = vst [vmem:[#allocation52_spill] sm:$0xff] %v3292_v19 }
 0x1b4   : > { %1209 = vrot.lane.b32.xlu1 %v2988_v21, %s2474_s7  ;;  %v3290_v38 = vpop.xlane.xlu0 %991 }
 0x1b5   : > { %5034 = vst [vmem:[#allocation51_spill] sm:$0xff] %v3290_v38  ;;  %v3296_v20 = vpop.permute.xlu1 %1020  ;;  %v3376_v38 = vmul.f32 20.0, %v5067_v56 }
 0x1b6   : > { %5037 = vst [vmem:[#allocation54_spill] sm:$0xff] %v3296_v20  ;;  %vm1051_vm1 = vcmp.eq.s32.totalorder %v2915_v0, %v3296_v20 }
 0x1b7   : > { %5068 = vst [vmem:[#allocation16_spill] sm:$0xff] %v3376_v38  ;;  %vm1067_vm3 = vmor %vm1051_vm1, %vm4939_vm2 }
 0x1b8   : > { %v3294_v9 = vpop.xlane.xlu0 %997 }
 0x1b9   : > { %5036 = vst [vmem:[#allocation53_spill] sm:$0xff] %v3294_v9  ;;  %v3312_v31 = vpop.permute.xlu1 %1022  ;;  %v3367_v9 = vmul.f32 20.0, %v5061_v54  ;;  %v5072_v54 = vld [vmem:[#allocation19_spill] sm:$0xff] }
 0x1ba   : > { %5043 = vst [vmem:[#allocation60_spill] sm:$0xff] %v3312_v31  ;;  %v3373_v31 = vmul.f32 20.0, %v5065_v46  ;;  %v3389_v18 = vmul.f32 20.0, %v5072_v54  ;;  %v1002_v46 = vmul.f32 20.0, %v3252_v44 }
 0x1bb   : > { %5062 = vst [vmem:[#allocation17_spill] sm:$0xff] %v3367_v9  ;;  %v1263_v54 = vmax.f32 %v3321_v22, %v3367_v9 }
 0x1bc   : > { %v3298_v21 = vpop.permute.xlu0 %1018  ;;  %5066 = vst [vmem:[#allocation15_spill] sm:$0xff] %v3373_v31  ;;  %5073 = vst [vmem:[#allocation19_spill] sm:$0xff] %v3389_v18  ;;  %v5110_v20 = vld [vmem:[#allocation51_spill] sm:$0xff] }
 0x1bd   : > { %5038 = vst [vmem:[#allocation55_spill] sm:$0xff] %v3298_v21  ;;  %v3382_v11 = vpop.permute.xlu1 %1024  ;;  %v5074_v21 = vld [vmem:[#allocation20_spill] sm:$0xff]  ;;  %v3627_v0 = vmul.f32 20.0, %v5110_v20 }
 0x1be   : > { %5071 = vst [vmem:[#allocation78_spill] sm:$0xff] %v3382_v11  ;;  %v3393_v17 = vmul.f32 20.0, %v5074_v21  ;;  %v1266_v21 = vmax.f32 %v3324_v24, %v3379_v39  ;;  %v5083_v24 = vld [vmem:[#allocation23_spill] sm:$0xff]  ;;  %v5085_v39 = vld [vmem:[#allocation24_spill] sm:$0xff]  ;;  %v5094_v11 = vld [vmem:[#allocation29_spill] sm:$0xff] }
 0x1c0   : > { %v3350_v50 = vpop.permute.xlu0 %1026  ;;  %5075 = vst [vmem:[#allocation20_spill] sm:$0xff] %v3393_v17 }
 0x1c1   : > { %5056 = vst [vmem:[#allocation73_spill] sm:$0xff] %v3350_v50  ;;  %v5063_v50 = vld [vmem:[#allocation28_spill] sm:$0xff] }
 0x1c2   : > { %v3370_v19 = vmul.f32 20.0, %v5063_v50  ;;  %v1262_v50 = vmax.f32 %v3307_v52, %v3348_v42  ;;  %v1264_v52 = vmax.f32 %v3318_v6, %v3364_v53  ;;  %v5078_v42 = vld [vmem:[#allocation21_spill] sm:$0xff]  ;;  %v1265_v6 = vmax.f32 %v3327_v26, %v3389_v18  ;;  %v5092_v18 = vld [vmem:[#allocation27_spill] sm:$0xff] }
 0x1c3   : > { %v3410_v8 = vmul.f32 20.0, %v5078_v42  ;;  %v1268_v42 = vmax.f32 %v3330_v48, %v3393_v17  ;;  %v3431_v53 = vmul.f32 20.0, %v5085_v39  ;;  %v5087_v26 = vld [vmem:[#allocation25_spill] sm:$0xff]  ;;  %v1270_v39 = vmax.f32 %v3339_v29, %v3419_v35 }
 0x1c4   : > { %5064 = vst [vmem:[#allocation28_spill] sm:$0xff] %v3370_v19  ;;  %v1275_v44 = vmax.f32 %v1259_v60, %v3370_v19  ;;  %v3426_v19 = vmul.f32 20.0, %v5083_v24  ;;  %v3434_v36 = vmul.f32 20.0, %v5087_v26  ;;  %v5090_v24 = vld [vmem:[#allocation26_spill] sm:$0xff]  ;;  %v3449_v26 = vmul.f32 20.0, %v5092_v18 }
 0x1c5   : > { %5086 = vst [vmem:[#allocation24_spill] sm:$0xff] %v3431_v53  ;;  %v1267_v48 = vmax.f32 %v3333_v5, %v3410_v8  ;;  %v3444_v17 = vmul.f32 20.0, %v5090_v24  ;;  %v3458_v24 = vmul.f32 20.0, %v3132_v61  ;;  %v1272_v18 = vmax.f32 %v3353_v58, %v3431_v53 }
 0x1c6   : > { %v1291_v22 = vmax.f32 %v1275_v44, %v1002_v46  ;;  %5084 = vst [vmem:[#allocation23_spill] sm:$0xff] %v3426_v19  ;;  %5088 = vst [vmem:[#allocation25_spill] sm:$0xff] %v3434_v36  ;;  %v1269_v5 = vmax.f32 %v3342_v32, %v3426_v19  ;;  %v3476_v32 = vmul.f32 20.0, %v3151_v30  ;;  %v1273_v58 = vmax.f32 %v3376_v38, %v3449_v26 }
 0x1c7   : > { %5091 = vst [vmem:[#allocation26_spill] sm:$0xff] %v3444_v17  ;;  %5093 = vst [vmem:[#allocation27_spill] sm:$0xff] %v3449_v26  ;;  %v1274_v61 = vmax.f32 %v3373_v31, %v3444_v17  ;;  %v3491_v30 = vmax.f32 %v1264_v52, %v3458_v24  ;;  %v3495_v17 = vmul.f32 20.0, %v3169_v16  ;;  %v3510_v52 = vmul.f32 20.0, %v3187_v28 }
 0x1c8   : > { %v3529_v28 = vmul.f32 20.0, %v3194_v47 }
 0x1c9   : > { %5099 = vst [vmem:[#allocation82_spill] sm:$0xff] %v3495_v17 }
 0x1ca   : > { %5102 = vst [vmem:[#allocation85_spill] sm:$0xff] %v3529_v28 }
 0x1dc   : > { %v1120_v56 = vpop.xlane.xlu0 %1119 }
 0x1dd   : > { %v3398_v27 = vmul.f32 20.0, %v1120_v56 }
 0x1df   : > { %v3414_v56 = vmax.f32 %v1292_v62, %v3398_v27 }
 0x1e0   : > { %v1117_v41 = vpop.xlane.xlu1 %1116  ;;  %v1123_v9 = vpop.xlane.xlu0 %1122 }
 0x1e1   : > { %5079 = vst [vmem:[#allocation21_spill] sm:$0xff] %v3414_v56  ;;  %v3421_v60 = vmul.f32 20.0, %v1117_v41  ;;  %v1516_v62 = vsub.f32 %v1003_v55, %v3414_v56  ;;  %v3439_v44 = vmul.f32 20.0, %v1123_v9 }
 0x1e3   : > { %5082 = vst [vmem:[#allocation79_spill] sm:$0xff] %v3421_v60  ;;  %v3437_v41 = vmax.f32 %v1291_v22, %v3421_v60  ;;  %v1533_v55 = vmul.f32 1.442695, %v1516_v62  ;;  %v3452_v22 = vmul.f32 20.0, %v5094_v11  ;;  %v3461_v62 = vmul.f32 20.0, %v5096_v14 }
 0x1e4   : > { %v1129_v12 = vpop.xlane.xlu1 %1128  ;;  %v1126_v60 = vpop.xlane.xlu0 %1125  ;;  %v3464_v29 = vmax.f32 %v1293_v7, %v3439_v44  ;;  %v1271_v11 = vmax.f32 %v3356_v37, %v3434_v36  ;;  %v5107_v36 = vld [vmem:[#allocation55_spill] sm:$0xff] }
 0x1e5   : > { %5089 = vst [vmem:[#allocation80_spill] sm:$0xff] %v3437_v41  ;;  %5095 = vst [vmem:[#allocation29_spill] sm:$0xff] %v3452_v22  ;;  %v1515_v9 = vsub.f32 %v1002_v46, %v3437_v41  ;;  %v3471_v46 = vmul.f32 20.0, %v3143_v1  ;;  %2200 = vpow2.f32 %v1533_v55  ;;  %v1278_v37 = vmax.f32 %v1262_v50, %v3452_v22 }
 0x1e6   : > { %5097 = vst [vmem:[#allocation31_spill] sm:$0xff] %v3461_v62  ;;  %5098 = vst [vmem:[#allocation81_spill] sm:$0xff] %v3464_v29  ;;  %v1517_v14 = vsub.f32 %v1004_v59, %v3464_v29  ;;  %v3485_v1 = vmul.f32 20.0, %v3158_v40  ;;  %v3488_v55 = vmul.f32 20.0, %v3163_v43  ;;  %v1279_v59 = vmax.f32 %v1263_v54, %v3461_v62 }
 0x1e7   : > { %v1531_v35 = vmul.f32 1.442695, %v1515_v9  ;;  %v3498_v9 = vmul.f32 20.0, %v3264_v33  ;;  %v3501_v50 = vmax.f32 %v1266_v21, %v3471_v46  ;;  %v3504_v40 = vmul.f32 20.0, %v3177_v34 }
 0x1e8   : > { %v3479_v7 = vpop.xlane.xlu1 %1134  ;;  %v1132_v31 = vpop.xlane.xlu0 %1131  ;;  %v3507_v43 = vmul.f32 20.0, %v3183_v4  ;;  %v3513_v54 = vmax.f32 %v1265_v6, %v3476_v32  ;;  %v3515_v16 = vmul.f32 20.0, %v1126_v60  ;;  %v1535_v33 = vmul.f32 1.442695, %v1517_v14 }
 0x1e9   : > { %2202 = vpow2.f32 %v1531_v35  ;;  %v3520_v21 = vmax.f32 %v1268_v42, %v3485_v1  ;;  %v3523_v34 = vmax.f32 %v1267_v48, %v3488_v55  ;;  %v3526_v4 = vmul.f32 20.0, %v3191_v45 }
 0x1ea   : > { %5100 = vst [vmem:[#allocation83_spill] sm:$0xff] %v3507_v43  ;;  %v3532_v60 = vmax.f32 %v1270_v39, %v3495_v17  ;;  %v1294_v62 = vmax.f32 %v1278_v37, %v3498_v9  ;;  %v3536_v35 = vmul.f32 20.0, %v3271_v57  ;;  %v3541_v48 = vmax.f32 %v1269_v5, %v3504_v40 }
 0x1eb   : > { %5101 = vst [vmem:[#allocation84_spill] sm:$0xff] %v3526_v4  ;;  %v3544_v45 = vmax.f32 %v1272_v18, %v3507_v43  ;;  %v3547_v47 = vmax.f32 %v1271_v11, %v3510_v52  ;;  %v3550_v42 = vmul.f32 20.0, %v3267_v25  ;;  %v1167_v57 = vmul.f32 20.0, %v1129_v12  ;;  %v5112_v43 = vld [vmem:[#allocation60_spill] sm:$0xff] }
 0x1ec   : > { %v3517_v38 = vpop.xlane.xlu1 %1140  ;;  %v1138_v6 = vpop.xlane.xlu0 %1137  ;;  %v3555_v37 = vmax.f32 %v1294_v62, %v3515_v16  ;;  %2204 = vpow2.f32 %v1535_v33  ;;  %v3560_v18 = vmax.f32 %v1274_v61, %v3526_v4  ;;  %v3563_v11 = vmax.f32 %v1273_v58, %v3529_v28  ;;  %v5104_v33 = vld [vmem:[#allocation48_spill] sm:$0xff]  ;;  %v5108_v4 = vld [vmem:[#allocation50_spill] sm:$0xff] }
 0x1ed   : > { %v3566_v25 = vmul.f32 20.0, %v3274_v49  ;;  %v3569_v14 = vmul.f32 20.0, %v3278_v13  ;;  %v1295_v62 = vmax.f32 %v1279_v59, %v3536_v35  ;;  %v3581_v58 = vmul.f32 20.0, %v3280_v10  ;;  %v5105_v10 = vld [vmem:[#allocation49_spill] sm:$0xff]  ;;  %v5113_v28 = vld [vmem:[#allocation52_spill] sm:$0xff] }
 0x1ee   : > { %5103 = vst [vmem:[#allocation86_spill] sm:$0xff] %v3555_v37  ;;  %v3584_v49 = vmul.f32 20.0, %v3282_v15  ;;  %v1296_v13 = vmax.f32 %v3491_v30, %v3550_v42  ;;  %v3593_v22 = vmul.f32 20.0, %v5104_v33  ;;  %v3597_v59 = vmul.f32 20.0, %v5105_v10 }
 0x1ef   : > { %v2201_v5 = vpop.eup %2200  ;;  %v3599_v15 = vmax.f32 %v1295_v62, %v1167_v57  ;;  %v3603_v26 = vmul.f32 20.0, %v1132_v31  ;;  %v1298_v30 = vmax.f32 %v3501_v50, %v3566_v25  ;;  %v1297_v33 = vmax.f32 %v3513_v54, %v3569_v14  ;;  %v5109_v50 = vld [vmem:[#allocation79_spill] sm:$0xff] }
 0x1f0   : > { %v3557_v39 = vpop.xlane.xlu1 %1146  ;;  %v3577_v12 = vpop.xlane.xlu0 %1143  ;;  %v1564_v61 = vsel %vm1067_vm3, 0.0, %v2201_v5  ;;  %v1518_v5 = vsub.f32 %v3498_v9, %v3555_v37  ;;  %vm1050_vm6 = vcmp.eq.s32.totalorder %v2923_v3, %v5107_v36  ;;  %v1660_v62 = vsub.f32 %v3398_v27, %v3414_v56  ;;  %v5152_v36 = vld [vmem:[#allocation42_spill] sm:$0xff] }
 0x1f1   : > { %1597 = vrot.lane.b32.xlu1 %v1564_v61, %s2475_s8  ;;  %5106 = vst [vmem:[#allocation48_spill] sm:$0xff] %v3599_v15  ;;  %v1299_v9 = vmax.f32 %v3523_v34, %v3584_v49  ;;  %v3620_v23 = vmul.f32 20.0, %v5108_v4  ;;  %v1659_v54 = vsub.f32 %v5109_v50, %v3437_v41  ;;  %v1661_v27 = vsub.f32 %v3439_v44, %v3464_v29  ;;  %vm1066_vm7 = vmor %vm1050_vm6, %vm905_vm4 }
 0x1f2   : > { %v1169_v31 = vmul.f32 20.0, %v3479_v7  ;;  %v1301_v34 = vmax.f32 %v3541_v48, %v3597_v59  ;;  %v1663_v4 = vsub.f32 %v1167_v57, %v3599_v15  ;;  %v3642_v20 = vmax.f32 %v1296_v13, %v3603_v26 }
 0x1f3   : > { %v2203_v10 = vpop.eup %2202  ;;  %v1537_v44 = vmul.f32 1.442695, %v1518_v5  ;;  %vm4932_vm8 = vcmp.eq.s32.totalorder %v2920_v2, %v5112_v43  ;;  %v1677_v7 = vmul.f32 1.442695, %v1660_v62  ;;  %v3648_v48 = vmul.f32 20.0, %v1138_v6  ;;  %v5114_v6 = vld [vmem:[#allocation53_spill] sm:$0xff] }
 0x1f4   : > { %v3605_v53 = vpop.xlane.xlu1 %1152  ;;  %v1150_v61 = vpop.xlane.xlu0 %1149  ;;  %5111 = vst [vmem:[#allocation49_spill] sm:$0xff] %v3642_v20  ;;  %v1563_v29 = vsel %vm1066_vm7, 0.0, %v2203_v10  ;;  %v1304_v63 = vmax.f32 %v3544_v45, %v3620_v23  ;;  %v3653_v57 = vmul.f32 20.0, %v5113_v28  ;;  %v1675_v13 = vmul.f32 1.442695, %v1659_v54  ;;  %vm3671_vm9 = vmor %vm4932_vm8, %vm4930_vm5  ;;  %v5119_v54 = vld [vmem:[#allocation36_spill] sm:$0xff] }
 0x1f5   : > { %v1662_v17 = vsub.f32 %v3515_v16, %v3555_v37  ;;  %1595 = vrot.lane.b32.xlu0 %v1563_v29, %s2475_s8  ;;  %v3661_v62 = vmul.f32 20.0, %v5114_v6  ;;  %v1679_v10 = vmul.f32 1.442695, %v1661_v27  ;;  %v3663_v19 = vmax.f32 %v1297_v33, %v1169_v31  ;;  %v5120_v27 = vld [vmem:[#allocation9_spill] sm:$0xff]  ;;  %v5141_v43 = vld [vmem:[#allocation12_spill] sm:$0xff] }
 0x1f6   : > { %v2205_v56 = vpop.eup %2204  ;;  %v1683_v29 = vmul.f32 1.442695, %v1663_v4  ;;  %v3676_v16 = vmul.f32 20.0, %v3517_v38  ;;  %2206 = vpow2.f32 %v1537_v44  ;;  %v1520_v33 = vsub.f32 %v3550_v42, %v3642_v20 }
 0x1f7   : > { %5115 = vst [vmem:[#allocation50_spill] sm:$0xff] %v3663_v19  ;;  %vm4931_vm10 = vcmp.eq.s32.totalorder %v5120_v27, %v5119_v54  ;;  %2208 = vpow2.f32 %v1677_v7  ;;  %v1519_v6 = vsub.f32 %v3536_v35, %v3599_v15  ;;  %v3687_v5 = vmax.f32 %v1298_v30, %v3648_v48 }
 0x1f8   : > { %v3644_v50 = vpop.xlane.xlu1 %1158  ;;  %v1156_v41 = vpop.xlane.xlu0 %1155  ;;  %v1565_v38 = vsel %vm3671_vm9, 0.0, %v2205_v56  ;;  %2210 = vpow2.f32 %v1675_v13  ;;  %v1681_v37 = vmul.f32 1.442695, %v1662_v17  ;;  %v3694_v42 = vmul.f32 20.0, %v3577_v12 }
 0x1f9   : > { %5121 = vst [vmem:[#allocation51_spill] sm:$0xff] %v3687_v5  ;;  %1599 = vrot.lane.b32.xlu0 %v1565_v38, %s2475_s8  ;;  %2212 = vpow2.f32 %v1679_v10  ;;  %v1665_v35 = vsub.f32 %v1169_v31, %v3663_v19  ;;  %v3699_v30 = vmul.f32 20.0, %v3557_v39  ;;  %v1541_v7 = vmul.f32 1.442695, %v1520_v33  ;;  %v5125_v38 = vld [vmem:[#allocation38_spill] sm:$0xff] }
 0x1fa   : > { %2214 = vpow2.f32 %v1683_v29  ;;  %v3704_v28 = vmax.f32 %v1299_v9, %v3676_v16  ;;  %v3706_v17 = vmul.f32 20.0, %v1150_v61  ;;  %v1664_v13 = vsub.f32 %v3603_v26, %v3642_v20  ;;  %v5126_v29 = vld [vmem:[#allocation11_spill] sm:$0xff]  ;;  %v5127_v9 = vld [vmem:[#allocation78_spill] sm:$0xff] }
 0x1fb   : > { %v3712_v10 = vmul.f32 20.0, %v1156_v41  ;;  %v1539_v31 = vmul.f32 1.442695, %v1519_v6  ;;  %v1522_v39 = vsub.f32 %v3566_v25, %v3687_v5  ;;  %vm4936_vm11 = vcmp.eq.s32.totalorder %v5126_v29, %v5125_v38 }
 0x1fc   : > { %v3678_v45 = vpop.permute.xlu1 %1028  ;;  %v1162_v4 = vpop.xlane.xlu0 %1161  ;;  %5122 = vst [vmem:[#allocation52_spill] sm:$0xff] %v3704_v28  ;;  %vm1053_vm12 = vcmp.eq.s32.totalorder %v5120_v27, %v5127_v9  ;;  %2216 = vpow2.f32 %v1681_v37  ;;  %v5128_v61 = vmax.f32 %v3520_v21, %v3581_v58  ;;  %v1521_v41 = vsub.f32 %v3569_v14, %v3663_v19  ;;  %v3796_v27 = vld [vmem:[%s2912_s30 + $0x20] sm:$0xff] }
 0x1fd   : > { %5118 = vst [vmem:[#allocation79_spill] sm:$0xff] %v3678_v45  ;;  %v1687_v6 = vmul.f32 1.442695, %v1665_v35  ;;  %v3731_v25 = vmax.f32 %v1301_v34, %v3699_v30  ;;  %v3734_v56 = vmul.f32 20.0, %v3605_v53  ;;  %2218 = vpow2.f32 %v1541_v7  ;;  %v5134_v35 = vld [vmem:[#allocation40_spill] sm:$0xff]  ;;  %v5135_v34 = vld [vmem:[#allocation13_spill] sm:$0xff]  ;;  %vm1069_vm15 = vmor %vm1053_vm12, %vm4931_vm10 }
 0x1fe   : > { %v3726_v26 = vmax.f32 %v5128_v61, %v3694_v42  ;;  %v5131_v37 = vmax.f32 %v3532_v60, %v3593_v22  ;;  %v1545_v21 = vmul.f32 1.442695, %v1522_v39  ;;  %v1543_v61 = vmul.f32 1.442695, %v1521_v41  ;;  %v5137_v39 = vld [vmem:[#allocation35_spill] sm:$0xff]  ;;  %v5138_v41 = vld [vmem:[#allocation10_spill] sm:$0xff] }
 0x1ff   : > { %5130 = vst [vmem:[#allocation89_spill] sm:$0xff] %v3731_v25  ;;  %v1523_v14 = vsub.f32 %v3584_v49, %v3704_v28  ;;  %vm4946_vm13 = vcmp.eq.s32.totalorder %v5135_v34, %v5134_v35  ;;  %v1685_v51 = vmul.f32 1.442695, %v1664_v13  ;;  %v3749_v53 = vmax.f32 %v1304_v63, %v3712_v10  ;;  %v5166_v35 = vld [vmem:[#allocation46_spill] sm:$0xff]  ;;  %v3937_v34 = vld [vmem:[%s2912_s30 + $0x70] sm:$0xff] }
 0x200   : > { %v3708_v12 = vpop.permute.xlu1 %1032  ;;  %v3716_v33 = vpop.permute.xlu0 %1030  ;;  %5129 = vst [vmem:[#allocation88_spill] sm:$0xff] %v3726_v26  ;;  %v3740_v44 = vmax.f32 %v5131_v37, %v3706_v17  ;;  %v3751_v7 = vmul.f32 20.0, %v1162_v4  ;;  %2220 = vpow2.f32 %v1539_v31  ;;  %vm4945_vm14 = vcmp.eq.s32.totalorder %v5138_v41, %v5137_v39  ;;  %v5140_v31 = vld [vmem:[#allocation37_spill] sm:$0xff] }
 0x201   : > { %5123 = vst [vmem:[#allocation53_spill] sm:$0xff] %v3708_v12  ;;  %5124 = vst [vmem:[#allocation87_spill] sm:$0xff] %v3716_v33  ;;  %v2207_v37 = vpop.eup %2206  ;;  %v1667_v63 = vsub.f32 %v3676_v16, %v3704_v28  ;;  %2222 = vpow2.f32 %v1545_v21  ;;  %v1547_v49 = vmul.f32 1.442695, %v1523_v14  ;;  %v1524_v4 = vsub.f32 %v3581_v58, %v3726_v26 }
 0x202   : > { %5132 = vst [vmem:[#allocation90_spill] sm:$0xff] %v3740_v44  ;;  %5136 = vst [vmem:[#allocation92_spill] sm:$0xff] %v3749_v53  ;;  %v3767_v13 = vpop.eup %2208  ;;  %vm4956_vm0 = vcmp.eq.s32.totalorder %v5141_v43, %v5140_v31  ;;  %v5142_v54 = vmax.f32 %v3547_v47, %v3627_v0  ;;  %v3778_v9 = vmul.f32 20.0, %v3644_v50  ;;  %v1566_v16 = vsel %vm1069_vm15, 0.0, %v2207_v37  ;;  %v5146_v37 = vld [vmem:[#allocation39_spill] sm:$0xff]  ;;  %v3975_v31 = vld [vmem:[%s2912_s30 + $0x78] sm:$0xff] }
 0x203   : > { %5139 = vst [vmem:[#allocation93_spill] sm:$0xff] %v3767_v13  ;;  %vm4938_vm3 = vcmp.eq.s32.totalorder %v5126_v29, %v3678_v45  ;;  %v3782_v58 = vpop.eup %2210  ;;  %1601 = vrot.lane.b32.xlu1 %v1566_v16, %s2475_s8  ;;  %2224 = vpow2.f32 %v1543_v61  ;;  %v1525_v21 = vsub.f32 %v3597_v59, %v3731_v25  ;;  %v1549_v47 = vmul.f32 1.442695, %v1524_v4  ;;  %v5147_v13 = vld [vmem:[#allocation14_spill] sm:$0xff] }
 0x204   : > { %v3742_v15 = vpop.permute.xlu1 %1034  ;;  %v3753_v60 = vpop.permute.xlu0 %1038  ;;  %v3775_v2 = vmax.f32 %v5142_v54, %v3734_v56  ;;  %5143 = vst [vmem:[#allocation94_spill] sm:$0xff] %v3778_v9  ;;  %5144 = vst [vmem:[#allocation95_spill] sm:$0xff] %v3782_v58  ;;  %v1526_v50 = vsub.f32 %v3593_v22, %v3740_v44  ;;  %vm913_vm7 = vcmp.eq.s32.totalorder %v5147_v13, %v5146_v37  ;;  %v5148_v58 = vld [vmem:[#allocation73_spill] sm:$0xff]  ;;  %2226 = vpow2.f32 %v1687_v6 }
 0x205   : > { %5133 = vst [vmem:[#allocation91_spill] sm:$0xff] %v3742_v15  ;;  %v3791_v54 = vpop.eup %2212  ;;  %vm4947_vm9 = vcmp.eq.s32.totalorder %v3796_v27, %v5148_v58  ;;  %v5149_v59 = vmax.f32 %v3560_v18, %v3653_v57  ;;  %v1528_v22 = vsub.f32 %v3620_v23, %v3749_v53  ;;  %v1691_v6 = vmul.f32 1.442695, %v1667_v63  ;;  %vm3833_vm5 = vmor %vm4938_vm3, %vm4936_vm11  ;;  %v3838_v63 = vld [vmem:[%s2912_s30 + $0x38] sm:$0xff] }
 0x206   : > { %5145 = vst [vmem:[#allocation96_spill] sm:$0xff] %v3791_v54  ;;  %v3810_v16 = vpop.eup %2214  ;;  %v3813_v54 = vld [vmem:[%s2912_s30 + $0x48] sm:$0xff]  ;;  %v1666_v3 = vsub.f32 %v3648_v48, %v3687_v5  ;;  %2228 = vpow2.f32 %v1547_v49  ;;  %v1553_v18 = vmul.f32 1.442695, %v1526_v50  ;;  %v5153_v23 = vmax.f32 %v3563_v11, %v3661_v62  ;;  %v3845_v11 = vld [vmem:[%s2912_s30 + $0x58] sm:$0xff]  ;;  %v5157_v49 = vld [vmem:[#allocation44_spill] sm:$0xff] }
 0x207   : > { %v3804_v61 = vmax.f32 %v5149_v59, %v3751_v7  ;;  %5151 = vst [vmem:[#allocation14_spill] sm:$0xff] %v3810_v16  ;;  %vm4959_vm15 = vcmp.eq.s32.totalorder %v3813_v54, %v5152_v36  ;;  %v1669_v59 = vsub.f32 %v3699_v30, %v3731_v25  ;;  %vm4940_vm10 = vcmp.eq.s32.totalorder %v3838_v63, %v3708_v12  ;;  %v3842_v30 = vpop.eup %2216  ;;  %v3897_v48 = vld [vmem:[%s2912_s30 + $0x40] sm:$0xff]  ;;  %v3904_v12 = vld [vmem:[%s2912_s30 + $0x68] sm:$0xff] }
 0x208   : > { %v3787_v14 = vpop.permute.xlu1 %1036  ;;  %v3806_v4 = vpop.permute.xlu0 %1042  ;;  %v3825_v16 = vmax.f32 %v5153_v23, %v3778_v9  ;;  %2230 = vpow2.f32 %v1549_v47  ;;  %5156 = vst [vmem:[#allocation97_spill] sm:$0xff] %v3842_v30  ;;  %vm4963_vm8 = vcmp.eq.s32.totalorder %v3845_v11, %v5157_v49  ;;  %v1551_v23 = vmul.f32 1.442695, %v1525_v21  ;;  %v3856_v47 = vld [vmem:[%s2912_s30 + $0x30] sm:$0xff]  ;;  %vm3874_vm3 = vmor %vm4940_vm10, %vm4946_vm13  ;;  %v5163_v21 = vld [vmem:[#allocation41_spill] sm:$0xff] }
 0x209   : > { %5150 = vst [vmem:[#allocation39_spill] sm:$0xff] %v3806_v4  ;;  %2232 = vpow2.f32 %v1685_v51  ;;  %v1527_v9 = vsub.f32 %v3627_v0, %v3775_v2  ;;  %v2219_v45 = vpop.eup %2218  ;;  %5159 = vst [vmem:[#allocation99_spill] sm:$0xff] %v3856_v47  ;;  %vm4954_vm11 = vcmp.eq.s32.totalorder %v3856_v47, %v3716_v33  ;;  %v1557_v29 = vmul.f32 1.442695, %v1528_v22  ;;  %v5171_v47 = vld [vmem:[#allocation45_spill] sm:$0xff] }
 0x20a   : > { %2234 = vpow2.f32 %v1553_v18  ;;  %v1530_v51 = vsub.f32 %v3653_v57, %v3804_v61  ;;  %v1689_v0 = vmul.f32 1.442695, %v1666_v3  ;;  %v1568_v50 = vsel %vm3833_vm5, 0.0, %v2219_v45  ;;  %v2221_v57 = vpop.eup %2220  ;;  %v3879_v18 = vld [vmem:[%s2912_s30 + $0x50] sm:$0xff]  ;;  %vm3889_vm5 = vmor %vm4947_vm9, %vm4945_vm14  ;;  %v3925_v3 = vld [vmem:[%s2912_s30 + $0x60] sm:$0xff]  ;;  %5170 = vst [vmem:[#allocation41_spill] sm:$0xff] %v3937_v34 }
 0x20b   : > { %2236 = vpow2.f32 %v1691_v6  ;;  %vm4969_vm2 = vcmp.eq.s32.totalorder %v3879_v18, %v5163_v21  ;;  %v1695_v45 = vmul.f32 1.442695, %v1669_v59  ;;  %v1668_v6 = vsub.f32 %v3694_v42, %v3726_v26  ;;  %1605 = vrot.lane.b32.xlu1 %v1568_v50, %s2475_s8  ;;  %v2223_v41 = vpop.eup %2222  ;;  %vm3916_vm13 = vmor %vm4954_vm11, %vm4956_vm0  ;;  %v5178_v59 = vld [vmem:[#allocation47_spill] sm:$0xff] }
 0x20c   : > { %v3853_v38 = vpop.permute.xlu1 %1040  ;;  %v3860_v30 = vpop.permute.xlu0 %1046  ;;  %vm4957_vm10 = vcmp.eq.s32.totalorder %v3897_v48, %v3742_v15  ;;  %v1529_v39 = vsub.f32 %v3661_v62, %v3825_v16  ;;  %vm4967_vm14 = vcmp.eq.s32.totalorder %v3904_v12, %v5166_v35  ;;  %v1567_v42 = vsel %vm3889_vm5, 0.0, %v2221_v57  ;;  %v5169_v57 = vld [vmem:[#allocation43_spill] sm:$0xff] }
 0x20d   : > { %5158 = vst [vmem:[#allocation98_spill] sm:$0xff] %v3853_v38  ;;  %5160 = vst [vmem:[#allocation100_spill] sm:$0xff] %v3860_v30  ;;  %2238 = vpow2.f32 %v1551_v23  ;;  %vm4960_vm9 = vcmp.eq.s32.totalorder %v3813_v54, %v3787_v14  ;;  %v1555_v62 = vmul.f32 1.442695, %v1527_v9  ;;  %vm917_vm5 = vcmp.eq.s32.totalorder %v3925_v3, %v5169_v57  ;;  %1603 = vrot.lane.b32.xlu0 %v1567_v42, %s2475_s8  ;;  %v2225_v9 = vpop.eup %2224 }
 0x20e   : > { %v1570_v33 = vsel %vm3874_vm3, 0.0, %v2223_v41  ;;  %2240 = vpow2.f32 %v1557_v29  ;;  %v1561_v43 = vmul.f32 1.442695, %v1530_v51  ;;  %vm919_vm11 = vcmp.eq.s32.totalorder %v3937_v34, %v5171_v47  ;;  %vm3951_vm3 = vmor %vm4957_vm10, %vm913_vm7  ;;  %v3957_v41 = vpop.eup %2226 }
 0x20f   : > { %v1442_v58 = vsub.f32 %v3471_v46, %v3687_v5  ;;  %2242 = vpow2.f32 %v1689_v0  ;;  %v1670_v42 = vsub.f32 %v3706_v17, %v3740_v44  ;;  %vm4965_vm0 = vcmp.eq.s32.totalorder %v3845_v11, %v3853_v38  ;;  %5174 = vst [vmem:[#allocation46_spill] sm:$0xff] %v3957_v41  ;;  %1609 = vrot.lane.b32.xlu1 %v1570_v33, %s2475_s8  ;;  %vm3968_vm10 = vmor %vm4960_vm9, %vm4959_vm15  ;;  %v5177_v0 = vld [vmem:[#allocation77_spill] sm:$0xff]  ;;  %v2404_v17 = vld [vmem:[%s2912_s30 + $0x8] sm:$0xff] }
 0x210   : > { %v3922_v50 = vpop.permute.xlu1 %1044  ;;  %v3934_v23 = vpop.permute.xlu0 %1179  ;;  %2244 = vpow2.f32 %v1695_v45  ;;  %v1569_v46 = vsel %vm3916_vm13, 0.0, %v2225_v9  ;;  %v1559_v51 = vmul.f32 1.442695, %v1529_v39  ;;  %v1376_v22 = vsub.f32 %v5177_v0, %v3642_v20  ;;  %vm3996_vm9 = vmor %vm4965_vm0, %vm4963_vm8  ;;  %v5182_v0 = vld [vmem:[#allocation18_spill] sm:$0xff] }
 0x211   : > { %v2229_v45 = vpop.eup %2228  ;;  %vm920_vm13 = vcmp.eq.s32.totalorder %v3975_v31, %v5178_v59  ;;  %v1693_v41 = vmul.f32 1.442695, %v1668_v6  ;;  %2246 = vpow2.f32 %v1555_v62  ;;  %1607 = vrot.lane.b32.xlu0 %v1569_v46, %s2475_s8  ;;  %vm4966_vm15 = vcmp.eq.s32.totalorder %v3879_v18, %v3753_v60  ;;  %v2403_v6 = vld [vmem:[%s2912_s30] sm:$0xff] }
 0x212   : > { %v2231_v39 = vpop.eup %2230  ;;  %2248 = vpow2.f32 %v1561_v43  ;;  %v1378_v33 = vsub.f32 %v5182_v0, %v3687_v5  ;;  %v1697_v9 = vmul.f32 1.442695, %v1670_v42  ;;  %v1571_v36 = vsel %vm3951_vm3, 0.0, %v2229_v45  ;;  %v5183_v42 = vld [vmem:[#allocation19_spill] sm:$0xff] }
 0x213   : > { %v4004_v46 = vpop.eup %2232  ;;  %v1572_v49 = vsel %vm3968_vm10, 0.0, %v2231_v39  ;;  %vm4968_vm8 = vcmp.eq.s32.totalorder %v3904_v12, %v3922_v50  ;;  %vm4970_vm0 = vcmp.eq.s32.totalorder %v3925_v3, %v3806_v4  ;;  %2250 = vpow2.f32 %v1559_v51  ;;  %vm4027_vm10 = vmor %vm4966_vm15, %vm4969_vm2 }
 0x214   : > { %v3983_v15 = vpop.permute.xlu1 %1048  ;;  %v4000_v62 = vpop.permute.xlu0 %1183  ;;  %1613 = vrot.lane.b32.xlu1 %v1572_v49, %s2475_s8  ;;  %v1397_v43 = vmul.f32 1.442695, %v1376_v22  ;;  %v1377_v0 = vsub.f32 %v5183_v42, %v3663_v19  ;;  %vm4978_vm3 = vcmp.eq.s32.totalorder %v3937_v34, %v3860_v30  ;;  %v5187_v22 = vsub.f32 %v3458_v24, %v3642_v20  ;;  %vm4045_vm15 = vmor %vm4968_vm8, %vm4967_vm14  ;;  %v5345_v57 = vld [vmem:[#allocation100_spill] sm:$0xff] }
 0x215   : > { %5179 = vst [vmem:[#allocation43_spill] sm:$0xff] %v3983_v15  ;;  %v2235_v38 = vpop.eup %2234  ;;  %2252 = vpow2.f32 %v1693_v41  ;;  %1611 = vrot.lane.b32.xlu0 %v1571_v36, %s2475_s8  ;;  %v1401_v42 = vmul.f32 1.442695, %v1378_v33  ;;  %v1379_v24 = vsub.f32 %v3410_v8, %v3704_v28  ;;  %v1672_v36 = vsub.f32 %v3712_v10, %v3749_v53  ;;  %vm4061_vm14 = vmor %vm4970_vm0, %vm917_vm5  ;;  %v5232_v10 = vld [vmem:[#allocation36_spill] sm:$0xff] }
 0x216   : > { %v4017_v29 = vpop.eup %2236  ;;  %v1574_v49 = vsel %vm3996_vm9, 0.0, %v2235_v38  ;;  %v1461_v39 = vmul.f32 1.442695, %v5187_v22  ;;  %vm1211_vm9 = vcmp.eq.s32.totalorder %v2403_v6, %v3934_v23  ;;  %2254 = vpow2.f32 %v1697_v9  ;;  %vm4075_vm2 = vmor %vm4978_vm3, %vm919_vm11  ;;  %v5220_v23 = vld [vmem:[#allocation83_spill] sm:$0xff] }
 0x217   : > { %5184 = vst [vmem:[#allocation77_spill] sm:$0xff] %v4017_v29  ;;  %v2239_v41 = vpop.eup %2238  ;;  %vm1065_vm8 = vcmp.eq.s32.totalorder %v3975_v31, %v3983_v15  ;;  %v1465_v8 = vmul.f32 1.442695, %v1442_v58  ;;  %2256 = vpow2.f32 %v1397_v43  ;;  %v1399_v5 = vmul.f32 1.442695, %v1377_v0  ;;  %v5194_v58 = vld [vmem:[#allocation20_spill] sm:$0xff]  ;;  %vm4094_vm3 = vmor %vm1211_vm9, %vm1050_vm6 }
 0x218   : > { %v1182_v51 = vpop.permute.xlu1 %1181  ;;  %v4067_v33 = vpop.permute.xlu0 %1187  ;;  %1617 = vrot.lane.b32.xlu1 %v1574_v49, %s2475_s8  ;;  %v1380_v20 = vsub.f32 %v5194_v58, %v3726_v26  ;;  %v1573_v47 = vsel %vm4027_vm10, 0.0, %v2239_v41  ;;  %2258 = vpow2.f32 %v1461_v39  ;;  %v5199_v0 = vsub.f32 %v3476_v32, %v3663_v19  ;;  %vm4110_vm6 = vmor %vm1065_vm8, %vm920_vm13  ;;  %v2405_v29 = vld [vmem:[%s2912_s30 + $0x18] sm:$0xff]  ;;  %v5203_v39 = vld [vmem:[#allocation23_spill] sm:$0xff] }
 0x219   : > { %v2241_v9 = vpop.eup %2240  ;;  %vm1212_vm0 = vcmp.eq.s32.totalorder %v2404_v17, %v1182_v51  ;;  %1615 = vrot.lane.b32.xlu0 %v1573_v47, %s2475_s8  ;;  %2260 = vpow2.f32 %v1401_v42  ;;  %v1403_v32 = vmul.f32 1.442695, %v1379_v24  ;;  %v1381_v38 = vsub.f32 %v5203_v39, %v3731_v25  ;;  %v5204_v47 = vld [vmem:[#allocation82_spill] sm:$0xff]  ;;  %vm4137_vm9 = vmor %vm4094_vm3, %vm905_vm4  ;;  %v2406_v17 = vld [vmem:[%s2912_s30 + $0x10] sm:$0xff] }
 0x21a   : > { %v4083_v4 = vpop.eup %2242  ;;  %v1576_v30 = vsel %vm4045_vm15, 0.0, %v2241_v9  ;;  %v1463_v58 = vmul.f32 1.442695, %v5199_v0  ;;  %v1446_v41 = vsub.f32 %v5204_v47, %v3740_v44  ;;  %v5205_v9 = vld [vmem:[#allocation85_spill] sm:$0xff]  ;;  %v5206_v19 = vld [vmem:[#allocation6_spill] sm:$0xff]  ;;  %vm4125_vm10 = vmor %vm1212_vm0, %vm1051_vm1  ;;  %2262 = vpow2.f32 %v1465_v8 }
 0x21b   : > { %v4101_v45 = vpop.eup %2244  ;;  %v5210_v42 = vsub.f32 %v3488_v55, %v3704_v28  ;;  %vm1213_vm1 = vcmp.eq.s32.totalorder %v2406_v17, %v4000_v62  ;;  %2264 = vpow2.f32 %v1399_v5  ;;  %v1405_v51 = vmul.f32 1.442695, %v1380_v20  ;;  %v5214_v55 = vld [vmem:[#allocation22_spill] sm:$0xff]  ;;  %v2407_v17 = vld [vmem:[%s2912_s30 + $0x28] sm:$0xff]  ;;  %s2414_s30 = scalar_lea.vmem %s2413_s29, 4096 }
 0x21c   : > { %v1186_v43 = vpop.permute.xlu1 %1185  ;;  %5200 = vst [vmem:[#allocation18_spill] sm:$0xff] %v4101_v45  ;;  %v2247_v6 = vpop.eup %2246  ;;  %1621 = vrot.lane.b32.xlu1 %v1576_v30, %s2475_s8  ;;  %v1382_v8 = vsub.f32 %v5214_v55, %v3740_v44  ;;  %2266 = vpow2.f32 %v1463_v58  ;;  %v5219_v5 = vsub.f32 %v3485_v1, %v3726_v26  ;;  %v4165_v55 = vmul.f32 1.442695, %v1672_v36  ;;  %v5266_v58 = vld [vmem:[#allocation53_spill] sm:$0xff]  ;;  %p2416_p4 = scmp.lt.s32.totalorder %s2414_s30, %s2408_s27 }
 0x21d   : > { %vm1214_vm15 = vcmp.eq.s32.totalorder %v2405_v29, %v1186_v43  ;;  %v1467_v24 = vmul.f32 1.442695, %v5210_v42  ;;  %v2249_v39 = vpop.eup %2248  ;;  %v1575_v45 = vsel %vm4061_vm14, 0.0, %v2247_v6  ;;  %v5215_v42 = vld [vmem:[#allocation9_spill] sm:$0xff]  ;;  %v4158_v28 = vpop.permute.xlu0 %1191  ;;  %v5221_v43 = vld [vmem:[#allocation32_spill] sm:$0xff]  ;;  %2268 = vpow2.f32 %v1403_v32 }
 0x21e   : > { %v1578_v49 = vsel %vm4110_vm6, 0.0, %v2249_v39  ;;  %vm4154_vm0 = vmor %vm1214_vm15, %vm1053_vm12  ;;  %v1469_v22 = vmul.f32 1.442695, %v5219_v5  ;;  %v2251_v6 = vpop.eup %2250  ;;  %v1448_v39 = vsub.f32 %v5220_v23, %v3749_v53  ;;  %1619 = vrot.lane.b32.xlu0 %v1575_v45, %s2475_s8  ;;  %vm5222_vm12 = vcmp.eq.s32.totalorder %v5206_v19, %v5221_v43  ;;  %v5225_v29 = vld [vmem:[#allocation84_spill] sm:$0xff]  ;;  %v5226_v5 = vld [vmem:[#allocation7_spill] sm:$0xff]  ;;  %p2417_p5 = por %p2416_p4, %p2415_p3 }
 0x21f   : > { %vm4173_vm14 = vmor %vm4125_vm10, %vm5222_vm12  ;;  %v1407_v1 = vmul.f32 1.442695, %v1381_v38  ;;  %v1577_v36 = vsel %vm4075_vm2, 0.0, %v2251_v6  ;;  %v5227_v23 = vld [vmem:[#allocation60_spill] sm:$0xff]  ;;  %2270 = vpow2.f32 %v1467_v24  ;;  %v5231_v59 = vsub.f32 %v3504_v40, %v3731_v25  ;;  %v4193_v38 = vpop.eup %2252  ;;  %v5236_v40 = vld [vmem:[#allocation25_spill] sm:$0xff] }
 0x220   : > { %v1190_v20 = vpop.permute.xlu1 %1189  ;;  %vm5228_vm3 = vcmp.eq.s32.totalorder %v5226_v5, %v5227_v23  ;;  %1625 = vrot.lane.b32.xlu1 %v1578_v49, %s2475_s8  ;;  %vm5233_vm2 = vcmp.eq.s32.totalorder %v5215_v42, %v5232_v10  ;;  %2272 = vpow2.f32 %v1405_v51  ;;  %v1409_v24 = vmul.f32 1.442695, %v1382_v8  ;;  %v4208_v23 = vpop.eup %2254  ;;  %v5238_v25 = vld [vmem:[#allocation24_spill] sm:$0xff]  ;;  %v5239_v8 = vld [vmem:[#allocation34_spill] sm:$0xff]  ;;  %p2418_p7 = pnand %p2417_p5, %p2411_p2 }
 0x221   : > { %vm4186_vm6 = vmor %vm1213_vm1, %vm5228_vm3  ;;  %v1471_v32 = vmul.f32 1.442695, %v5231_v59  ;;  %vm1216_vm10 = vcmp.eq.s32.totalorder %v2407_v17, %v1190_v20  ;;  %v1383_v6 = vsub.f32 %v5236_v40, %v3775_v2  ;;  %v5237_v59 = vld [vmem:[#allocation93_spill] sm:$0xff]  ;;  %2274 = vpow2.f32 %v1469_v22  ;;  %v2257_v26 = vpop.eup %2256  ;;  %v5243_v22 = vld [vmem:[#allocation95_spill] sm:$0xff]  ;;  %v4240_v51 = vpop.permute.xlu0 %1195 }
 0x222   : > { %vm4201_vm15 = vmor %vm4154_vm0, %vm5233_vm2  ;;  %v1708_v49 = vsel %vm4173_vm14, 0.0, %v5237_v59  ;;  %v1473_v30 = vmul.f32 1.442695, %v1446_v41  ;;  %v1384_v44 = vsub.f32 %v5238_v25, %v3749_v53  ;;  %1623 = vrot.lane.b32.xlu0 %v1577_v36, %s2475_s8  ;;  %vm5240_vm1 = vcmp.eq.s32.totalorder %v5226_v5, %v5239_v8  ;;  %v2259_v41 = vpop.eup %2258  ;;  %v5244_v36 = vld [vmem:[#allocation11_spill] sm:$0xff]  ;;  %v5249_v53 = vld [vmem:[#allocation97_spill] sm:$0xff] }
 0x223   : > { %vm4223_vm0 = vmor %vm4186_vm6, %vm5240_vm1  ;;  %vm1215_vm12 = vcmp.eq.s32.totalorder %v3796_v27, %v4067_v33  ;;  %2276 = vpow2.f32 %v1407_v1  ;;  %v1411_v25 = vmul.f32 1.442695, %v1383_v6  ;;  %v1707_v40 = vsel %vm4137_vm9, 0.0, %v5243_v22  ;;  %v5245_v59 = vld [vmem:[#allocation79_spill] sm:$0xff]  ;;  %v2261_v22 = vpop.eup %2260  ;;  %v5251_v20 = vld [vmem:[#allocation38_spill] sm:$0xff] }
 0x224   : > { %v1194_v0 = vpop.permute.xlu1 %1193  ;;  %vm5246_vm14 = vcmp.eq.s32.totalorder %v5244_v36, %v5245_v59  ;;  %v1710_v1 = vsel %vm4201_vm15, 0.0, %v5249_v53  ;;  %2278 = vpow2.f32 %v1471_v32  ;;  %v5250_v6 = vsub.f32 %v3510_v52, %v3775_v2  ;;  %1741 = vrot.lane.b32.xlu1 %v1708_v49, %s2476_s9  ;;  %v2263_v8 = vpop.eup %2262  ;;  %v5253_v53 = vld [vmem:[#allocation73_spill] sm:$0xff] }
 0x225   : > { %vm4236_vm3 = vmor %vm1216_vm10, %vm5246_vm14  ;;  %vm1218_vm9 = vcmp.eq.s32.totalorder %v3838_v63, %v1194_v0  ;;  %vm5252_vm6 = vcmp.eq.s32.totalorder %v5244_v36, %v5251_v20  ;;  %2280 = vpow2.f32 %v1409_v24  ;;  %v1413_v59 = vmul.f32 1.442695, %v1384_v44  ;;  %v2265_v44 = vpop.eup %2264  ;;  %v5263_v33 = vld [vmem:[#allocation13_spill] sm:$0xff]  ;;  %v5272_v20 = vld [vmem:[#allocation10_spill] sm:$0xff] }
 0x226   : > { %v1475_v47 = vmul.f32 1.442695, %v5250_v6  ;;  %v1488_v17 = vsel %vm5252_vm6, 0.0, %v2259_v41  ;;  %vm5254_vm2 = vcmp.eq.s32.totalorder %v3796_v27, %v5253_v53  ;;  %2282 = vpow2.f32 %v1473_v30  ;;  %v5257_v41 = vld [vmem:[#allocation27_spill] sm:$0xff]  ;;  %1739 = vrot.lane.b32.xlu0 %v1707_v40, %s2476_s9  ;;  %v5258_v6 = vld [vmem:[#allocation96_spill] sm:$0xff]  ;;  %vm5260_vm1 = vmmov %vm5252_vm6  ;;  %v2267_v40 = vpop.eup %2266 }
 0x227   : > { %vm4259_vm15 = vmor %vm1215_vm12, %vm5254_vm2  ;;  %v4263_v62 = vadd.f32 %v2257_v26, %v1488_v17  ;;  %v1477_v49 = vmul.f32 1.442695, %v1448_v39  ;;  %v1385_v24 = vsub.f32 %v5257_v41, %v3825_v16  ;;  %v1709_v53 = vsel %vm4223_vm0, 0.0, %v5258_v6  ;;  %v5259_v27 = vld [vmem:[#allocation99_spill] sm:$0xff]  ;;  %v5264_v39 = vld [vmem:[#allocation40_spill] sm:$0xff] }
 0x228   : > { %v1198_v32 = vpop.permute.xlu1 %1197  ;;  %vm1217_vm10 = vcmp.eq.s32.totalorder %v5259_v27, %v4158_v28  ;;  %vm4278_vm12 = vmor %vm4236_vm3, %vm5260_vm1  ;;  %vm5265_vm14 = vcmp.eq.s32.totalorder %v5263_v33, %v5264_v39  ;;  %2284 = vpow2.f32 %v1411_v25  ;;  %vm5267_vm0 = vcmp.eq.s32.totalorder %v3838_v63, %v5266_v58  ;;  %v2269_v25 = vpop.eup %2268  ;;  %v5273_v41 = vld [vmem:[#allocation35_spill] sm:$0xff]  ;;  %1745 = vrot.lane.b32.xlu1 %v1710_v1, %s2476_s9  ;;  %v5277_v0 = vld [vmem:[#allocation12_spill] sm:$0xff] }
 0x229   : > { %v1490_v30 = vsel %vm5265_vm14, 0.0, %v2263_v8  ;;  %vm4290_vm6 = vmor %vm1218_vm9, %vm5267_vm0  ;;  %vm1220_vm3 = vcmp.eq.s32.totalorder %v3813_v54, %v1198_v32  ;;  %2286 = vpow2.f32 %v1475_v47  ;;  %v5271_v45 = vsub.f32 %v5205_v9, %v3825_v16  ;;  %v5280_v9 = vld [vmem:[#allocation26_spill] sm:$0xff]  ;;  %v2271_v58 = vpop.eup %2270  ;;  %v1200_v1 = vpop.permute.xlu0 %1199 }
 0x22a   : > { %v4295_v36 = vadd.f32 %v2261_v22, %v1490_v30  ;;  %vm5274_vm2 = vcmp.eq.s32.totalorder %v5272_v20, %v5273_v41  ;;  %v5278_v22 = vld [vmem:[#allocation37_spill] sm:$0xff]  ;;  %2288 = vpow2.f32 %v1413_v59  ;;  %v1415_v6 = vmul.f32 1.442695, %v1385_v24  ;;  %1743 = vrot.lane.b32.xlu0 %v1709_v53, %s2476_s9 }
 0x22b   : > { %v1479_v8 = vmul.f32 1.442695, %v5271_v45  ;;  %vm4305_vm1 = vmor %vm4259_vm15, %vm5274_vm2  ;;  %vm5279_vm9 = vcmp.eq.s32.totalorder %v5277_v0, %v5278_v22  ;;  %v1386_v30 = vsub.f32 %v5280_v9, %v3804_v61  ;;  %v5281_v45 = vld [vmem:[#allocation87_spill] sm:$0xff]  ;;  %v1712_v59 = vsel %vm4278_vm12, 0.0, %v4004_v46 }
 0x22c   : > { %5270 = vst [vmem:[#allocation19_spill] sm:$0xff] %v4295_v36  ;;  %v1489_v47 = vsel %vm5279_vm9, 0.0, %v2267_v40  ;;  %vm5282_vm14 = vcmp.eq.s32.totalorder %v5259_v27, %v5281_v45  ;;  %v1202_v24 = vpop.permute.xlu1 %1201  ;;  %2290 = vpow2.f32 %v1477_v49  ;;  %v5285_v9 = vsub.f32 %v5225_v29, %v3804_v61  ;;  %v2273_v36 = vpop.eup %2272  ;;  %1749 = vrot.lane.b32.xlu1 %v1712_v59, %s2476_s9  ;;  %v5299_v22 = vld [vmem:[#allocation91_spill] sm:$0xff] }
 0x22d   : > { %vm4321_vm15 = vmor %vm1217_vm10, %vm5282_vm14  ;;  %v4328_v40 = vadd.f32 %v2265_v44, %v1489_v47  ;;  %vm1219_vm10 = vcmp.eq.s32.totalorder %v3897_v48, %v4240_v51  ;;  %vm5286_vm0 = vcmp.eq.s32.totalorder %v5263_v33, %v5264_v39  ;;  %v1491_v46 = vsel %vm913_vm7, 0.0, %v2271_v58  ;;  %v2275_v49 = vpop.eup %2274  ;;  %v5293_v39 = vld [vmem:[#allocation94_spill] sm:$0xff] }
 0x22e   : > { %v1481_v45 = vmul.f32 1.442695, %v5285_v9  ;;  %vm4341_vm12 = vmor %vm4290_vm6, %vm5286_vm0  ;;  %2292 = vpow2.f32 %v1415_v6  ;;  %v1417_v29 = vmul.f32 1.442695, %v1386_v30  ;;  %v5289_v44 = vsub.f32 %v3734_v56, %v3775_v2  ;;  %v2277_v33 = vpop.eup %2276  ;;  %v5308_v51 = vld [vmem:[#allocation98_spill] sm:$0xff] }
 0x22f   : > { %vm5290_vm2 = vcmp.eq.s32.totalorder %v3813_v54, %v3787_v14  ;;  %v4360_v26 = vadd.f32 %v2269_v25, %v1491_v46  ;;  %2294 = vpow2.f32 %v1479_v8  ;;  %v1673_v17 = vsub.f32 %v5293_v39, %v3825_v16  ;;  %vm4369_vm14 = vmor %vm4321_vm15, %vm5279_vm9  ;;  %v5296_v14 = vld [vmem:[#allocation42_spill] sm:$0xff]  ;;  %v2279_v8 = vpop.eup %2278  ;;  %v5350_v39 = vld [vmem:[#allocation80_spill] sm:$0xff] }
 0x230   : > { %v1699_v53 = vmul.f32 1.442695, %v5289_v44  ;;  %vm4356_vm6 = vmor %vm1220_vm3, %vm5290_vm2  ;;  %vm1222_vm3 = vcmp.eq.s32.totalorder %v3845_v11, %v1202_v24  ;;  %vm5297_vm0 = vcmp.eq.s32.totalorder %v3813_v54, %v5296_v14  ;;  %2296 = vpow2.f32 %v1417_v29  ;;  %v5298_v25 = vld [vmem:[#allocation14_spill] sm:$0xff]  ;;  %v1206_v30 = vpop.permute.xlu1 %1205  ;;  %v2281_v63 = vpop.eup %2280  ;;  %v5314_v24 = vld [vmem:[#allocation44_spill] sm:$0xff] }
 0x231   : > { %v1492_v32 = vsel %vm5297_vm0, 0.0, %v2275_v49  ;;  %v1711_v0 = vsel %vm4305_vm1, 0.0, %v5298_v25  ;;  %vm5300_vm15 = vcmp.eq.s32.totalorder %v3897_v48, %v5299_v22  ;;  %v1714_v6 = vsel %vm4341_vm12, 0.0, %v4083_v4  ;;  %v5316_v29 = vld [vmem:[#allocation46_spill] sm:$0xff] }
 0x232   : > { %vm4387_vm2 = vmor %vm1219_vm10, %vm5300_vm15  ;;  %v4394_v58 = vadd.f32 %v2273_v36, %v1492_v32  ;;  %2298 = vpow2.f32 %v1481_v45  ;;  %v5303_v52 = vsub.f32 %v3751_v7, %v3804_v61  ;;  %1747 = vrot.lane.b32.xlu0 %v1711_v0, %s2476_s9  ;;  %vm1221_vm1 = vcmp.eq.s32.totalorder %v3879_v18, %v1200_v1  ;;  %v1204_v7 = vpop.permute.xlu0 %1203  ;;  %1753 = vrot.lane.b32.xlu1 %v1714_v6, %s2476_s9  ;;  %v5330_v32 = vld [vmem:[#allocation77_spill] sm:$0xff] }
 0x233   : > { %2300 = vpow2.f32 %v4165_v55  ;;  %vm5304_vm10 = vmmov %vm5297_vm0  ;;  %vm5307_vm9 = vcmp.eq.s32.totalorder %v3879_v18, %v5163_v21  ;;  %v2283_v55 = vpop.eup %2282  ;;  %vm5309_vm0 = vcmp.eq.s32.totalorder %v3845_v11, %v5308_v51  ;;  %v1713_v13 = vsel %vm4369_vm14, 0.0, %v5316_v29 }
 0x234   : > { %v1705_v59 = vmul.f32 1.442695, %v5303_v52  ;;  %vm4407_vm12 = vmor %vm4356_vm6, %vm5304_vm10  ;;  %v1493_v48 = vsel %vm5307_vm9, 0.0, %v2279_v8  ;;  %v2285_v9 = vpop.eup %2284  ;;  %vm1224_vm10 = vcmp.eq.s32.totalorder %v3904_v12, %v1206_v30  ;;  %2302 = vpow2.f32 %v1699_v53  ;;  %v1210_v44 = vpop.permute.xlu1 %1209  ;;  %v5338_v30 = vld [vmem:[#allocation41_spill] sm:$0xff] }
 0x235   : > { %vm4419_vm15 = vmor %vm1222_vm3, %vm5309_vm0  ;;  %v4423_v54 = vadd.f32 %v2277_v33, %v1493_v48  ;;  %vm5315_vm3 = vcmp.eq.s32.totalorder %v3845_v11, %v5314_v24  ;;  %v2287_v46 = vpop.eup %2286  ;;  %v1716_v49 = vsel %vm4407_vm12, 0.0, %v4193_v38  ;;  %v1703_v33 = vmul.f32 1.442695, %v1673_v17 }
 0x236   : > { %vm4430_vm6 = vmor %vm4387_vm2, %vm913_vm7  ;;  %v1494_v28 = vsel %vm5315_vm3, 0.0, %v2283_v55  ;;  %vm5317_vm7 = vcmp.eq.s32.totalorder %v3879_v18, %v3753_v60  ;;  %v2289_v53 = vpop.eup %2288  ;;  %2304 = vpow2.f32 %v1705_v59  ;;  %1751 = vrot.lane.b32.xlu0 %v1713_v13, %s2476_s9  ;;  %vm1223_vm14 = vcmp.eq.s32.totalorder %v3925_v3, %v1204_v7  ;;  %1757 = vrot.lane.b32.xlu1 %v1716_v49, %s2476_s9  ;;  %v1208_v25 = vpop.permute.xlu0 %1207  ;;  %v5344_v7 = vld [vmem:[#allocation18_spill] sm:$0xff]  ;;  %v5357_v59 = vld [vmem:[#allocation72_spill] sm:$0xff] }
 0x237   : > { %vm4447_vm2 = vmor %vm1221_vm1, %vm5317_vm7  ;;  %v4454_v27 = vadd.f32 %v2281_v63, %v1494_v28  ;;  %v1495_v38 = vsel %vm917_vm5, 0.0, %v2287_v46  ;;  %v2291_v1 = vpop.eup %2290  ;;  %vm5323_vm12 = vcmp.eq.s32.totalorder %v3904_v12, %v3922_v50  ;;  %vm1226_vm7 = vcmp.eq.s32.totalorder %v3975_v31, %v1210_v44  ;;  %v5358_v55 = vld [vmem:[#allocation76_spill] sm:$0xff] }
 0x238   : > { %vm5320_vm1 = vmmov %vm5315_vm3  ;;  %v4479_v11 = vadd.f32 %v2285_v9, %v1495_v38  ;;  %v2293_v17 = vpop.eup %2292  ;;  %v1715_v8 = vsel %vm4430_vm6, 0.0, %v5330_v32  ;;  %2306 = vpow2.f32 %v1703_v33  ;;  %v2477_v45 = vmov 1   ;;  %v5348_v33 = vld [vmem:[#allocation68_spill] sm:$0xff]  ;;  %v5349_v38 = vld [vmem:[#allocation59_spill] sm:$0xff] }
 0x239   : > { %vm4463_vm9 = vmor %vm4419_vm15, %vm5320_vm1  ;;  %vm5326_vm15 = vcmp.eq.s32.totalorder %v3879_v18, %v5163_v21  ;;  %v2295_v14 = vpop.eup %2294  ;;  %v5331_v21 = vld [vmem:[#allocation39_spill] sm:$0xff]  ;;  %2198 = vset.pattern.permute.xlu0 %v2477_v45  ;;  %2199 = vset.pattern.permute.xlu1 %v2477_v45 }
 0x23a   : > { %vm4475_vm0 = vmor %vm1224_vm10, %vm5323_vm12  ;;  %vm5329_vm10 = vcmp.eq.s32.totalorder %v3904_v12, %v5166_v35  ;;  %vm5332_vm1 = vcmp.eq.s32.totalorder %v3925_v3, %v5331_v21  ;;  %v1718_v0 = vsel %vm4463_vm9, 0.0, %v4208_v23  ;;  %v2297_v47 = vpop.eup %2296  ;;  %1755 = vrot.lane.b32.xlu0 %v1715_v8, %s2476_s9  ;;  %v1497_v52 = vsel %vm919_vm11, 0.0, %v2295_v14  ;;  %v5353_v8 = vld [vmem:[#allocation86_spill] sm:$0xff]  ;;  %v5354_v21 = vld [vmem:[#allocation29_spill] sm:$0xff] }
 0x23b   : > { %vm4486_vm3 = vmor %vm4447_vm2, %vm5326_vm15  ;;  %v1496_v50 = vsel %vm5329_vm10, 0.0, %v2291_v1  ;;  %v4526_v4 = vadd.f32 %v2293_v17, %v1497_v52  ;;  %vm1225_vm12 = vcmp.eq.s32.totalorder %v5338_v30, %v1208_v25  ;;  %1761 = vrot.lane.b32.xlu1 %v1718_v0, %s2476_s9  ;;  %v5351_v17 = vld [vmem:[#allocation28_spill] sm:$0xff]  ;;  %v1438_v18 = vsub.f32 %v5354_v21, %v5353_v8  ;;  %v5355_v0 = vld [vmem:[#allocation81_spill] sm:$0xff] }
 0x23c   : > { %vm4501_vm2 = vmor %vm1223_vm14, %vm5332_vm1  ;;  %v4508_v22 = vadd.f32 %v2289_v53, %v1496_v50  ;;  %v2299_v23 = vpop.eup %2298  ;;  %v1717_v51 = vsel %vm4486_vm3, 0.0, %v5344_v7  ;;  %v5347_v53 = vld [vmem:[#allocation21_spill] sm:$0xff]  ;;  %v1435_v56 = vsub.f32 %v5351_v17, %v5350_v39  ;;  %v5352_v50 = vld [vmem:[#allocation71_spill] sm:$0xff]  ;;  %v1373_v7 = vsub.f32 %v5358_v55, %v5355_v0 }
 0x23d   : > { %vm5335_vm6 = vmmov %vm5329_vm10  ;;  %v2301_v48 = vpop.eup %2300  ;;  %v1498_v35 = vsel %vm920_vm13, 0.0, %v2299_v23  ;;  %v1436_v60 = vsub.f32 %v5348_v33, %v5347_v53  ;;  %v1372_v1 = vsub.f32 %v5349_v38, %v5347_v53  ;;  %v1371_v14 = vsub.f32 %v5352_v50, %v5350_v39  ;;  %v5362_v33 = vld [vmem:[#allocation17_spill] sm:$0xff] }
 0x23e   : > { %vm4516_vm14 = vmor %vm4475_vm0, %vm5335_vm6  ;;  %v4547_v9 = vadd.f32 %v2297_v47, %v1498_v35  ;;  %1759 = vrot.lane.b32.xlu0 %v1717_v51, %s2476_s9  ;;  %v2303_v3 = vpop.eup %2302  ;;  %v5356_v47 = vld [vmem:[#allocation30_spill] sm:$0xff]  ;;  %v1451_v52 = vmul.f32 1.442695, %v1435_v56  ;;  %v1457_v35 = vmul.f32 1.442695, %v1438_v18  ;;  %v5359_v51 = vld [vmem:[#allocation48_spill] sm:$0xff] }
 0x23f   : > { %vm1242_vm9 = vmor %vm1226_vm7, %vm1065_vm8  ;;  %v1720_v36 = vsel %vm4516_vm14, 0.0, %v2301_v48  ;;  %v1453_v25 = vmul.f32 1.442695, %v1436_v60  ;;  %v1437_v6 = vsub.f32 %v5356_v47, %v5355_v0  ;;  %v1387_v23 = vmul.f32 1.442695, %v1371_v14  ;;  %v5363_v38 = vld [vmem:[#allocation57_spill] sm:$0xff] }
 0x240   : > { %vm4538_vm0 = vmor %vm4501_vm2, %vm917_vm5  ;;  %vm5346_vm5 = vcmp.eq.s32.totalorder %v5338_v30, %v5345_v57  ;;  %v2305_v24 = vpop.eup %2304  ;;  %1765 = vrot.lane.b32.xlu1 %v1720_v36, %s2476_s9  ;;  %v1389_v30 = vmul.f32 1.442695, %v1372_v1  ;;  %v1374_v48 = vsub.f32 %v5357_v59, %v5353_v8  ;;  %v5360_v36 = vld [vmem:[#allocation31_spill] sm:$0xff]  ;;  %v1375_v60 = vsub.f32 %v5362_v33, %v5359_v51 }
 0x241   : > { %vm1258_vm8 = vmor %vm1242_vm9, %vm920_vm13  ;;  %v1719_v28 = vsel %vm4538_vm0, 0.0, %v2303_v3  ;;  %2308 = vpow2.f32 %v1453_v25  ;;  %v1439_v45 = vsub.f32 %v5360_v36, %v5359_v51  ;;  %v1455_v3 = vmul.f32 1.442695, %v1437_v6  ;;  %v5365_v25 = vld [vmem:[#allocation56_spill] sm:$0xff]  ;;  %v5370_v33 = vld [vmem:[#allocation51_spill] sm:$0xff] }
 0x242   : > { %vm1241_vm15 = vmor %vm1225_vm12, %vm5346_vm5  ;;  %v1722_v46 = vsel %vm1258_vm8, 0.0, %v2305_v24  ;;  %1763 = vrot.lane.b32.xlu0 %v1719_v28, %s2476_s9  ;;  %v2307_v31 = vpop.eup %2306  ;;  %2310 = vpow2.f32 %v1389_v30  ;;  %v5361_v24 = vld [vmem:[#allocation61_spill] sm:$0xff]  ;;  %v4609_v1 = vsub.f32 %v5363_v38, %v5350_v39  ;;  %v1395_v18 = vmul.f32 1.442695, %v1375_v60  ;;  %v5371_v60 = vld [vmem:[#allocation64_spill] sm:$0xff] }
 0x243   : > { %vm1257_vm3 = vmor %vm1241_vm15, %vm919_vm11  ;;  %2312 = vpow2.f32 %v1451_v52  ;;  %v4601_v28 = vsub.f32 %v5361_v24, %v5347_v53  ;;  %v1459_v17 = vmul.f32 1.442695, %v1439_v45  ;;  %v5364_v53 = vld [vmem:[#allocation58_spill] sm:$0xff]  ;;  %v4622_v47 = vsub.f32 %v5365_v25, %v5355_v0 }
 0x244   : > { %1769 = vrot.lane.b32.xlu1 %v1722_v46, %s2476_s9  ;;  %v1721_v29 = vsel %vm1257_vm3, 0.0, %v2307_v31  ;;  %2314 = vpow2.f32 %v1387_v23  ;;  %v1393_v46 = vmul.f32 1.442695, %v1374_v48  ;;  %v4615_v50 = vsub.f32 %v5364_v53, %v5353_v8  ;;  %v5366_v8 = vld [vmem:[#allocation49_spill] sm:$0xff]  ;;  %v5367_v23 = vld [vmem:[#allocation62_spill] sm:$0xff] }
 0x245   : > { %2316 = vpow2.f32 %v1457_v35  ;;  %v1341_v21 = vmul.f32 1.442695, %v4601_v28  ;;  %v1339_v6 = vmul.f32 1.442695, %v4609_v1  ;;  %v4629_v59 = vsub.f32 %v5367_v23, %v5366_v8 }
 0x246   : > { %1767 = vrot.lane.b32.xlu0 %v1721_v29, %s2476_s9  ;;  %v1391_v29 = vmul.f32 1.442695, %v1373_v7  ;;  %2318 = vpow2.f32 %v1455_v3  ;;  %v1345_v35 = vmul.f32 1.442695, %v4615_v50  ;;  %v5368_v7 = vld [vmem:[#allocation63_spill] sm:$0xff]  ;;  %vm5369_vm11 = vcmp.eq.s32.totalorder %v5206_v19, %v5221_v43 }
 0x247   : > { %2320 = vpow2.f32 %v1393_v46  ;;  %v4636_v36 = vsub.f32 %v5368_v7, %v5359_v51  ;;  %v1343_v24 = vmul.f32 1.442695, %v4622_v47  ;;  %v4646_v38 = vsub.f32 %v5371_v60, %v5370_v33  ;;  %v5377_v7 = vld [vmem:[#allocation88_spill] sm:$0xff] }
 0x248   : > { %2322 = vpow2.f32 %v1391_v29  ;;  %v1349_v19 = vmul.f32 1.442695, %v4629_v59  ;;  %vm5374_vm13 = vcmp.eq.s32.totalorder %v5215_v42, %v5232_v10  ;;  %vm5381_vm7 = vcmp.eq.s32.totalorder %v5272_v20, %v5273_v41  ;;  %v5385_v20 = vld [vmem:[#allocation70_spill] sm:$0xff] }
 0x249   : > { %2324 = vpow2.f32 %v1459_v17  ;;  %v1347_v15 = vmul.f32 1.442695, %v4636_v36  ;;  %v1353_v10 = vmul.f32 1.442695, %v4646_v38 }
 0x24a   : > { %2326 = vpow2.f32 %v1341_v21  ;;  %v5372_v21 = vld [vmem:[#allocation50_spill] sm:$0xff] }
 0x24b   : > { %v2309_v30 = vpop.eup %2308  ;;  %2328 = vpow2.f32 %v1395_v18  ;;  %v5373_v18 = vld [vmem:[#allocation65_spill] sm:$0xff] }
 0x24c   : > { %v2311_v52 = vpop.eup %2310  ;;  %v1484_v45 = vsel %vm5369_vm11, 0.0, %v2309_v30  ;;  %2330 = vpow2.f32 %v1339_v6  ;;  %v4656_v25 = vsub.f32 %v5373_v18, %v5372_v21 }
 0x24d   : > { %v2313_v55 = vpop.eup %2312  ;;  %2332 = vpow2.f32 %v1345_v35  ;;  %v1500_v43 = vadd.f32 %v2311_v52, %v1484_v45  ;;  %v5375_v52 = vld [vmem:[#allocation34_spill] sm:$0xff] }
 0x24e   : > { %v2315_v0 = vpop.eup %2314  ;;  %v1483_v51 = vsel %vm905_vm4, 0.0, %v2313_v55  ;;  %2334 = vpow2.f32 %v1343_v24  ;;  %vm5376_vm4 = vcmp.eq.s32.totalorder %v5226_v5, %v5375_v52  ;;  %v5378_v45 = vld [vmem:[#allocation66_spill] sm:$0xff] }
 0x24f   : > { %v2317_v46 = vpop.eup %2316  ;;  %v1499_v23 = vadd.f32 %v2315_v0, %v1483_v51  ;;  %v4670_v33 = vsub.f32 %v5378_v45, %v5377_v7  ;;  %2336 = vpow2.f32 %v1349_v19  ;;  %v5380_v0 = vld [vmem:[#allocation67_spill] sm:$0xff] }
 0x250   : > { %v2319_v29 = vpop.eup %2318  ;;  %v1486_v6 = vsel %vm5374_vm13, 0.0, %v2317_v46  ;;  %2338 = vpow2.f32 %v1347_v15 }
 0x251   : > { %v2321_v53 = vpop.eup %2320  ;;  %v1485_v35 = vsel %vm5376_vm4, 0.0, %v2319_v29  ;;  %2340 = vpow2.f32 %v1353_v10  ;;  %v1357_v15 = vmul.f32 1.442695, %v4670_v33 }
 0x252   : > { %v2323_v34 = vpop.eup %2322  ;;  %v1502_v46 = vadd.f32 %v2321_v53, %v1486_v6 }
 0x253   : > { %v2325_v55 = vpop.eup %2324  ;;  %v1501_v5 = vadd.f32 %v2323_v34, %v1485_v35 }
 0x254   : > { %v2327_v21 = vpop.eup %2326  ;;  %v1487_v19 = vsel %vm5381_vm7, 0.0, %v2325_v55 }
 0x255   : > { %v2329_v18 = vpop.eup %2328 }
 0x256   : > { %v2331_v6 = vpop.eup %2330  ;;  %v1503_v55 = vadd.f32 %v2329_v18, %v1487_v19 }
 0x263   : > { %v4567_v37 = vpop.permute.xlu1 %1597 }
 0x264   : > { %v1644_v8 = vadd.f32 %v4567_v37, %v1500_v43  ;;  %v5379_v37 = vld [vmem:[#allocation52_spill] sm:$0xff]  ;;  %v1351_v43 = vmul.f32 1.442695, %v4656_v25 }
 0x265   : > { %v4676_v51 = vsub.f32 %v5380_v0, %v5379_v37  ;;  %v5386_v0 = vld [vmem:[#allocation92_spill] sm:$0xff] }
 0x267   : > { %v4565_v13 = vpop.permute.xlu0 %1595 }
 0x268   : > { %v1643_v24 = vadd.f32 %v4565_v13, %v1499_v23  ;;  %v5383_v23 = vld [vmem:[#allocation69_spill] sm:$0xff] }
 0x26b   : > { %v4571_v44 = vpop.permute.xlu0 %1599 }
 0x26c   : > { %v1645_v34 = vadd.f32 %v4571_v44, %v1501_v5  ;;  %v5387_v5 = vld [vmem:[#allocation74_spill] sm:$0xff] }
 0x275   : > { %v4569_v49 = vpop.permute.xlu1 %1601 }
 0x276   : > { %v1646_v52 = vadd.f32 %v4569_v49, %v1502_v46  ;;  %v5384_v46 = vld [vmem:[#allocation89_spill] sm:$0xff] }
 0x277   : > { %v4691_v41 = vsub.f32 %v5385_v20, %v5384_v46 }
 0x27d   : > { %v4581_v32 = vpop.permute.xlu1 %1605 }
 0x27e   : > { %v1648_v10 = vadd.f32 %v4581_v32, %v4263_v62  ;;  %v5388_v62 = vld [vmem:[#allocation75_spill] sm:$0xff] }
 0x27f   : > { %v4587_v63 = vpop.permute.xlu0 %1603  ;;  %v4704_v32 = vsub.f32 %v5388_v62, %v3775_v2 }
 0x280   : > { %v1647_v18 = vadd.f32 %v4587_v63, %v1503_v55  ;;  %v5390_v63 = vld [vmem:[#allocation15_spill] sm:$0xff] }
 0x281   : > { %v4591_v12 = vpop.permute.xlu1 %1609 }
 0x283   : > { %v4597_v57 = vpop.permute.xlu0 %1607 }
 0x284   : > { %v1649_v46 = vadd.f32 %v4597_v57, %v4328_v40 }
 0x286   : > { %v4603_v31 = vpop.permute.xlu1 %1613 }
 0x287   : > { %v4611_v56 = vpop.permute.xlu0 %1611 }
 0x28a   : > { %v4617_v14 = vpop.permute.xlu1 %1617 }
 0x28b   : > { %v4624_v39 = vpop.permute.xlu0 %1615 }
 0x28e   : > { %v4631_v48 = vpop.permute.xlu1 %1621 }
 0x290   : > { %v4641_v3 = vpop.permute.xlu0 %1619 }
 0x292   : > { %v4651_v17 = vpop.permute.xlu1 %1625 }
 0x294   : > { %v4661_v30 = vpop.permute.xlu0 %1623 }
 0x296   : > { %v1742_v42 = vpop.permute.xlu1 %1741 }
 0x297   : > { %v1788_v60 = vadd.f32 %v1742_v42, %v1644_v8  ;;  %v5382_v8 = vld [vmem:[#allocation90_spill] sm:$0xff]  ;;  %v2333_v42 = vpop.eup %2332 }
 0x298   : > { %v1740_v29 = vpop.permute.xlu0 %1739  ;;  %v4685_v7 = vsub.f32 %v5383_v23, %v5382_v8  ;;  %v2335_v44 = vpop.eup %2334  ;;  %v1359_v8 = vmul.f32 1.442695, %v4691_v41  ;;  %v5389_v23 = vld [vmem:[#allocation19_spill] sm:$0xff] }
 0x299   : > { %v1787_v13 = vadd.f32 %v1740_v29, %v1643_v24  ;;  %v1804_v53 = vadd.f32 %v2327_v21, %v1788_v60  ;;  %v1355_v60 = vmul.f32 1.442695, %v4676_v51  ;;  %v4698_v29 = vsub.f32 %v5387_v5, %v5386_v0 }
 0x29a   : > { %v1746_v45 = vpop.permute.xlu1 %1745 }
 0x29b   : > { %v1803_v35 = vadd.f32 %v2331_v6, %v1787_v13  ;;  %2342 = vlog2.f32 %v1804_v53  ;;  %v1790_v49 = vadd.f32 %v1746_v45, %v1646_v52  ;;  %v1361_v13 = vmul.f32 1.442695, %v4685_v7  ;;  %v2337_v53 = vpop.eup %2336 }
 0x29c   : > { %v1744_v24 = vpop.permute.xlu0 %1743  ;;  %2344 = vpow2.f32 %v1351_v43  ;;  %v1650_v45 = vadd.f32 %v4591_v12, %v5389_v23  ;;  %v1365_v2 = vmul.f32 1.442695, %v4698_v29  ;;  %v5391_v12 = vld [vmem:[#allocation16_spill] sm:$0xff] }
 0x29d   : > { %2346 = vlog2.f32 %v1803_v35  ;;  %v1789_v21 = vadd.f32 %v1744_v24, %v1645_v34  ;;  %v1806_v37 = vadd.f32 %v2333_v42, %v1790_v49  ;;  %v2339_v35 = vpop.eup %2338  ;;  %v4711_v49 = vsub.f32 %v5390_v63, %v3804_v61 }
 0x29e   : > { %v1750_v52 = vpop.permute.xlu1 %1749  ;;  %2348 = vpow2.f32 %v1357_v15  ;;  %v2341_v24 = vpop.eup %2340  ;;  %v1363_v61 = vmul.f32 1.442695, %v4704_v32 }
 0x29f   : > { %v1805_v43 = vadd.f32 %v2335_v44, %v1789_v21  ;;  %2350 = vlog2.f32 %v1806_v37  ;;  %v1792_v19 = vadd.f32 %v1750_v52, %v1648_v10  ;;  %v1652_v37 = vadd.f32 %v4603_v31, %v4394_v58 }
 0x2a0   : > { %2352 = vpow2.f32 %v1355_v60  ;;  %v4718_v60 = vsub.f32 %v5391_v12, %v3825_v16  ;;  %v1369_v52 = vmul.f32 1.442695, %v4711_v49  ;;  %v1651_v16 = vadd.f32 %v4611_v56, %v4360_v26 }
 0x2a1   : > { %2354 = vlog2.f32 %v1805_v43  ;;  %v1808_v34 = vadd.f32 %v2337_v53, %v1792_v19 }
 0x2a2   : > { %2356 = vpow2.f32 %v1361_v13  ;;  %v1367_v31 = vmul.f32 1.442695, %v4718_v60 }
 0x2a3   : > { %2358 = vlog2.f32 %v1808_v34 }
 0x2a4   : > { %v1748_v6 = vpop.permute.xlu0 %1747  ;;  %v1754_v42 = vpop.permute.xlu1 %1753  ;;  %2360 = vpow2.f32 %v1359_v8  ;;  %v1654_v8 = vadd.f32 %v4617_v14, %v4454_v27 }
 0x2a5   : > { %v1791_v15 = vadd.f32 %v1748_v6, %v1647_v18  ;;  %v1794_v55 = vadd.f32 %v1754_v42, %v1650_v45  ;;  %v2343_v21 = vpop.eup %2342 }
 0x2a6   : > { %v2345_v40 = vpop.eup %2344  ;;  %v1822_v57 = vmul.f32 0.6931472, %v2343_v21  ;;  %v1655_v21 = vadd.f32 %v4641_v3, %v4479_v11 }
 0x2a7   : > { %v1807_v20 = vadd.f32 %v2339_v35, %v1791_v15  ;;  %v1810_v0 = vadd.f32 %v2341_v24, %v1794_v55  ;;  %v2347_v13 = vpop.eup %2346 }
 0x2a8   : > { %v1752_v10 = vpop.permute.xlu0 %1751  ;;  %v1758_v5 = vpop.permute.xlu1 %1757  ;;  %v1820_v53 = vmul.f32 0.6931472, %v2347_v13  ;;  %v1852_v58 = vsub.f32 %v1822_v57, %v4601_v28  ;;  %v1653_v28 = vadd.f32 %v4624_v39, %v4423_v54  ;;  %v1658_v57 = vadd.f32 %v4651_v17, %v4547_v9 }
 0x2a9   : > { %2362 = vlog2.f32 %v1807_v20  ;;  %v1793_v44 = vadd.f32 %v1752_v10, %v1649_v46  ;;  %v1796_v43 = vadd.f32 %v1758_v5, %v1652_v37  ;;  %v2349_v19 = vpop.eup %2348 }
 0x2aa   : > { %2364 = vpow2.f32 %v1365_v2  ;;  %v2351_v6 = vpop.eup %2350  ;;  %v1851_v56 = vsub.f32 %v1820_v53, %v4609_v1  ;;  %1874 = vperm.xlu1 %2199, %v1852_v58   ;;  %v1656_v1 = vadd.f32 %v4631_v48, %v4508_v22 }
 0x2ab   : > { %v1809_v18 = vadd.f32 %v2345_v40, %v1793_v44  ;;  %2366 = vlog2.f32 %v1810_v0  ;;  %v1812_v45 = vadd.f32 %v2349_v19, %v1796_v43  ;;  %v2353_v15 = vpop.eup %2352  ;;  %v1826_v26 = vmul.f32 0.6931472, %v2351_v6 }
 0x2ac   : > { %v1756_v62 = vpop.permute.xlu0 %1755  ;;  %2368 = vpow2.f32 %v1363_v61  ;;  %v2355_v35 = vpop.eup %2354  ;;  %1869 = vperm.xlu0 %2198, %v1851_v56  }
 0x2ad   : > { %2370 = vlog2.f32 %v1809_v18  ;;  %v1795_v23 = vadd.f32 %v1756_v62, %v1651_v16  ;;  %v1762_v34 = vpop.permute.xlu1 %1761  ;;  %v2357_v2 = vpop.eup %2356  ;;  %v1824_v46 = vmul.f32 0.6931472, %v2355_v35  ;;  %v1854_v14 = vsub.f32 %v1826_v26, %v4615_v50 }
 0x2ae   : > { %2372 = vpow2.f32 %v1369_v52  ;;  %v1798_v42 = vadd.f32 %v1762_v34, %v1654_v8  ;;  %v2359_v20 = vpop.eup %2358  ;;  %v1657_v18 = vadd.f32 %v4661_v30, %v4526_v4 }
 0x2af   : > { %v1811_v63 = vadd.f32 %v2353_v15, %v1795_v23  ;;  %2374 = vlog2.f32 %v1812_v45  ;;  %v2361_v12 = vpop.eup %2360  ;;  %v1830_v10 = vmul.f32 0.6931472, %v2359_v20  ;;  %v1853_v39 = vsub.f32 %v1824_v46, %v4622_v47 }
 0x2b0   : > { %v1760_v27 = vpop.permute.xlu0 %1759  ;;  %2376 = vpow2.f32 %v1367_v31  ;;  %v1814_v24 = vadd.f32 %v2357_v2, %v1798_v42  ;;  %1884 = vperm.xlu0 %2198, %v1854_v14  }
 0x2b1   : > { %2378 = vlog2.f32 %v1811_v63  ;;  %v1797_v55 = vadd.f32 %v1760_v27, %v1653_v28  ;;  %1879 = vperm.xlu1 %2199, %v1853_v39   ;;  %v1856_v22 = vsub.f32 %v1830_v10, %v4629_v59 }
 0x2b2   : > { %v1766_v54 = vpop.permute.xlu1 %1765  ;;  %2380 = vlog2.f32 %v1814_v24 }
 0x2b3   : > { %v2363_v61 = vpop.eup %2362  ;;  %v1813_v37 = vadd.f32 %v2361_v12, %v1797_v55  ;;  %v1800_v44 = vadd.f32 %v1766_v54, %v1656_v1 }
 0x2b4   : > { %v2365_v50 = vpop.eup %2364  ;;  %v1828_v0 = vmul.f32 0.6931472, %v2363_v61  ;;  %v1764_v40 = vpop.permute.xlu0 %1763  ;;  %1894 = vperm.xlu0 %2198, %v1856_v22  }
 0x2b5   : > { %v2367_v48 = vpop.eup %2366  ;;  %2382 = vlog2.f32 %v1813_v37  ;;  %v1799_v47 = vadd.f32 %v1764_v40, %v1655_v21  ;;  %v1816_v5 = vadd.f32 %v2365_v50, %v1800_v44 }
 0x2b6   : > { %v2369_v52 = vpop.eup %2368  ;;  %v1834_v13 = vmul.f32 0.6931472, %v2367_v48  ;;  %v1770_v11 = vpop.permute.xlu1 %1769  ;;  %v1855_v3 = vsub.f32 %v1828_v0, %v4636_v36 }
 0x2b7   : > { %v2371_v16 = vpop.eup %2370  ;;  %v1815_v43 = vadd.f32 %v2369_v52, %v1799_v47  ;;  %2384 = vlog2.f32 %v1816_v5  ;;  %v1802_v19 = vadd.f32 %v1770_v11, %v1658_v57 }
 0x2b8   : > { %v2373_v59 = vpop.eup %2372  ;;  %v1832_v53 = vmul.f32 0.6931472, %v2371_v16  ;;  %v1768_v62 = vpop.permute.xlu0 %1767  ;;  %1889 = vperm.xlu1 %2199, %v1855_v3   ;;  %v1858_v9 = vsub.f32 %v1834_v13, %v4646_v38 }
 0x2b9   : > { %v2375_v17 = vpop.eup %2374  ;;  %2386 = vlog2.f32 %v1815_v43  ;;  %v1801_v58 = vadd.f32 %v1768_v62, %v1657_v18  ;;  %v1818_v31 = vadd.f32 %v2373_v59, %v1802_v19 }
 0x2ba   : > { %v2377_v6 = vpop.eup %2376  ;;  %v1838_v36 = vmul.f32 0.6931472, %v2375_v17  ;;  %v1857_v8 = vsub.f32 %v1832_v53, %v4656_v25  ;;  %1904 = vperm.xlu0 %2198, %v1858_v9  }
 0x2bb   : > { %v2379_v23 = vpop.eup %2378  ;;  %v1817_v4 = vadd.f32 %v2377_v6, %v1801_v58  ;;  %2388 = vlog2.f32 %v1818_v31 }
 0x2bc   : > { %v1836_v30 = vmul.f32 0.6931472, %v2379_v23  ;;  %1899 = vperm.xlu1 %2199, %v1857_v8   ;;  %v1860_v45 = vsub.f32 %v1838_v36, %v4670_v33  ;;  %v2381_v15 = vpop.eup %2380 }
 0x2bd   : > { %2390 = vlog2.f32 %v1817_v4  ;;  %v1842_v26 = vmul.f32 0.6931472, %v2381_v15 }
 0x2be   : > { %v1859_v38 = vsub.f32 %v1836_v30, %v4676_v51  ;;  %1914 = vperm.xlu0 %2198, %v1860_v45  }
 0x2bf   : > { %v2383_v56 = vpop.eup %2382  ;;  %v1862_v35 = vsub.f32 %v1842_v26, %v4685_v7 }
 0x2c0   : > { %v1840_v34 = vmul.f32 0.6931472, %v2383_v56  ;;  %1909 = vperm.xlu1 %2199, %v1859_v38  }
 0x2c1   : > { %v2385_v25 = vpop.eup %2384 }
 0x2c2   : > { %v1846_v28 = vmul.f32 0.6931472, %v2385_v25  ;;  %v1861_v63 = vsub.f32 %v1840_v34, %v4691_v41  ;;  %1924 = vperm.xlu0 %2198, %v1862_v35  }
 0x2c3   : > { %v2387_v42 = vpop.eup %2386 }
 0x2c4   : > { %v1844_v2 = vmul.f32 0.6931472, %v2387_v42  ;;  %1919 = vperm.xlu1 %2199, %v1861_v63   ;;  %v1864_v33 = vsub.f32 %v1846_v28, %v4698_v29 }
 0x2c5   : > { %v2389_v46 = vpop.eup %2388 }
 0x2c6   : > { %v1850_v27 = vmul.f32 0.6931472, %v2389_v46  ;;  %v1863_v51 = vsub.f32 %v1844_v2, %v4704_v32  ;;  %1934 = vperm.xlu0 %2198, %v1864_v33  }
 0x2c7   : > { %v2391_v14 = vpop.eup %2390 }
 0x2c8   : > { %v1848_v20 = vmul.f32 0.6931472, %v2391_v14  ;;  %1929 = vperm.xlu1 %2199, %v1863_v51   ;;  %v1866_v7 = vsub.f32 %v1850_v27, %v4711_v49 }
 0x2ca   : > { %v1865_v1 = vsub.f32 %v1848_v20, %v4718_v60  ;;  %1944 = vperm.xlu0 %2198, %v1866_v7  }
 0x2cc   : > { %1939 = vperm.xlu1 %2199, %v1865_v1  }
 0x329   : > { %v1875_v41 = vpop.permute.xlu1 %1874 }
 0x32a   : > { %1948 = vst [vmem:[%s4756_s11 + $0x8] sm:$0xff] %v1875_v41 }
 0x32b   : > { %v1870_v29 = vpop.permute.xlu0 %1869 }
 0x32c   : > { %1947 = vst [vmem:[%s4756_s11] sm:$0xff] %v1870_v29 }
 0x32f   : > { %v1885_v49 = vpop.permute.xlu0 %1884 }
 0x330   : > { %v1880_v32 = vpop.permute.xlu1 %1879  ;;  %1950 = vst [vmem:[%s4756_s11 + $0x18] sm:$0xff] %v1885_v49 }
 0x331   : > { %1949 = vst [vmem:[%s4756_s11 + $0x10] sm:$0xff] %v1880_v32 }
 0x333   : > { %v1895_v55 = vpop.permute.xlu0 %1894 }
 0x334   : > { %1952 = vst [vmem:[%s4756_s11 + $0x28] sm:$0xff] %v1895_v55 }
 0x337   : > { %v1890_v60 = vpop.permute.xlu1 %1889 }
 0x338   : > { %1951 = vst [vmem:[%s4756_s11 + $0x20] sm:$0xff] %v1890_v60 }
 0x339   : > { %v1905_v12 = vpop.permute.xlu0 %1904 }
 0x33a   : > { %1954 = vst [vmem:[%s4756_s11 + $0x38] sm:$0xff] %v1905_v12 }
 0x33b   : > { %v1900_v24 = vpop.permute.xlu1 %1899 }
 0x33c   : > { %1953 = vst [vmem:[%s4756_s11 + $0x30] sm:$0xff] %v1900_v24 }
 0x33d   : > { %v1915_v54 = vpop.permute.xlu0 %1914 }
 0x33e   : > { %1956 = vst [vmem:[%s4756_s11 + $0x48] sm:$0xff] %v1915_v54 }
 0x33f   : > { %v1910_v10 = vpop.permute.xlu1 %1909 }
 0x340   : > { %1955 = vst [vmem:[%s4756_s11 + $0x40] sm:$0xff] %v1910_v10 }
 0x341   : > { %v1925_v61 = vpop.permute.xlu0 %1924 }
 0x342   : > { %1958 = vst [vmem:[%s4756_s11 + $0x58] sm:$0xff] %v1925_v61 }
 0x343   : > { %v1920_v39 = vpop.permute.xlu1 %1919 }
 0x344   : > { %1957 = vst [vmem:[%s4756_s11 + $0x50] sm:$0xff] %v1920_v39 }
 0x345   : > { %v1935_v37 = vpop.permute.xlu0 %1934 }
 0x346   : > { %1960 = vst [vmem:[%s4756_s11 + $0x68] sm:$0xff] %v1935_v37 }
 0x347   : > { %v1930_v21 = vpop.permute.xlu1 %1929 }
 0x348   : > { %1959 = vst [vmem:[%s4756_s11 + $0x60] sm:$0xff] %v1930_v21 }
 0x349   : > { %v1945_v50 = vpop.permute.xlu0 %1944 }
 0x34a   : > { %1962 = vst [vmem:[%s4756_s11 + $0x78] sm:$0xff] %v1945_v50 }
 0x34b   : > { %v1940_v44 = vpop.permute.xlu1 %1939 }
 0x34c   : > { %1961 = vst [vmem:[%s4756_s11 + $0x70] sm:$0xff] %v1940_v44 }
 0x34d   : > { %2421 = shalt.err (!%p2418_p7)
}
 0x34e   : > { %s2422_s5 = scalar_lea.hbm %s4777_s23, 2048  ;;  %s2426_s8 = scalar_lea.hbm %s4829_s4, 4096 }
 0x34f   : > { %p2423_p10 = scmp.ne.s32.totalorder %s4777_s23, %s2422_s5  ;;  %p2427_p13 = scmp.lt.u32.totalorder %s4777_s23, %s4829_s4 }
 0x350   : > { %p2428_p0 = scmp.lt.u32.totalorder %s2426_s8, %s2422_s5  ;;  %p2430_p2 = scmp.lt.u32.totalorder %s2422_s5, %s4777_s23 }
 0x351   : > { %p2424_p11 = pnand %p2423_p10, %p2545_p6 }
 0x352   : > { %p2429_p1 = por %p2428_p0, %p2427_p13 }
 0x353   : > { %p2425_p12 = pneg %p2424_p11 }
 0x354   : > { %p2431_p3 = por %p2430_p2, %p2429_p1 }
 0x356   : > { %p2432_p4 = pnand %p2431_p3, %p2425_p12 }
 0x358   : > { %2435 = shalt.err (!%p2432_p4)
}
 0x359   : > { %s2479_s11 = smov 128   ;;  %s2480_s12 = smov 8  }
 0x35a   : > { %2151 = dma.vmem_to_hbm [thread:$0]  (%p2545_p6), %s4779_s13, 2048, %s4777_s23, %s1964_s19, %s2479_s11, %s2479_s11, %s2480_s12  }
 0x35b PF: > { %s1992_s14 = sand.u32 1, %s2458_s15   ;;  %p2154_p5 = pnand %p2083_p9, %p2549_p8 }
 0x35c   : > { %s1993_s20 = scalar_lea.sflag [#allocation4], %s1992_s14 }
 0x35d   : > { %2453 = dma.done.wait (!%p2154_p5), %s1993_s20, 2048  }
 0x35e   : > { %2455 = vsyncadd (!%p2154_p5), %s1993_s20, 4294965248  ;;  %p14_p7 = scmp.ge.s32.totalorder %s2531_s21, 4   ;;  %s5392_s15 = smov %s2462_s16 }
 0x35f   : > { %s5393_s16 = smov %s2466_s17  ;;  %s5394_s17 = smov %s2543_s24 }
 0x360   : > { %s5395_s18 = smov %s2531_s21  ;;  %16 = sbr.rel (!%p14_p7) target bundleno = 3 (0x3), region = 126 }
 0x367   :  { %1998 = vsyncpa [#allocation4], 1 }
 0x368   :  { %2000 = vsyncpa [#allocation4 + $0x1], 1 }

</bundles_post_ra>
